<compile_context>
chip_gen: v7x
topology: tpu7x:2x2x1
jax: 0.10.0
libtpu: 0.0.40
codegen_flags: <defaults>
</compile_context>

<pallas_src>
import numpy as np
import jax
import jax.numpy as jnp
from jax.experimental import pallas as pl
from jax.experimental.pallas import tpu as pltpu  # noqa: F401  (TPU backend)

# ------------------------- model / graph hyper-params -------------------------
B = 2            # graphs in batch
NA_PER = 8       # atoms per graph
NM_PER = 4       # motif ("func_group") nodes per graph
NA = B * NA_PER
NM = B * NM_PER
EA = 2 * B * NA_PER   # atom-graph edges (bidirectional ring)
EM = 2 * B * NM_PER   # motif-graph edges
HID = 32         # args.hid_dim
HEADS = 4        # args.heads
D_K = HID // HEADS
EMB = 32         # emb_dim
STEP = 2         # args.step
ATOM_IN = 16     # args.atom_in_dim
SS_NODE_IN = 12  # args.ss_node_in_dim
BOND_IN = 8      # args.bond_in_dim
SS_EDGE_IN = 8   # args.ss_edge_in_dim
MOL_IN = 10      # args.mol_in_dim
# agg_op='sum', mol_FP='ss', attention=True, resdual=False assumed.

# bf16 VPU elementwise only on v6e / v7x (v5e and older: no bf16 VALU).
try:
    _DEV_KIND = jax.devices()[0].device_kind.lower()
except Exception:  # pragma: no cover
    _DEV_KIND = ""
_BF16_ELTWISE = not any(t in _DEV_KIND for t in ("v2", "v3", "v4", "v5"))


# ------------------------- fused whole-forward kernel -------------------------
def _forward_kernel(*refs):
    (  # ---- dynamic features ----
     af_ref, fnf_ref, mf_ref, bf_ref, fef_ref,
     # ---- static graph structure (0/1 one-hot, bf16) ----
     src_a, col_a, dst_a, src_m, dst_m, a2m, krep_ref, rsum_ref,
     # ---- encoders (BN folded, bf16 weights / f32 bias) ----
     aenc1_w, aenc1_b, aenc2_w, aenc2_b, menc1_w, menc1_b, menc2_w, menc2_b,
     # ---- NNConv edge nets + conv bias ----
     a_en_w, a_en_b, a_cv_b, m_en_w, m_en_b, m_cv_b,
     # ---- GRUs (fused r/z gate weights [2,2H,H]; split n gate) ----
     agru_wrz, agru_brz, agru_wnx, agru_wnh, agru_bnx, agru_bnh,
     mgru_wrz, mgru_brz, mgru_wnx, mgru_wnh, mgru_bnx, mgru_bnh,
     # ---- LocalAugmentation ----
     la_wq, la_wk, la_wv, la_wo, la_bo, la_M, la_MT,
     # ---- readouts ----
     aro_w, aro_b, mro_w, mro_b,
     # ---- edge_att MLP (w1 pre-split) ----
     ea_w1a, ea_w1b, ea_b1, ea_w2, ea_b2,
     # ---- mol_rep_projection MLP (w1 pre-split into wsum/max/mf blocks) ----
     mp_w1_ws, mp_w1_mx, mp_w1_mf, mp_b1, mp_w2, mp_b2,
     # ---- outputs ----
     edge_out, grep_out, molrep_out) = refs

    f32 = jnp.float32
    bfl = jnp.bfloat16

    def _b(x):
        return x if x.dtype == bfl else x.astype(bfl)

    def mxu(a, b):
        # bf16 MXU operands, f32 accumulation (weights already bf16 -> no cast)
        return jnp.dot(_b(a), _b(b), preferred_element_type=f32)

    def lin_relu(x, w, b):
        return jnp.maximum(mxu(x, w[...]) + b[...], 0.0)

    # ---- encoders: LinearBn(+fold) -> ReLU -> Dropout(id) -> LinearBn -> ReLU ----
    uaf = lin_relu(lin_relu(af_ref[...], aenc1_w, aenc1_b), aenc2_w, aenc2_b)
    ufnf = lin_relu(lin_relu(fnf_ref[...], menc1_w, menc1_b), menc2_w, menc2_b)

    # ---- static structure / kron helpers hoisted out of the STEP loop ----
    src_a_v = src_a[...]; src_m_v = src_m[...]
    dst_a_v = dst_a[...]; dst_m_v = dst_m[...]
    a2m_v = a2m[...]
    krep_v = krep_ref[...]                # [H, H*H]   row-repeat one-hot
    rsum_v = rsum_ref[...]                # [H*H, H]   strided column-sum one-hot

    # ---- NNConv per-edge weights (loop-invariant -> computed once, cast once) ----
    w_edge_cat = jnp.concatenate(
        [mxu(bf_ref[...], a_en_w[...]) + a_en_b[...],     # [EA, H*H]
         mxu(fef_ref[...], m_en_w[...]) + m_en_b[...]],   # [EM, H*H]
        axis=0)                                           # [EA+EM, H*H]
    if _BF16_ELTWISE:
        w_edge_cat = w_edge_cat.astype(bfl)               # cast ONCE, reused STEP times

    def nnconv_both(uaf_in, ufnf_in):
        # batched atom+motif: gather sources, kron-expand, per-edge matvec, split
        h_src = jnp.concatenate([mxu(src_a_v, uaf_in),
                                 mxu(src_m_v, ufnf_in)], axis=0)   # [EA+EM, H]
        h_rep = mxu(h_src, krep_v)                                 # [EA+EM, H*H]
        if _BF16_ELTWISE:
            prod = h_rep.astype(bfl) * w_edge_cat                  # bf16 VPU (v6e/v7x)
        else:
            prod = h_rep * w_edge_cat                              # f32 VPU (v5e)
        msgs = mxu(prod, rsum_v)                                   # [EA+EM, H]
        uam = mxu(dst_a_v, msgs[:EA, :]) + a_cv_b[...]             # [NA, H]
        ufnm = mxu(dst_m_v, msgs[EA:, :]) + m_cv_b[...]            # [NM, H]
        return uam, ufnm

    def gru(x, h, w_rz, b_rz, w_nx, w_nh, b_nx, b_nh):
        # torch.nn.GRUCell: r/z gates fused over [x|h] (K=2H); n gate split
        xh = jnp.concatenate([x, h], axis=1)                       # [N, 2H]
        r = jax.nn.sigmoid(mxu(xh, w_rz[0]) + b_rz[0])
        z = jax.nn.sigmoid(mxu(xh, w_rz[1]) + b_rz[1])
        n = jnp.tanh(mxu(x, w_nx[...]) + b_nx[...]
                     + r * (mxu(h, w_nh[...]) + b_nh[...]))
        return (1.0 - z) * n + z * h

    la_M_v = la_M[...]
    la_MT_v = la_MT[...]
    inv_dk = 1.0 / float(D_K)             # PyTorch LocalAugmentation divides by d_k

    def local_aug(fine, coarse, motif):
        # stack fine/coarse along rows so wk/wv/M/MT matmuls are issued once
        fc = jnp.concatenate([fine, coarse], axis=0)               # [2*NM, H]
        kk = mxu(fc, la_wk[...])                                   # [2*NM, H]
        vv = mxu(fc, la_wv[...])                                   # [2*NM, H]
        q = mxu(motif, la_wq[...])                                 # [NM, H]
        qq = jnp.concatenate([q, q], axis=0)                       # [2*NM, H]
        s = mxu(qq * kk, la_M_v) * inv_dk                          # [2*NM, heads]
        s1 = s[:NM, :]; s2 = s[NM:, :]
        m = jnp.maximum(s1, s2)
        e1 = jnp.exp(s1 - m); e2 = jnp.exp(s2 - m)
        inv = pl.reciprocal(e1 + e2, approx=True)
        w12 = jnp.concatenate([e1 * inv, e2 * inv], axis=0)        # [2*NM, heads]
        a = mxu(w12, la_MT_v)                                      # broadcast heads -> H lanes
        av = a * vv
        ctx = av[:NM, :] + av[NM:, :]                              # [NM, H]
        return mxu(ctx, la_wo[...]) + la_bo[...]

    # ---- message-passing steps (static unroll, STEP=2; activations stay in VMEM) ----
    # TODO(synk): if STEP grows past ~4, switch to lax.fori_loop to bound vreg live ranges.
    for _ in range(STEP):
        uam, ufnm = nnconv_both(uaf, ufnf)
        augment_ufnm = mxu(a2m_v, uam)              # atom -> func_group sum (agg_op='sum')
        ufnm = local_aug(augment_ufnm, ufnm, ufnf)
        ufnf = gru(ufnm, ufnf, mgru_wrz, mgru_brz, mgru_wnx, mgru_wnh, mgru_bnx, mgru_bnh)
        uaf = gru(uam, uaf, agru_wrz, agru_brz, agru_wnx, agru_wnh, agru_bnx, agru_bnh)

    # ---- attention readout: per-graph softmax-weighted-sum & per-graph max ----
    def readout(nf, w_ref, b_ref, npg):
        s = mxu(nf, w_ref[...]) + b_ref[...]        # [N, 1] node scores
        ws_rows, mx_rows = [], []
        for g in range(B):                          # static unroll (B graphs)
            lo = g * npg
            sg = s[lo:lo + npg, :]
            fg = nf[lo:lo + npg, :]
            e = jnp.exp(sg - jnp.max(sg, axis=0, keepdims=True))
            wgt = e * pl.reciprocal(jnp.sum(e, axis=0, keepdims=True), approx=True)
            ws_rows.append(jnp.sum(wgt * fg, axis=0, keepdims=True))
            mx_rows.append(jnp.max(fg, axis=0, keepdims=True))
        return (jnp.concatenate(ws_rows, axis=0),   # [B, H]
                jnp.concatenate(mx_rows, axis=0))   # [B, H]

    atom_ws, atom_mx = readout(uaf, aro_w, aro_b, NA_PER)
    motif_ws, motif_mx = readout(ufnf, mro_w, mro_b, NM_PER)
    mf_v = mf_ref[...]

    # ---- edge attention MLP (fused 2-layer; concat replaced by split weights) ----
    uaf_row = mxu(src_a_v, uaf)                     # uaf[row]
    uaf_col = mxu(col_a[...], uaf)                  # uaf[col]
    h1 = jnp.maximum(mxu(uaf_row, ea_w1a[...]) + mxu(uaf_col, ea_w1b[...])
                     + ea_b1[...], 0.0)
    scores = mxu(h1, ea_w2[...]) + ea_b2[...]       # [EA, 1]
    # lane-dense (1, EA) output: one-hot "transpose" (no masked per-lane stores)
    rid = jax.lax.broadcasted_iota(jnp.int32, (EA, EA), 0)
    cid = jax.lax.broadcasted_iota(jnp.int32, (EA, EA), 1)
    eye = (rid == cid).astype(jnp.float32)
    edge_out[...] = jnp.sum(scores * eye, axis=0, keepdims=True)   # [1, EA]

    # ---- mol_rep_projection(motif_representation = [motif_wsum | motif_max | mf]) ----
    g1 = jnp.maximum(mxu(motif_ws, mp_w1_ws[...]) + mxu(motif_mx, mp_w1_mx[...])
                     + mxu(mf_v, mp_w1_mf[...]) + mp_b1[...], 0.0)
    grep_out[...] = mxu(g1, mp_w2[...]) + mp_b2[...]

    # ---- mol_representation = [atom_ro | motif_ro | mf]  (mol_FP == 'ss') ----
    # single full-block store (no partial-lane masked stores)
    molrep_out[...] = jnp.concatenate(
        [atom_ws, atom_mx, motif_ws, motif_mx, mf_v], axis=1)


# ------------------------- host-side packing (done once) -------------------------
def _fold_bn(p):
    scale = p["gamma"] / jnp.sqrt(p["var"] + 1e-5)
    shift = p["beta"] - p["mean"] * scale
    return p["w"] * scale[None, :], (p["b"] * scale + shift).reshape(1, -1)


def _split_gru_fused(p):
    """r/z gates: stacked [x|h] weights [2, 2H, H] + summed bias; n gate split."""
    wx, wh, bx, bh = p["wx"], p["wh"], p["bx"], p["bh"]

    def gate(i):
        w = jnp.concatenate([wx[:, i * HID:(i + 1) * HID],
                             wh[:, i * HID:(i + 1) * HID]], axis=0)      # [2H, H]
        b = (bx[i * HID:(i + 1) * HID] + bh[i * HID:(i + 1) * HID]).reshape(1, HID)
        return w, b

    wr, br = gate(0)
    wz, bz = gate(1)
    w_rz = jnp.stack([wr, wz]).astype(jnp.bfloat16)   # [2, 2H, H]
    b_rz = jnp.stack([br, bz])                        # [2, 1, H] f32
    w_nx = wx[:, 2 * HID:].astype(jnp.bfloat16)
    w_nh = wh[:, 2 * HID:].astype(jnp.bfloat16)
    b_nx = bx[2 * HID:].reshape(1, HID)
    b_nh = bh[2 * HID:].reshape(1, HID)
    return w_rz, b_rz, w_nx, w_nh, b_nx, b_nh


def pack_inputs(params, graph):
    """All call-invariant inputs: folded/pre-cast bf16 weights + one-hot structure."""
    P = params
    bfl = jnp.bfloat16

    def bf(x):
        return jnp.asarray(x, bfl)

    def oh(idx, n):
        m = np.asarray(idx)[:, None] == np.arange(n)[None, :]
        return jnp.asarray(m, bfl)

    a1w, a1b = _fold_bn(P["atom_enc1"]); a2w, a2b = _fold_bn(P["atom_enc2"])
    m1w, m1b = _fold_bn(P["motif_enc1"]); m2w, m2b = _fold_bn(P["motif_enc2"])
    agru = _split_gru_fused(P["atom_gru"])
    mgru = _split_gru_fused(P["motif_gru"])

    src_a = oh(graph["a_src"], NA)          # [EA, NA] gather sources
    col_a = oh(graph["a_dst"], NA)          # [EA, NA] gather destinations
    dst_a = col_a.T                         # [NA, EA] scatter-sum to destinations
    src_m = oh(graph["m_src"], NM)
    dst_m = oh(graph["m_dst"], NM).T
    a2m = oh(graph["atom2motif"], NM).T     # [NM, NA]

    krep = jnp.asarray(np.kron(np.eye(HID), np.ones((1, HID))), bfl)   # [H, H*H]
    rsum = jnp.asarray(np.kron(np.ones((HID, 1)), np.eye(HID)), bfl)   # [H*H, H]

    M = (np.arange(HID)[:, None] // D_K == np.arange(HEADS)[None, :])  # head pooling
    la = P["LA"]; ea = P["edge_att"]; mp = P["mol_proj"]

    return [
        src_a, col_a, dst_a, src_m, dst_m, a2m, krep, rsum,
        bf(a1w), a1b, bf(a2w), a2b, bf(m1w), m1b, bf(m2w), m2b,
        bf(P["atom_mp"]["A"]), P["atom_mp"]["bA"].reshape(1, -1), P["atom_mp"]["bias"].reshape(1, -1),
        bf(P["motif_mp"]["A"]), P["motif_mp"]["bA"].reshape(1, -1), P["motif_mp"]["bias"].reshape(1, -1),
        *agru, *mgru,
        bf(la["wq"]), bf(la["wk"]), bf(la["wv"]), bf(la["wo"]), la["bo"].reshape(1, -1),
        jnp.asarray(M, bfl), jnp.asarray(M.T, bfl),
        bf(P["atom_ro"]["w"]), P["atom_ro"]["b"].reshape(1, 1),
        bf(P["motif_ro"]["w"]), P["motif_ro"]["b"].reshape(1, 1),
        bf(ea["w1"][:HID]), bf(ea["w1"][HID:]), ea["b1"].reshape(1, -1),
        bf(ea["w2"]), ea["b2"].reshape(1, 1),
        bf(mp["w1"][:HID]), bf(mp["w1"][HID:2 * HID]), bf(mp["w1"][2 * HID:]),
        mp["b1"].reshape(1, -1), bf(mp["w2"]), mp["b2"].reshape(1, -1),
    ]


def forward(packed, af, bf, fnf, fef, mf):
    inputs = [af, fnf, mf, bf, fef] + list(packed)
    edge_w, graph_rep, mol_rep = pl.pallas_call(
        _forward_kernel,
        out_shape=(
            jax.ShapeDtypeStruct((1, EA), jnp.float32),
            jax.ShapeDtypeStruct((B, EMB), jnp.float32),
            jax.ShapeDtypeStruct((B, 4 * HID + MOL_IN), jnp.float32),
        ),
    )(*inputs)
    # TODO(synk): gnn_encoder (GNN_node_Virtualnode), the classifier GNN, causal/spurious
    #             top-k edge splitting (np.argpartition + relabel + DataBatch re-batching),
    #             causal_rep_projection and mx_classifier depend on external torch_geometric /
    #             DGL machinery and data-dependent graph rebuilding; not translated here.
    return edge_w.reshape(-1), graph_rep, mol_rep


# ------------------------- parameters -------------------------
def init_params(key):
    keys = iter(jax.random.split(key, 64))

    def rnd(*shape):
        return 0.1 * jax.random.normal(next(keys), shape, dtype=jnp.float32)

    def linear_bn(din, dout):
        return dict(w=rnd(din, dout), b=rnd(dout),
                    gamma=1.0 + rnd(dout), beta=rnd(dout),
                    mean=jnp.zeros((dout,), jnp.float32),
                    var=jnp.ones((dout,), jnp.float32))

    def nnconv_p(edge_in):
        return dict(A=rnd(edge_in, HID * HID), bA=rnd(HID * HID), bias=rnd(HID))

    def gru_p():
        return dict(wx=rnd(HID, 3 * HID), wh=rnd(HID, 3 * HID),
                    bx=rnd(3 * HID), bh=rnd(3 * HID))

    return dict(
        atom_enc1=linear_bn(ATOM_IN, HID), atom_enc2=linear_bn(HID, HID),
        motif_enc1=linear_bn(SS_NODE_IN, HID), motif_enc2=linear_bn(HID, HID),
        motif_mp=nnconv_p(SS_EDGE_IN), atom_mp=nnconv_p(BOND_IN),
        motif_gru=gru_p(), atom_gru=gru_p(),
        atom_ro=dict(w=rnd(HID, 1), b=rnd(1)),
        motif_ro=dict(w=rnd(HID, 1), b=rnd(1)),
        LA=dict(wq=rnd(HID, HID), wk=rnd(HID, HID), wv=rnd(HID, HID),
                wo=rnd(HID, HID), bo=rnd(HID)),
        edge_att=dict(w1=rnd(2 * HID, 4 * EMB), b1=rnd(4 * EMB),
                      w2=rnd(4 * EMB, 1), b2=rnd(1)),
        mol_proj=dict(w1=rnd(2 * HID + MOL_IN, 4 * EMB), b1=rnd(4 * EMB),
                      w2=rnd(4 * EMB, EMB), b2=rnd(EMB)),
    )


# ------------------------- synthetic graph -------------------------
def build_graph():
    a_src, a_dst = [], []
    for g in range(B):
        for i in range(NA_PER):          # bidirectional ring over atoms
            u, v = g * NA_PER + i, g * NA_PER + (i + 1) % NA_PER
            a_src += [u, v]
            a_dst += [v, u]
    m_src, m_dst = [], []
    for g in range(B):
        for i in range(NM_PER):          # bidirectional ring over motifs
            u, v = g * NM_PER + i, g * NM_PER + (i + 1) % NM_PER
            m_src += [u, v]
            m_dst += [v, u]
    atom2motif = [g * NM_PER + (i // (NA_PER // NM_PER))
                  for g in range(B) for i in range(NA_PER)]
    return dict(
        a_src=np.array(a_src, np.int32), a_dst=np.array(a_dst, np.int32),
        m_src=np.array(m_src, np.int32), m_dst=np.array(m_dst, np.int32),
        atom2motif=np.array(atom2motif, np.int32),
    )


if __name__ == "__main__":
    key = jax.random.PRNGKey(0)
    kp, ka, kb, kf, ke, km = jax.random.split(key, 6)
    params = init_params(kp)
    graph = build_graph()
    packed = pack_inputs(params, graph)

    af = jax.random.normal(ka, (NA, ATOM_IN), jnp.float32)       # atom features
    bf = jax.random.normal(kb, (EA, BOND_IN), jnp.float32)       # bond features
    fnf = jax.random.normal(kf, (NM, SS_NODE_IN), jnp.float32)   # motif node features
    fef = jax.random.normal(ke, (EM, SS_EDGE_IN), jnp.float32)   # motif edge features
    mf = jax.random.normal(km, (B, MOL_IN), jnp.float32)         # molecular fingerprint

    fwd = jax.jit(forward)
    out = fwd(packed, af, bf, fnf, fef, mf)
    out = jax.block_until_ready(out)
    assert out[0].shape == (EA,)
    assert out[1].shape == (B, EMB)
    assert out[2].shape == (B, 2 * HID + 2 * HID + MOL_IN)
    assert all(bool(jnp.all(jnp.isfinite(o))) for o in out)
    print("KERNEL_OK")
</pallas_src>

<mosaic_0001>
module attributes {stable_mosaic.version = 11 : i64} {
  func.func @_forward_kernel(%arg0: memref<16x16xf32, #tpu.memory_space<vmem>>, %arg1: memref<8x12xf32, #tpu.memory_space<vmem>>, %arg2: memref<2x10xf32, #tpu.memory_space<vmem>>, %arg3: memref<32x8xf32, #tpu.memory_space<vmem>>, %arg4: memref<16x8xf32, #tpu.memory_space<vmem>>, %arg5: memref<32x16xbf16, #tpu.memory_space<vmem>>, %arg6: memref<32x16xbf16, #tpu.memory_space<vmem>>, %arg7: memref<16x32xbf16, #tpu.memory_space<vmem>>, %arg8: memref<16x8xbf16, #tpu.memory_space<vmem>>, %arg9: memref<8x16xbf16, #tpu.memory_space<vmem>>, %arg10: memref<8x16xbf16, #tpu.memory_space<vmem>>, %arg11: memref<32x1024xbf16, #tpu.memory_space<vmem>>, %arg12: memref<1024x32xbf16, #tpu.memory_space<vmem>>, %arg13: memref<16x32xbf16, #tpu.memory_space<vmem>>, %arg14: memref<1x32xf32, #tpu.memory_space<vmem>>, %arg15: memref<32x32xbf16, #tpu.memory_space<vmem>>, %arg16: memref<1x32xf32, #tpu.memory_space<vmem>>, %arg17: memref<12x32xbf16, #tpu.memory_space<vmem>>, %arg18: memref<1x32xf32, #tpu.memory_space<vmem>>, %arg19: memref<32x32xbf16, #tpu.memory_space<vmem>>, %arg20: memref<1x32xf32, #tpu.memory_space<vmem>>, %arg21: memref<8x1024xbf16, #tpu.memory_space<vmem>>, %arg22: memref<1x1024xf32, #tpu.memory_space<vmem>>, %arg23: memref<1x32xf32, #tpu.memory_space<vmem>>, %arg24: memref<8x1024xbf16, #tpu.memory_space<vmem>>, %arg25: memref<1x1024xf32, #tpu.memory_space<vmem>>, %arg26: memref<1x32xf32, #tpu.memory_space<vmem>>, %arg27: memref<2x64x32xbf16, #tpu.memory_space<vmem>>, %arg28: memref<2x1x32xf32, #tpu.memory_space<vmem>>, %arg29: memref<32x32xbf16, #tpu.memory_space<vmem>>, %arg30: memref<32x32xbf16, #tpu.memory_space<vmem>>, %arg31: memref<1x32xf32, #tpu.memory_space<vmem>>, %arg32: memref<1x32xf32, #tpu.memory_space<vmem>>, %arg33: memref<2x64x32xbf16, #tpu.memory_space<vmem>>, %arg34: memref<2x1x32xf32, #tpu.memory_space<vmem>>, %arg35: memref<32x32xbf16, #tpu.memory_space<vmem>>, %arg36: memref<32x32xbf16, #tpu.memory_space<vmem>>, %arg37: memref<1x32xf32, #tpu.memory_space<vmem>>, %arg38: memref<1x32xf32, #tpu.memory_space<vmem>>, %arg39: memref<32x32xbf16, #tpu.memory_space<vmem>>, %arg40: memref<32x32xbf16, #tpu.memory_space<vmem>>, %arg41: memref<32x32xbf16, #tpu.memory_space<vmem>>, %arg42: memref<32x32xbf16, #tpu.memory_space<vmem>>, %arg43: memref<1x32xf32, #tpu.memory_space<vmem>>, %arg44: memref<32x4xbf16, #tpu.memory_space<vmem>>, %arg45: memref<4x32xbf16, #tpu.memory_space<vmem>>, %arg46: memref<32x1xbf16, #tpu.memory_space<vmem>>, %arg47: memref<1x1xf32, #tpu.memory_space<vmem>>, %arg48: memref<32x1xbf16, #tpu.memory_space<vmem>>, %arg49: memref<1x1xf32, #tpu.memory_space<vmem>>, %arg50: memref<32x128xbf16, #tpu.memory_space<vmem>>, %arg51: memref<32x128xbf16, #tpu.memory_space<vmem>>, %arg52: memref<1x128xf32, #tpu.memory_space<vmem>>, %arg53: memref<128x1xbf16, #tpu.memory_space<vmem>>, %arg54: memref<1x1xf32, #tpu.memory_space<vmem>>, %arg55: memref<32x128xbf16, #tpu.memory_space<vmem>>, %arg56: memref<32x128xbf16, #tpu.memory_space<vmem>>, %arg57: memref<10x128xbf16, #tpu.memory_space<vmem>>, %arg58: memref<1x128xf32, #tpu.memory_space<vmem>>, %arg59: memref<128x32xbf16, #tpu.memory_space<vmem>>, %arg60: memref<1x32xf32, #tpu.memory_space<vmem>>, %arg61: memref<1x32xf32, #tpu.memory_space<vmem>>, %arg62: memref<2x32xf32, #tpu.memory_space<vmem>>, %arg63: memref<2x138xf32, #tpu.memory_space<vmem>>) attributes {dimension_semantics = [], scalar_prefetch = 0 : i64, scratch_operands = 0 : i64, tpu.core_type = #tpu.core_type<tc>} {
    %c0 = arith.constant 0 : index
    %c0_0 = arith.constant 0 : index
    %0 = vector.load %arg0[%c0, %c0_0] : memref<16x16xf32, #tpu.memory_space<vmem>>, vector<16x16xf32>
    %c0_1 = arith.constant 0 : index
    %c0_2 = arith.constant 0 : index
    %1 = vector.load %arg13[%c0_1, %c0_2] : memref<16x32xbf16, #tpu.memory_space<vmem>>, vector<16x32xbf16>
    %2 = arith.truncf %0 : vector<16x16xf32> to vector<16x16xbf16>
    %cst = arith.constant dense<0.000000e+00> : vector<16x32xf32>
    %3 = tpu.matmul %2, %1, %cst {dimension_numbers = #tpu.dot_dimension_numbers<[1], [0], [0], [1], [0, 0, 1, 1], [], []>} : vector<16x16xbf16>, vector<16x32xbf16>, vector<16x32xf32> -> vector<16x32xf32>
    %c0_3 = arith.constant 0 : index
    %c0_4 = arith.constant 0 : index
    %4 = vector.load %arg14[%c0_3, %c0_4] : memref<1x32xf32, #tpu.memory_space<vmem>>, vector<1x32xf32>
    %5 = vector.broadcast %4 : vector<1x32xf32> to vector<16x32xf32>
    %6 = arith.addf %3, %5 : vector<16x32xf32>
    %cst_5 = arith.constant 0.000000e+00 : f32
    %7 = vector.broadcast %cst_5 : f32 to vector<16x32xf32>
    %8 = arith.maximumf %6, %7 : vector<16x32xf32>
    %c0_6 = arith.constant 0 : index
    %c0_7 = arith.constant 0 : index
    %9 = vector.load %arg15[%c0_6, %c0_7] : memref<32x32xbf16, #tpu.memory_space<vmem>>, vector<32x32xbf16>
    %10 = arith.truncf %8 : vector<16x32xf32> to vector<16x32xbf16>
    %cst_8 = arith.constant dense<0.000000e+00> : vector<16x32xf32>
    %11 = tpu.matmul %10, %9, %cst_8 {dimension_numbers = #tpu.dot_dimension_numbers<[1], [0], [0], [1], [0, 0, 1, 1], [], []>} : vector<16x32xbf16>, vector<32x32xbf16>, vector<16x32xf32> -> vector<16x32xf32>
    %c0_9 = arith.constant 0 : index
    %c0_10 = arith.constant 0 : index
    %12 = vector.load %arg16[%c0_9, %c0_10] : memref<1x32xf32, #tpu.memory_space<vmem>>, vector<1x32xf32>
    %13 = vector.broadcast %12 : vector<1x32xf32> to vector<16x32xf32>
    %14 = arith.addf %11, %13 : vector<16x32xf32>
    %cst_11 = arith.constant 0.000000e+00 : f32
    %15 = vector.broadcast %cst_11 : f32 to vector<16x32xf32>
    %16 = arith.maximumf %14, %15 : vector<16x32xf32>
    %c0_12 = arith.constant 0 : index
    %c0_13 = arith.constant 0 : index
    %17 = vector.load %arg1[%c0_12, %c0_13] : memref<8x12xf32, #tpu.memory_space<vmem>>, vector<8x12xf32>
    %c0_14 = arith.constant 0 : index
    %c0_15 = arith.constant 0 : index
    %18 = vector.load %arg17[%c0_14, %c0_15] : memref<12x32xbf16, #tpu.memory_space<vmem>>, vector<12x32xbf16>
    %19 = arith.truncf %17 : vector<8x12xf32> to vector<8x12xbf16>
    %cst_16 = arith.constant dense<0.000000e+00> : vector<8x32xf32>
    %20 = tpu.matmul %19, %18, %cst_16 {dimension_numbers = #tpu.dot_dimension_numbers<[1], [0], [0], [1], [0, 0, 1, 1], [], []>} : vector<8x12xbf16>, vector<12x32xbf16>, vector<8x32xf32> -> vector<8x32xf32>
    %c0_17 = arith.constant 0 : index
    %c0_18 = arith.constant 0 : index
    %21 = vector.load %arg18[%c0_17, %c0_18] : memref<1x32xf32, #tpu.memory_space<vmem>>, vector<1x32xf32>
    %22 = vector.broadcast %21 : vector<1x32xf32> to vector<8x32xf32>
    %23 = arith.addf %20, %22 : vector<8x32xf32>
    %cst_19 = arith.constant 0.000000e+00 : f32
    %24 = vector.broadcast %cst_19 : f32 to vector<8x32xf32>
    %25 = arith.maximumf %23, %24 : vector<8x32xf32>
    %c0_20 = arith.constant 0 : index
    %c0_21 = arith.constant 0 : index
    %26 = vector.load %arg19[%c0_20, %c0_21] : memref<32x32xbf16, #tpu.memory_space<vmem>>, vector<32x32xbf16>
    %27 = arith.truncf %25 : vector<8x32xf32> to vector<8x32xbf16>
    %cst_22 = arith.constant dense<0.000000e+00> : vector<8x32xf32>
    %28 = tpu.matmul %27, %26, %cst_22 {dimension_numbers = #tpu.dot_dimension_numbers<[1], [0], [0], [1], [0, 0, 1, 1], [], []>} : vector<8x32xbf16>, vector<32x32xbf16>, vector<8x32xf32> -> vector<8x32xf32>
    %c0_23 = arith.constant 0 : index
    %c0_24 = arith.constant 0 : index
    %29 = vector.load %arg20[%c0_23, %c0_24] : memref<1x32xf32, #tpu.memory_space<vmem>>, vector<1x32xf32>
    %30 = vector.broadcast %29 : vector<1x32xf32> to vector<8x32xf32>
    %31 = arith.addf %28, %30 : vector<8x32xf32>
    %cst_25 = arith.constant 0.000000e+00 : f32
    %32 = vector.broadcast %cst_25 : f32 to vector<8x32xf32>
    %33 = arith.maximumf %31, %32 : vector<8x32xf32>
    %c0_26 = arith.constant 0 : index
    %c0_27 = arith.constant 0 : index
    %34 = vector.load %arg5[%c0_26, %c0_27] : memref<32x16xbf16, #tpu.memory_space<vmem>>, vector<32x16xbf16>
    %c0_28 = arith.constant 0 : index
    %c0_29 = arith.constant 0 : index
    %35 = vector.load %arg8[%c0_28, %c0_29] : memref<16x8xbf16, #tpu.memory_space<vmem>>, vector<16x8xbf16>
    %c0_30 = arith.constant 0 : index
    %c0_31 = arith.constant 0 : index
    %36 = vector.load %arg7[%c0_30, %c0_31] : memref<16x32xbf16, #tpu.memory_space<vmem>>, vector<16x32xbf16>
    %c0_32 = arith.constant 0 : index
    %c0_33 = arith.constant 0 : index
    %37 = vector.load %arg9[%c0_32, %c0_33] : memref<8x16xbf16, #tpu.memory_space<vmem>>, vector<8x16xbf16>
    %c0_34 = arith.constant 0 : index
    %c0_35 = arith.constant 0 : index
    %38 = vector.load %arg10[%c0_34, %c0_35] : memref<8x16xbf16, #tpu.memory_space<vmem>>, vector<8x16xbf16>
    %c0_36 = arith.constant 0 : index
    %c0_37 = arith.constant 0 : index
    %39 = vector.load %arg11[%c0_36, %c0_37] : memref<32x1024xbf16, #tpu.memory_space<vmem>>, vector<32x1024xbf16>
    %c0_38 = arith.constant 0 : index
    %c0_39 = arith.constant 0 : index
    %40 = vector.load %arg12[%c0_38, %c0_39] : memref<1024x32xbf16, #tpu.memory_space<vmem>>, vector<1024x32xbf16>
    %c0_40 = arith.constant 0 : index
    %c0_41 = arith.constant 0 : index
    %41 = vector.load %arg3[%c0_40, %c0_41] : memref<32x8xf32, #tpu.memory_space<vmem>>, vector<32x8xf32>
    %c0_42 = arith.constant 0 : index
    %c0_43 = arith.constant 0 : index
    %42 = vector.load %arg21[%c0_42, %c0_43] : memref<8x1024xbf16, #tpu.memory_space<vmem>>, vector<8x1024xbf16>
    %43 = arith.truncf %41 : vector<32x8xf32> to vector<32x8xbf16>
    %cst_44 = arith.constant dense<0.000000e+00> : vector<32x1024xf32>
    %44 = tpu.matmul %43, %42, %cst_44 {dimension_numbers = #tpu.dot_dimension_numbers<[1], [0], [0], [1], [0, 0, 1, 1], [], []>} : vector<32x8xbf16>, vector<8x1024xbf16>, vector<32x1024xf32> -> vector<32x1024xf32>
    %c0_45 = arith.constant 0 : index
    %c0_46 = arith.constant 0 : index
    %45 = vector.load %arg22[%c0_45, %c0_46] : memref<1x1024xf32, #tpu.memory_space<vmem>>, vector<1x1024xf32>
    %46 = vector.broadcast %45 : vector<1x1024xf32> to vector<32x1024xf32>
    %47 = arith.addf %44, %46 : vector<32x1024xf32>
    %c0_47 = arith.constant 0 : index
    %c0_48 = arith.constant 0 : index
    %48 = vector.load %arg4[%c0_47, %c0_48] : memref<16x8xf32, #tpu.memory_space<vmem>>, vector<16x8xf32>
    %c0_49 = arith.constant 0 : index
    %c0_50 = arith.constant 0 : index
    %49 = vector.load %arg24[%c0_49, %c0_50] : memref<8x1024xbf16, #tpu.memory_space<vmem>>, vector<8x1024xbf16>
    %50 = arith.truncf %48 : vector<16x8xf32> to vector<16x8xbf16>
    %cst_51 = arith.constant dense<0.000000e+00> : vector<16x1024xf32>
    %51 = tpu.matmul %50, %49, %cst_51 {dimension_numbers = #tpu.dot_dimension_numbers<[1], [0], [0], [1], [0, 0, 1, 1], [], []>} : vector<16x8xbf16>, vector<8x1024xbf16>, vector<16x1024xf32> -> vector<16x1024xf32>
    %c0_52 = arith.constant 0 : index
    %c0_53 = arith.constant 0 : index
    %52 = vector.load %arg25[%c0_52, %c0_53] : memref<1x1024xf32, #tpu.memory_space<vmem>>, vector<1x1024xf32>
    %53 = vector.broadcast %52 : vector<1x1024xf32> to vector<16x1024xf32>
    %54 = arith.addf %51, %53 : vector<16x1024xf32>
    %55 = tpu.concatenate %47, %54 in 0 : vector<32x1024xf32>, vector<16x1024xf32> -> vector<48x1024xf32>
    %56 = arith.truncf %55 : vector<48x1024xf32> to vector<48x1024xbf16>
    %c0_54 = arith.constant 0 : index
    %c0_55 = arith.constant 0 : index
    %57 = vector.load %arg44[%c0_54, %c0_55] : memref<32x4xbf16, #tpu.memory_space<vmem>>, vector<32x4xbf16>
    %c0_56 = arith.constant 0 : index
    %c0_57 = arith.constant 0 : index
    %58 = vector.load %arg45[%c0_56, %c0_57] : memref<4x32xbf16, #tpu.memory_space<vmem>>, vector<4x32xbf16>
    %59 = arith.truncf %16 : vector<16x32xf32> to vector<16x32xbf16>
    %cst_58 = arith.constant dense<0.000000e+00> : vector<32x32xf32>
    %60 = tpu.matmul %34, %59, %cst_58 {dimension_numbers = #tpu.dot_dimension_numbers<[1], [0], [0], [1], [0, 0, 1, 1], [], []>} : vector<32x16xbf16>, vector<16x32xbf16>, vector<32x32xf32> -> vector<32x32xf32>
    %61 = arith.truncf %33 : vector<8x32xf32> to vector<8x32xbf16>
    %cst_59 = arith.constant dense<0.000000e+00> : vector<16x32xf32>
    %62 = tpu.matmul %35, %61, %cst_59 {dimension_numbers = #tpu.dot_dimension_numbers<[1], [0], [0], [1], [0, 0, 1, 1], [], []>} : vector<16x8xbf16>, vector<8x32xbf16>, vector<16x32xf32> -> vector<16x32xf32>
    %63 = tpu.concatenate %60, %62 in 0 : vector<32x32xf32>, vector<16x32xf32> -> vector<48x32xf32>
    %64 = arith.truncf %63 : vector<48x32xf32> to vector<48x32xbf16>
    %cst_60 = arith.constant dense<0.000000e+00> : vector<48x1024xf32>
    %65 = tpu.matmul %64, %39, %cst_60 {dimension_numbers = #tpu.dot_dimension_numbers<[1], [0], [0], [1], [0, 0, 1, 1], [], []>} : vector<48x32xbf16>, vector<32x1024xbf16>, vector<48x1024xf32> -> vector<48x1024xf32>
    %66 = arith.truncf %65 : vector<48x1024xf32> to vector<48x1024xbf16>
    %67 = arith.mulf %66, %56 : vector<48x1024xbf16>
    %cst_61 = arith.constant dense<0.000000e+00> : vector<48x32xf32>
    %68 = tpu.matmul %67, %40, %cst_61 {dimension_numbers = #tpu.dot_dimension_numbers<[1], [0], [0], [1], [0, 0, 1, 1], [], []>} : vector<48x1024xbf16>, vector<1024x32xbf16>, vector<48x32xf32> -> vector<48x32xf32>
    %69 = vector.extract_strided_slice %68 {offsets = [0, 0], sizes = [32, 32], strides = [1, 1]} : vector<48x32xf32> to vector<32x32xf32>
    %70 = arith.truncf %69 : vector<32x32xf32> to vector<32x32xbf16>
    %cst_62 = arith.constant dense<0.000000e+00> : vector<16x32xf32>
    %71 = tpu.matmul %36, %70, %cst_62 {dimension_numbers = #tpu.dot_dimension_numbers<[1], [0], [0], [1], [0, 0, 1, 1], [], []>} : vector<16x32xbf16>, vector<32x32xbf16>, vector<16x32xf32> -> vector<16x32xf32>
    %c0_63 = arith.constant 0 : index
    %c0_64 = arith.constant 0 : index
    %72 = vector.load %arg23[%c0_63, %c0_64] : memref<1x32xf32, #tpu.memory_space<vmem>>, vector<1x32xf32>
    %73 = vector.broadcast %72 : vector<1x32xf32> to vector<16x32xf32>
    %74 = arith.addf %71, %73 : vector<16x32xf32>
    %75 = vector.extract_strided_slice %68 {offsets = [32, 0], sizes = [16, 32], strides = [1, 1]} : vector<48x32xf32> to vector<16x32xf32>
    %76 = arith.truncf %75 : vector<16x32xf32> to vector<16x32xbf16>
    %cst_65 = arith.constant dense<0.000000e+00> : vector<8x32xf32>
    %77 = tpu.matmul %37, %76, %cst_65 {dimension_numbers = #tpu.dot_dimension_numbers<[1], [0], [0], [1], [0, 0, 1, 1], [], []>} : vector<8x16xbf16>, vector<16x32xbf16>, vector<8x32xf32> -> vector<8x32xf32>
    %c0_66 = arith.constant 0 : index
    %c0_67 = arith.constant 0 : index
    %78 = vector.load %arg26[%c0_66, %c0_67] : memref<1x32xf32, #tpu.memory_space<vmem>>, vector<1x32xf32>
    %79 = vector.broadcast %78 : vector<1x32xf32> to vector<8x32xf32>
    %80 = arith.addf %77, %79 : vector<8x32xf32>
    %81 = arith.truncf %74 : vector<16x32xf32> to vector<16x32xbf16>
    %cst_68 = arith.constant dense<0.000000e+00> : vector<8x32xf32>
    %82 = tpu.matmul %38, %81, %cst_68 {dimension_numbers = #tpu.dot_dimension_numbers<[1], [0], [0], [1], [0, 0, 1, 1], [], []>} : vector<8x16xbf16>, vector<16x32xbf16>, vector<8x32xf32> -> vector<8x32xf32>
    %83 = tpu.concatenate %82, %80 in 0 : vector<8x32xf32>, vector<8x32xf32> -> vector<16x32xf32>
    %c0_69 = arith.constant 0 : index
    %c0_70 = arith.constant 0 : index
    %84 = vector.load %arg40[%c0_69, %c0_70] : memref<32x32xbf16, #tpu.memory_space<vmem>>, vector<32x32xbf16>
    %85 = arith.truncf %83 : vector<16x32xf32> to vector<16x32xbf16>
    %cst_71 = arith.constant dense<0.000000e+00> : vector<16x32xf32>
    %86 = tpu.matmul %85, %84, %cst_71 {dimension_numbers = #tpu.dot_dimension_numbers<[1], [0], [0], [1], [0, 0, 1, 1], [], []>} : vector<16x32xbf16>, vector<32x32xbf16>, vector<16x32xf32> -> vector<16x32xf32>
    %c0_72 = arith.constant 0 : index
    %c0_73 = arith.constant 0 : index
    %87 = vector.load %arg41[%c0_72, %c0_73] : memref<32x32xbf16, #tpu.memory_space<vmem>>, vector<32x32xbf16>
    %88 = arith.truncf %83 : vector<16x32xf32> to vector<16x32xbf16>
    %cst_74 = arith.constant dense<0.000000e+00> : vector<16x32xf32>
    %89 = tpu.matmul %88, %87, %cst_74 {dimension_numbers = #tpu.dot_dimension_numbers<[1], [0], [0], [1], [0, 0, 1, 1], [], []>} : vector<16x32xbf16>, vector<32x32xbf16>, vector<16x32xf32> -> vector<16x32xf32>
    %c0_75 = arith.constant 0 : index
    %c0_76 = arith.constant 0 : index
    %90 = vector.load %arg39[%c0_75, %c0_76] : memref<32x32xbf16, #tpu.memory_space<vmem>>, vector<32x32xbf16>
    %91 = arith.truncf %33 : vector<8x32xf32> to vector<8x32xbf16>
    %cst_77 = arith.constant dense<0.000000e+00> : vector<8x32xf32>
    %92 = tpu.matmul %91, %90, %cst_77 {dimension_numbers = #tpu.dot_dimension_numbers<[1], [0], [0], [1], [0, 0, 1, 1], [], []>} : vector<8x32xbf16>, vector<32x32xbf16>, vector<8x32xf32> -> vector<8x32xf32>
    %93 = tpu.concatenate %92, %92 in 0 : vector<8x32xf32>, vector<8x32xf32> -> vector<16x32xf32>
    %94 = arith.mulf %93, %86 : vector<16x32xf32>
    %95 = arith.truncf %94 : vector<16x32xf32> to vector<16x32xbf16>
    %cst_78 = arith.constant dense<0.000000e+00> : vector<16x4xf32>
    %96 = tpu.matmul %95, %57, %cst_78 {dimension_numbers = #tpu.dot_dimension_numbers<[1], [0], [0], [1], [0, 0, 1, 1], [], []>} : vector<16x32xbf16>, vector<32x4xbf16>, vector<16x4xf32> -> vector<16x4xf32>
    %cst_79 = arith.constant 1.250000e-01 : f32
    %97 = vector.broadcast %cst_79 : f32 to vector<16x4xf32>
    %98 = arith.mulf %96, %97 : vector<16x4xf32>
    %99 = vector.extract_strided_slice %98 {offsets = [0, 0], sizes = [8, 4], strides = [1, 1]} : vector<16x4xf32> to vector<8x4xf32>
    %100 = vector.extract_strided_slice %98 {offsets = [8, 0], sizes = [8, 4], strides = [1, 1]} : vector<16x4xf32> to vector<8x4xf32>
    %101 = arith.maximumf %99, %100 : vector<8x4xf32>
    %102 = arith.subf %99, %101 : vector<8x4xf32>
    %103 = math.exp %102 : vector<8x4xf32>
    %104 = arith.subf %100, %101 : vector<8x4xf32>
    %105 = math.exp %104 : vector<8x4xf32>
    %106 = arith.addf %103, %105 : vector<8x4xf32>
    %107 = tpu.reciprocal %106 {approx = true} : vector<8x4xf32> -> vector<8x4xf32>
    %108 = arith.mulf %103, %107 : vector<8x4xf32>
    %109 = arith.mulf %105, %107 : vector<8x4xf32>
    %110 = tpu.concatenate %108, %109 in 0 : vector<8x4xf32>, vector<8x4xf32> -> vector<16x4xf32>
    %111 = arith.truncf %110 : vector<16x4xf32> to vector<16x4xbf16>
    %cst_80 = arith.constant dense<0.000000e+00> : vector<16x32xf32>
    %112 = tpu.matmul %111, %58, %cst_80 {dimension_numbers = #tpu.dot_dimension_numbers<[1], [0], [0], [1], [0, 0, 1, 1], [], []>} : vector<16x4xbf16>, vector<4x32xbf16>, vector<16x32xf32> -> vector<16x32xf32>
    %113 = arith.mulf %112, %89 : vector<16x32xf32>
    %114 = vector.extract_strided_slice %113 {offsets = [0, 0], sizes = [8, 32], strides = [1, 1]} : vector<16x32xf32> to vector<8x32xf32>
    %115 = vector.extract_strided_slice %113 {offsets = [8, 0], sizes = [8, 32], strides = [1, 1]} : vector<16x32xf32> to vector<8x32xf32>
    %116 = arith.addf %114, %115 : vector<8x32xf32>
    %c0_81 = arith.constant 0 : index
    %c0_82 = arith.constant 0 : index
    %117 = vector.load %arg42[%c0_81, %c0_82] : memref<32x32xbf16, #tpu.memory_space<vmem>>, vector<32x32xbf16>
    %118 = arith.truncf %116 : vector<8x32xf32> to vector<8x32xbf16>
    %cst_83 = arith.constant dense<0.000000e+00> : vector<8x32xf32>
    %119 = tpu.matmul %118, %117, %cst_83 {dimension_numbers = #tpu.dot_dimension_numbers<[1], [0], [0], [1], [0, 0, 1, 1], [], []>} : vector<8x32xbf16>, vector<32x32xbf16>, vector<8x32xf32> -> vector<8x32xf32>
    %c0_84 = arith.constant 0 : index
    %c0_85 = arith.constant 0 : index
    %120 = vector.load %arg43[%c0_84, %c0_85] : memref<1x32xf32, #tpu.memory_space<vmem>>, vector<1x32xf32>
    %121 = vector.broadcast %120 : vector<1x32xf32> to vector<8x32xf32>
    %122 = arith.addf %119, %121 : vector<8x32xf32>
    %123 = tpu.concatenate %122, %33 in 1 : vector<8x32xf32>, vector<8x32xf32> -> vector<8x64xf32>
    %c0_86 = arith.constant 0 : index
    %c0_87 = arith.constant 0 : index
    %c0_88 = arith.constant 0 : index
    %124 = vector.load %arg33[%c0_86, %c0_87, %c0_88] : memref<2x64x32xbf16, #tpu.memory_space<vmem>>, vector<1x64x32xbf16>
    %125 = vector.shape_cast %124 : vector<1x64x32xbf16> to vector<64x32xbf16>
    %126 = arith.truncf %123 : vector<8x64xf32> to vector<8x64xbf16>
    %cst_89 = arith.constant dense<0.000000e+00> : vector<8x32xf32>
    %127 = tpu.matmul %126, %125, %cst_89 {dimension_numbers = #tpu.dot_dimension_numbers<[1], [0], [0], [1], [0, 0, 1, 1], [], []>} : vector<8x64xbf16>, vector<64x32xbf16>, vector<8x32xf32> -> vector<8x32xf32>
    %c0_90 = arith.constant 0 : index
    %c0_91 = arith.constant 0 : index
    %c0_92 = arith.constant 0 : index
    %128 = vector.load %arg34[%c0_90, %c0_91, %c0_92] : memref<2x1x32xf32, #tpu.memory_space<vmem>>, vector<1x1x32xf32>
    %129 = vector.shape_cast %128 : vector<1x1x32xf32> to vector<1x32xf32>
    %130 = vector.broadcast %129 : vector<1x32xf32> to vector<8x32xf32>
    %131 = arith.addf %127, %130 : vector<8x32xf32>
    %132 = arith.negf %131 : vector<8x32xf32>
    %133 = math.exp %132 : vector<8x32xf32>
    %cst_93 = arith.constant 1.000000e+00 : f32
    %134 = vector.broadcast %cst_93 : f32 to vector<8x32xf32>
    %135 = arith.addf %134, %133 : vector<8x32xf32>
    %136 = arith.divf %134, %135 : vector<8x32xf32>
    %c1 = arith.constant 1 : index
    %c0_94 = arith.constant 0 : index
    %c0_95 = arith.constant 0 : index
    %137 = vector.load %arg33[%c1, %c0_94, %c0_95] : memref<2x64x32xbf16, #tpu.memory_space<vmem>>, vector<1x64x32xbf16>
    %138 = vector.shape_cast %137 : vector<1x64x32xbf16> to vector<64x32xbf16>
    %139 = arith.truncf %123 : vector<8x64xf32> to vector<8x64xbf16>
    %cst_96 = arith.constant dense<0.000000e+00> : vector<8x32xf32>
    %140 = tpu.matmul %139, %138, %cst_96 {dimension_numbers = #tpu.dot_dimension_numbers<[1], [0], [0], [1], [0, 0, 1, 1], [], []>} : vector<8x64xbf16>, vector<64x32xbf16>, vector<8x32xf32> -> vector<8x32xf32>
    %c1_97 = arith.constant 1 : index
    %c0_98 = arith.constant 0 : index
    %c0_99 = arith.constant 0 : index
    %141 = vector.load %arg34[%c1_97, %c0_98, %c0_99] : memref<2x1x32xf32, #tpu.memory_space<vmem>>, vector<1x1x32xf32>
    %142 = vector.shape_cast %141 : vector<1x1x32xf32> to vector<1x32xf32>
    %143 = vector.broadcast %142 : vector<1x32xf32> to vector<8x32xf32>
    %144 = arith.addf %140, %143 : vector<8x32xf32>
    %145 = arith.negf %144 : vector<8x32xf32>
    %146 = math.exp %145 : vector<8x32xf32>
    %cst_100 = arith.constant 1.000000e+00 : f32
    %147 = vector.broadcast %cst_100 : f32 to vector<8x32xf32>
    %148 = arith.addf %147, %146 : vector<8x32xf32>
    %149 = arith.divf %147, %148 : vector<8x32xf32>
    %c0_101 = arith.constant 0 : index
    %c0_102 = arith.constant 0 : index
    %150 = vector.load %arg35[%c0_101, %c0_102] : memref<32x32xbf16, #tpu.memory_space<vmem>>, vector<32x32xbf16>
    %151 = arith.truncf %122 : vector<8x32xf32> to vector<8x32xbf16>
    %cst_103 = arith.constant dense<0.000000e+00> : vector<8x32xf32>
    %152 = tpu.matmul %151, %150, %cst_103 {dimension_numbers = #tpu.dot_dimension_numbers<[1], [0], [0], [1], [0, 0, 1, 1], [], []>} : vector<8x32xbf16>, vector<32x32xbf16>, vector<8x32xf32> -> vector<8x32xf32>
    %c0_104 = arith.constant 0 : index
    %c0_105 = arith.constant 0 : index
    %153 = vector.load %arg37[%c0_104, %c0_105] : memref<1x32xf32, #tpu.memory_space<vmem>>, vector<1x32xf32>
    %154 = vector.broadcast %153 : vector<1x32xf32> to vector<8x32xf32>
    %155 = arith.addf %152, %154 : vector<8x32xf32>
    %c0_106 = arith.constant 0 : index
    %c0_107 = arith.constant 0 : index
    %156 = vector.load %arg36[%c0_106, %c0_107] : memref<32x32xbf16, #tpu.memory_space<vmem>>, vector<32x32xbf16>
    %157 = arith.truncf %33 : vector<8x32xf32> to vector<8x32xbf16>
    %cst_108 = arith.constant dense<0.000000e+00> : vector<8x32xf32>
    %158 = tpu.matmul %157, %156, %cst_108 {dimension_numbers = #tpu.dot_dimension_numbers<[1], [0], [0], [1], [0, 0, 1, 1], [], []>} : vector<8x32xbf16>, vector<32x32xbf16>, vector<8x32xf32> -> vector<8x32xf32>
    %c0_109 = arith.constant 0 : index
    %c0_110 = arith.constant 0 : index
    %159 = vector.load %arg38[%c0_109, %c0_110] : memref<1x32xf32, #tpu.memory_space<vmem>>, vector<1x32xf32>
    %160 = vector.broadcast %159 : vector<1x32xf32> to vector<8x32xf32>
    %161 = arith.addf %158, %160 : vector<8x32xf32>
    %162 = arith.mulf %136, %161 : vector<8x32xf32>
    %163 = arith.addf %155, %162 : vector<8x32xf32>
    %164 = math.tanh %163 : vector<8x32xf32>
    %cst_111 = arith.constant 1.000000e+00 : f32
    %165 = vector.broadcast %cst_111 : f32 to vector<8x32xf32>
    %166 = arith.subf %165, %149 : vector<8x32xf32>
    %167 = arith.mulf %166, %164 : vector<8x32xf32>
    %168 = arith.mulf %149, %33 : vector<8x32xf32>
    %169 = arith.addf %167, %168 : vector<8x32xf32>
    %170 = tpu.concatenate %74, %16 in 1 : vector<16x32xf32>, vector<16x32xf32> -> vector<16x64xf32>
    %c0_112 = arith.constant 0 : index
    %c0_113 = arith.constant 0 : index
    %c0_114 = arith.constant 0 : index
    %171 = vector.load %arg27[%c0_112, %c0_113, %c0_114] : memref<2x64x32xbf16, #tpu.memory_space<vmem>>, vector<1x64x32xbf16>
    %172 = vector.shape_cast %171 : vector<1x64x32xbf16> to vector<64x32xbf16>
    %173 = arith.truncf %170 : vector<16x64xf32> to vector<16x64xbf16>
    %cst_115 = arith.constant dense<0.000000e+00> : vector<16x32xf32>
    %174 = tpu.matmul %173, %172, %cst_115 {dimension_numbers = #tpu.dot_dimension_numbers<[1], [0], [0], [1], [0, 0, 1, 1], [], []>} : vector<16x64xbf16>, vector<64x32xbf16>, vector<16x32xf32> -> vector<16x32xf32>
    %c0_116 = arith.constant 0 : index
    %c0_117 = arith.constant 0 : index
    %c0_118 = arith.constant 0 : index
    %175 = vector.load %arg28[%c0_116, %c0_117, %c0_118] : memref<2x1x32xf32, #tpu.memory_space<vmem>>, vector<1x1x32xf32>
    %176 = vector.shape_cast %175 : vector<1x1x32xf32> to vector<1x32xf32>
    %177 = vector.broadcast %176 : vector<1x32xf32> to vector<16x32xf32>
    %178 = arith.addf %174, %177 : vector<16x32xf32>
    %179 = arith.negf %178 : vector<16x32xf32>
    %180 = math.exp %179 : vector<16x32xf32>
    %cst_119 = arith.constant 1.000000e+00 : f32
    %181 = vector.broadcast %cst_119 : f32 to vector<16x32xf32>
    %182 = arith.addf %181, %180 : vector<16x32xf32>
    %183 = arith.divf %181, %182 : vector<16x32xf32>
    %c1_120 = arith.constant 1 : index
    %c0_121 = arith.constant 0 : index
    %c0_122 = arith.constant 0 : index
    %184 = vector.load %arg27[%c1_120, %c0_121, %c0_122] : memref<2x64x32xbf16, #tpu.memory_space<vmem>>, vector<1x64x32xbf16>
    %185 = vector.shape_cast %184 : vector<1x64x32xbf16> to vector<64x32xbf16>
    %186 = arith.truncf %170 : vector<16x64xf32> to vector<16x64xbf16>
    %cst_123 = arith.constant dense<0.000000e+00> : vector<16x32xf32>
    %187 = tpu.matmul %186, %185, %cst_123 {dimension_numbers = #tpu.dot_dimension_numbers<[1], [0], [0], [1], [0, 0, 1, 1], [], []>} : vector<16x64xbf16>, vector<64x32xbf16>, vector<16x32xf32> -> vector<16x32xf32>
    %c1_124 = arith.constant 1 : index
    %c0_125 = arith.constant 0 : index
    %c0_126 = arith.constant 0 : index
    %188 = vector.load %arg28[%c1_124, %c0_125, %c0_126] : memref<2x1x32xf32, #tpu.memory_space<vmem>>, vector<1x1x32xf32>
    %189 = vector.shape_cast %188 : vector<1x1x32xf32> to vector<1x32xf32>
    %190 = vector.broadcast %189 : vector<1x32xf32> to vector<16x32xf32>
    %191 = arith.addf %187, %190 : vector<16x32xf32>
    %192 = arith.negf %191 : vector<16x32xf32>
    %193 = math.exp %192 : vector<16x32xf32>
    %cst_127 = arith.constant 1.000000e+00 : f32
    %194 = vector.broadcast %cst_127 : f32 to vector<16x32xf32>
    %195 = arith.addf %194, %193 : vector<16x32xf32>
    %196 = arith.divf %194, %195 : vector<16x32xf32>
    %c0_128 = arith.constant 0 : index
    %c0_129 = arith.constant 0 : index
    %197 = vector.load %arg29[%c0_128, %c0_129] : memref<32x32xbf16, #tpu.memory_space<vmem>>, vector<32x32xbf16>
    %198 = arith.truncf %74 : vector<16x32xf32> to vector<16x32xbf16>
    %cst_130 = arith.constant dense<0.000000e+00> : vector<16x32xf32>
    %199 = tpu.matmul %198, %197, %cst_130 {dimension_numbers = #tpu.dot_dimension_numbers<[1], [0], [0], [1], [0, 0, 1, 1], [], []>} : vector<16x32xbf16>, vector<32x32xbf16>, vector<16x32xf32> -> vector<16x32xf32>
    %c0_131 = arith.constant 0 : index
    %c0_132 = arith.constant 0 : index
    %200 = vector.load %arg31[%c0_131, %c0_132] : memref<1x32xf32, #tpu.memory_space<vmem>>, vector<1x32xf32>
    %201 = vector.broadcast %200 : vector<1x32xf32> to vector<16x32xf32>
    %202 = arith.addf %199, %201 : vector<16x32xf32>
    %c0_133 = arith.constant 0 : index
    %c0_134 = arith.constant 0 : index
    %203 = vector.load %arg30[%c0_133, %c0_134] : memref<32x32xbf16, #tpu.memory_space<vmem>>, vector<32x32xbf16>
    %204 = arith.truncf %16 : vector<16x32xf32> to vector<16x32xbf16>
    %cst_135 = arith.constant dense<0.000000e+00> : vector<16x32xf32>
    %205 = tpu.matmul %204, %203, %cst_135 {dimension_numbers = #tpu.dot_dimension_numbers<[1], [0], [0], [1], [0, 0, 1, 1], [], []>} : vector<16x32xbf16>, vector<32x32xbf16>, vector<16x32xf32> -> vector<16x32xf32>
    %c0_136 = arith.constant 0 : index
    %c0_137 = arith.constant 0 : index
    %206 = vector.load %arg32[%c0_136, %c0_137] : memref<1x32xf32, #tpu.memory_space<vmem>>, vector<1x32xf32>
    %207 = vector.broadcast %206 : vector<1x32xf32> to vector<16x32xf32>
    %208 = arith.addf %205, %207 : vector<16x32xf32>
    %209 = arith.mulf %183, %208 : vector<16x32xf32>
    %210 = arith.addf %202, %209 : vector<16x32xf32>
    %211 = math.tanh %210 : vector<16x32xf32>
    %cst_138 = arith.constant 1.000000e+00 : f32
    %212 = vector.broadcast %cst_138 : f32 to vector<16x32xf32>
    %213 = arith.subf %212, %196 : vector<16x32xf32>
    %214 = arith.mulf %213, %211 : vector<16x32xf32>
    %215 = arith.mulf %196, %16 : vector<16x32xf32>
    %216 = arith.addf %214, %215 : vector<16x32xf32>
    %217 = arith.truncf %216 : vector<16x32xf32> to vector<16x32xbf16>
    %cst_139 = arith.constant dense<0.000000e+00> : vector<32x32xf32>
    %218 = tpu.matmul %34, %217, %cst_139 {dimension_numbers = #tpu.dot_dimension_numbers<[1], [0], [0], [1], [0, 0, 1, 1], [], []>} : vector<32x16xbf16>, vector<16x32xbf16>, vector<32x32xf32> -> vector<32x32xf32>
    %219 = arith.truncf %169 : vector<8x32xf32> to vector<8x32xbf16>
    %cst_140 = arith.constant dense<0.000000e+00> : vector<16x32xf32>
    %220 = tpu.matmul %35, %219, %cst_140 {dimension_numbers = #tpu.dot_dimension_numbers<[1], [0], [0], [1], [0, 0, 1, 1], [], []>} : vector<16x8xbf16>, vector<8x32xbf16>, vector<16x32xf32> -> vector<16x32xf32>
    %221 = tpu.concatenate %218, %220 in 0 : vector<32x32xf32>, vector<16x32xf32> -> vector<48x32xf32>
    %222 = arith.truncf %221 : vector<48x32xf32> to vector<48x32xbf16>
    %cst_141 = arith.constant dense<0.000000e+00> : vector<48x1024xf32>
    %223 = tpu.matmul %222, %39, %cst_141 {dimension_numbers = #tpu.dot_dimension_numbers<[1], [0], [0], [1], [0, 0, 1, 1], [], []>} : vector<48x32xbf16>, vector<32x1024xbf16>, vector<48x1024xf32> -> vector<48x1024xf32>
    %224 = arith.truncf %223 : vector<48x1024xf32> to vector<48x1024xbf16>
    %225 = arith.mulf %224, %56 : vector<48x1024xbf16>
    %cst_142 = arith.constant dense<0.000000e+00> : vector<48x32xf32>
    %226 = tpu.matmul %225, %40, %cst_142 {dimension_numbers = #tpu.dot_dimension_numbers<[1], [0], [0], [1], [0, 0, 1, 1], [], []>} : vector<48x1024xbf16>, vector<1024x32xbf16>, vector<48x32xf32> -> vector<48x32xf32>
    %227 = vector.extract_strided_slice %226 {offsets = [0, 0], sizes = [32, 32], strides = [1, 1]} : vector<48x32xf32> to vector<32x32xf32>
    %228 = arith.truncf %227 : vector<32x32xf32> to vector<32x32xbf16>
    %cst_143 = arith.constant dense<0.000000e+00> : vector<16x32xf32>
    %229 = tpu.matmul %36, %228, %cst_143 {dimension_numbers = #tpu.dot_dimension_numbers<[1], [0], [0], [1], [0, 0, 1, 1], [], []>} : vector<16x32xbf16>, vector<32x32xbf16>, vector<16x32xf32> -> vector<16x32xf32>
    %c0_144 = arith.constant 0 : index
    %c0_145 = arith.constant 0 : index
    %230 = vector.load %arg23[%c0_144, %c0_145] : memref<1x32xf32, #tpu.memory_space<vmem>>, vector<1x32xf32>
    %231 = vector.broadcast %230 : vector<1x32xf32> to vector<16x32xf32>
    %232 = arith.addf %229, %231 : vector<16x32xf32>
    %233 = vector.extract_strided_slice %226 {offsets = [32, 0], sizes = [16, 32], strides = [1, 1]} : vector<48x32xf32> to vector<16x32xf32>
    %234 = arith.truncf %233 : vector<16x32xf32> to vector<16x32xbf16>
    %cst_146 = arith.constant dense<0.000000e+00> : vector<8x32xf32>
    %235 = tpu.matmul %37, %234, %cst_146 {dimension_numbers = #tpu.dot_dimension_numbers<[1], [0], [0], [1], [0, 0, 1, 1], [], []>} : vector<8x16xbf16>, vector<16x32xbf16>, vector<8x32xf32> -> vector<8x32xf32>
    %c0_147 = arith.constant 0 : index
    %c0_148 = arith.constant 0 : index
    %236 = vector.load %arg26[%c0_147, %c0_148] : memref<1x32xf32, #tpu.memory_space<vmem>>, vector<1x32xf32>
    %237 = vector.broadcast %236 : vector<1x32xf32> to vector<8x32xf32>
    %238 = arith.addf %235, %237 : vector<8x32xf32>
    %239 = arith.truncf %232 : vector<16x32xf32> to vector<16x32xbf16>
    %cst_149 = arith.constant dense<0.000000e+00> : vector<8x32xf32>
    %240 = tpu.matmul %38, %239, %cst_149 {dimension_numbers = #tpu.dot_dimension_numbers<[1], [0], [0], [1], [0, 0, 1, 1], [], []>} : vector<8x16xbf16>, vector<16x32xbf16>, vector<8x32xf32> -> vector<8x32xf32>
    %241 = tpu.concatenate %240, %238 in 0 : vector<8x32xf32>, vector<8x32xf32> -> vector<16x32xf32>
    %c0_150 = arith.constant 0 : index
    %c0_151 = arith.constant 0 : index
    %242 = vector.load %arg40[%c0_150, %c0_151] : memref<32x32xbf16, #tpu.memory_space<vmem>>, vector<32x32xbf16>
    %243 = arith.truncf %241 : vector<16x32xf32> to vector<16x32xbf16>
    %cst_152 = arith.constant dense<0.000000e+00> : vector<16x32xf32>
    %244 = tpu.matmul %243, %242, %cst_152 {dimension_numbers = #tpu.dot_dimension_numbers<[1], [0], [0], [1], [0, 0, 1, 1], [], []>} : vector<16x32xbf16>, vector<32x32xbf16>, vector<16x32xf32> -> vector<16x32xf32>
    %c0_153 = arith.constant 0 : index
    %c0_154 = arith.constant 0 : index
    %245 = vector.load %arg41[%c0_153, %c0_154] : memref<32x32xbf16, #tpu.memory_space<vmem>>, vector<32x32xbf16>
    %246 = arith.truncf %241 : vector<16x32xf32> to vector<16x32xbf16>
    %cst_155 = arith.constant dense<0.000000e+00> : vector<16x32xf32>
    %247 = tpu.matmul %246, %245, %cst_155 {dimension_numbers = #tpu.dot_dimension_numbers<[1], [0], [0], [1], [0, 0, 1, 1], [], []>} : vector<16x32xbf16>, vector<32x32xbf16>, vector<16x32xf32> -> vector<16x32xf32>
    %c0_156 = arith.constant 0 : index
    %c0_157 = arith.constant 0 : index
    %248 = vector.load %arg39[%c0_156, %c0_157] : memref<32x32xbf16, #tpu.memory_space<vmem>>, vector<32x32xbf16>
    %249 = arith.truncf %169 : vector<8x32xf32> to vector<8x32xbf16>
    %cst_158 = arith.constant dense<0.000000e+00> : vector<8x32xf32>
    %250 = tpu.matmul %249, %248, %cst_158 {dimension_numbers = #tpu.dot_dimension_numbers<[1], [0], [0], [1], [0, 0, 1, 1], [], []>} : vector<8x32xbf16>, vector<32x32xbf16>, vector<8x32xf32> -> vector<8x32xf32>
    %251 = tpu.concatenate %250, %250 in 0 : vector<8x32xf32>, vector<8x32xf32> -> vector<16x32xf32>
    %252 = arith.mulf %251, %244 : vector<16x32xf32>
    %253 = arith.truncf %252 : vector<16x32xf32> to vector<16x32xbf16>
    %cst_159 = arith.constant dense<0.000000e+00> : vector<16x4xf32>
    %254 = tpu.matmul %253, %57, %cst_159 {dimension_numbers = #tpu.dot_dimension_numbers<[1], [0], [0], [1], [0, 0, 1, 1], [], []>} : vector<16x32xbf16>, vector<32x4xbf16>, vector<16x4xf32> -> vector<16x4xf32>
    %cst_160 = arith.constant 1.250000e-01 : f32
    %255 = vector.broadcast %cst_160 : f32 to vector<16x4xf32>
    %256 = arith.mulf %254, %255 : vector<16x4xf32>
    %257 = vector.extract_strided_slice %256 {offsets = [0, 0], sizes = [8, 4], strides = [1, 1]} : vector<16x4xf32> to vector<8x4xf32>
    %258 = vector.extract_strided_slice %256 {offsets = [8, 0], sizes = [8, 4], strides = [1, 1]} : vector<16x4xf32> to vector<8x4xf32>
    %259 = arith.maximumf %257, %258 : vector<8x4xf32>
    %260 = arith.subf %257, %259 : vector<8x4xf32>
    %261 = math.exp %260 : vector<8x4xf32>
    %262 = arith.subf %258, %259 : vector<8x4xf32>
    %263 = math.exp %262 : vector<8x4xf32>
    %264 = arith.addf %261, %263 : vector<8x4xf32>
    %265 = tpu.reciprocal %264 {approx = true} : vector<8x4xf32> -> vector<8x4xf32>
    %266 = arith.mulf %261, %265 : vector<8x4xf32>
    %267 = arith.mulf %263, %265 : vector<8x4xf32>
    %268 = tpu.concatenate %266, %267 in 0 : vector<8x4xf32>, vector<8x4xf32> -> vector<16x4xf32>
    %269 = arith.truncf %268 : vector<16x4xf32> to vector<16x4xbf16>
    %cst_161 = arith.constant dense<0.000000e+00> : vector<16x32xf32>
    %270 = tpu.matmul %269, %58, %cst_161 {dimension_numbers = #tpu.dot_dimension_numbers<[1], [0], [0], [1], [0, 0, 1, 1], [], []>} : vector<16x4xbf16>, vector<4x32xbf16>, vector<16x32xf32> -> vector<16x32xf32>
    %271 = arith.mulf %270, %247 : vector<16x32xf32>
    %272 = vector.extract_strided_slice %271 {offsets = [0, 0], sizes = [8, 32], strides = [1, 1]} : vector<16x32xf32> to vector<8x32xf32>
    %273 = vector.extract_strided_slice %271 {offsets = [8, 0], sizes = [8, 32], strides = [1, 1]} : vector<16x32xf32> to vector<8x32xf32>
    %274 = arith.addf %272, %273 : vector<8x32xf32>
    %c0_162 = arith.constant 0 : index
    %c0_163 = arith.constant 0 : index
    %275 = vector.load %arg42[%c0_162, %c0_163] : memref<32x32xbf16, #tpu.memory_space<vmem>>, vector<32x32xbf16>
    %276 = arith.truncf %274 : vector<8x32xf32> to vector<8x32xbf16>
    %cst_164 = arith.constant dense<0.000000e+00> : vector<8x32xf32>
    %277 = tpu.matmul %276, %275, %cst_164 {dimension_numbers = #tpu.dot_dimension_numbers<[1], [0], [0], [1], [0, 0, 1, 1], [], []>} : vector<8x32xbf16>, vector<32x32xbf16>, vector<8x32xf32> -> vector<8x32xf32>
    %c0_165 = arith.constant 0 : index
    %c0_166 = arith.constant 0 : index
    %278 = vector.load %arg43[%c0_165, %c0_166] : memref<1x32xf32, #tpu.memory_space<vmem>>, vector<1x32xf32>
    %279 = vector.broadcast %278 : vector<1x32xf32> to vector<8x32xf32>
    %280 = arith.addf %277, %279 : vector<8x32xf32>
    %281 = tpu.concatenate %280, %169 in 1 : vector<8x32xf32>, vector<8x32xf32> -> vector<8x64xf32>
    %c0_167 = arith.constant 0 : index
    %c0_168 = arith.constant 0 : index
    %c0_169 = arith.constant 0 : index
    %282 = vector.load %arg33[%c0_167, %c0_168, %c0_169] : memref<2x64x32xbf16, #tpu.memory_space<vmem>>, vector<1x64x32xbf16>
    %283 = vector.shape_cast %282 : vector<1x64x32xbf16> to vector<64x32xbf16>
    %284 = arith.truncf %281 : vector<8x64xf32> to vector<8x64xbf16>
    %cst_170 = arith.constant dense<0.000000e+00> : vector<8x32xf32>
    %285 = tpu.matmul %284, %283, %cst_170 {dimension_numbers = #tpu.dot_dimension_numbers<[1], [0], [0], [1], [0, 0, 1, 1], [], []>} : vector<8x64xbf16>, vector<64x32xbf16>, vector<8x32xf32> -> vector<8x32xf32>
    %c0_171 = arith.constant 0 : index
    %c0_172 = arith.constant 0 : index
    %c0_173 = arith.constant 0 : index
    %286 = vector.load %arg34[%c0_171, %c0_172, %c0_173] : memref<2x1x32xf32, #tpu.memory_space<vmem>>, vector<1x1x32xf32>
    %287 = vector.shape_cast %286 : vector<1x1x32xf32> to vector<1x32xf32>
    %288 = vector.broadcast %287 : vector<1x32xf32> to vector<8x32xf32>
    %289 = arith.addf %285, %288 : vector<8x32xf32>
    %290 = arith.negf %289 : vector<8x32xf32>
    %291 = math.exp %290 : vector<8x32xf32>
    %cst_174 = arith.constant 1.000000e+00 : f32
    %292 = vector.broadcast %cst_174 : f32 to vector<8x32xf32>
    %293 = arith.addf %292, %291 : vector<8x32xf32>
    %294 = arith.divf %292, %293 : vector<8x32xf32>
    %c1_175 = arith.constant 1 : index
    %c0_176 = arith.constant 0 : index
    %c0_177 = arith.constant 0 : index
    %295 = vector.load %arg33[%c1_175, %c0_176, %c0_177] : memref<2x64x32xbf16, #tpu.memory_space<vmem>>, vector<1x64x32xbf16>
    %296 = vector.shape_cast %295 : vector<1x64x32xbf16> to vector<64x32xbf16>
    %297 = arith.truncf %281 : vector<8x64xf32> to vector<8x64xbf16>
    %cst_178 = arith.constant dense<0.000000e+00> : vector<8x32xf32>
    %298 = tpu.matmul %297, %296, %cst_178 {dimension_numbers = #tpu.dot_dimension_numbers<[1], [0], [0], [1], [0, 0, 1, 1], [], []>} : vector<8x64xbf16>, vector<64x32xbf16>, vector<8x32xf32> -> vector<8x32xf32>
    %c1_179 = arith.constant 1 : index
    %c0_180 = arith.constant 0 : index
    %c0_181 = arith.constant 0 : index
    %299 = vector.load %arg34[%c1_179, %c0_180, %c0_181] : memref<2x1x32xf32, #tpu.memory_space<vmem>>, vector<1x1x32xf32>
    %300 = vector.shape_cast %299 : vector<1x1x32xf32> to vector<1x32xf32>
    %301 = vector.broadcast %300 : vector<1x32xf32> to vector<8x32xf32>
    %302 = arith.addf %298, %301 : vector<8x32xf32>
    %303 = arith.negf %302 : vector<8x32xf32>
    %304 = math.exp %303 : vector<8x32xf32>
    %cst_182 = arith.constant 1.000000e+00 : f32
    %305 = vector.broadcast %cst_182 : f32 to vector<8x32xf32>
    %306 = arith.addf %305, %304 : vector<8x32xf32>
    %307 = arith.divf %305, %306 : vector<8x32xf32>
    %c0_183 = arith.constant 0 : index
    %c0_184 = arith.constant 0 : index
    %308 = vector.load %arg35[%c0_183, %c0_184] : memref<32x32xbf16, #tpu.memory_space<vmem>>, vector<32x32xbf16>
    %309 = arith.truncf %280 : vector<8x32xf32> to vector<8x32xbf16>
    %cst_185 = arith.constant dense<0.000000e+00> : vector<8x32xf32>
    %310 = tpu.matmul %309, %308, %cst_185 {dimension_numbers = #tpu.dot_dimension_numbers<[1], [0], [0], [1], [0, 0, 1, 1], [], []>} : vector<8x32xbf16>, vector<32x32xbf16>, vector<8x32xf32> -> vector<8x32xf32>
    %c0_186 = arith.constant 0 : index
    %c0_187 = arith.constant 0 : index
    %311 = vector.load %arg37[%c0_186, %c0_187] : memref<1x32xf32, #tpu.memory_space<vmem>>, vector<1x32xf32>
    %312 = vector.broadcast %311 : vector<1x32xf32> to vector<8x32xf32>
    %313 = arith.addf %310, %312 : vector<8x32xf32>
    %c0_188 = arith.constant 0 : index
    %c0_189 = arith.constant 0 : index
    %314 = vector.load %arg36[%c0_188, %c0_189] : memref<32x32xbf16, #tpu.memory_space<vmem>>, vector<32x32xbf16>
    %315 = arith.truncf %169 : vector<8x32xf32> to vector<8x32xbf16>
    %cst_190 = arith.constant dense<0.000000e+00> : vector<8x32xf32>
    %316 = tpu.matmul %315, %314, %cst_190 {dimension_numbers = #tpu.dot_dimension_numbers<[1], [0], [0], [1], [0, 0, 1, 1], [], []>} : vector<8x32xbf16>, vector<32x32xbf16>, vector<8x32xf32> -> vector<8x32xf32>
    %c0_191 = arith.constant 0 : index
    %c0_192 = arith.constant 0 : index
    %317 = vector.load %arg38[%c0_191, %c0_192] : memref<1x32xf32, #tpu.memory_space<vmem>>, vector<1x32xf32>
    %318 = vector.broadcast %317 : vector<1x32xf32> to vector<8x32xf32>
    %319 = arith.addf %316, %318 : vector<8x32xf32>
    %320 = arith.mulf %294, %319 : vector<8x32xf32>
    %321 = arith.addf %313, %320 : vector<8x32xf32>
    %322 = math.tanh %321 : vector<8x32xf32>
    %cst_193 = arith.constant 1.000000e+00 : f32
    %323 = vector.broadcast %cst_193 : f32 to vector<8x32xf32>
    %324 = arith.subf %323, %307 : vector<8x32xf32>
    %325 = arith.mulf %324, %322 : vector<8x32xf32>
    %326 = arith.mulf %307, %169 : vector<8x32xf32>
    %327 = arith.addf %325, %326 : vector<8x32xf32>
    %328 = tpu.concatenate %232, %216 in 1 : vector<16x32xf32>, vector<16x32xf32> -> vector<16x64xf32>
    %c0_194 = arith.constant 0 : index
    %c0_195 = arith.constant 0 : index
    %c0_196 = arith.constant 0 : index
    %329 = vector.load %arg27[%c0_194, %c0_195, %c0_196] : memref<2x64x32xbf16, #tpu.memory_space<vmem>>, vector<1x64x32xbf16>
    %330 = vector.shape_cast %329 : vector<1x64x32xbf16> to vector<64x32xbf16>
    %331 = arith.truncf %328 : vector<16x64xf32> to vector<16x64xbf16>
    %cst_197 = arith.constant dense<0.000000e+00> : vector<16x32xf32>
    %332 = tpu.matmul %331, %330, %cst_197 {dimension_numbers = #tpu.dot_dimension_numbers<[1], [0], [0], [1], [0, 0, 1, 1], [], []>} : vector<16x64xbf16>, vector<64x32xbf16>, vector<16x32xf32> -> vector<16x32xf32>
    %c0_198 = arith.constant 0 : index
    %c0_199 = arith.constant 0 : index
    %c0_200 = arith.constant 0 : index
    %333 = vector.load %arg28[%c0_198, %c0_199, %c0_200] : memref<2x1x32xf32, #tpu.memory_space<vmem>>, vector<1x1x32xf32>
    %334 = vector.shape_cast %333 : vector<1x1x32xf32> to vector<1x32xf32>
    %335 = vector.broadcast %334 : vector<1x32xf32> to vector<16x32xf32>
    %336 = arith.addf %332, %335 : vector<16x32xf32>
    %337 = arith.negf %336 : vector<16x32xf32>
    %338 = math.exp %337 : vector<16x32xf32>
    %cst_201 = arith.constant 1.000000e+00 : f32
    %339 = vector.broadcast %cst_201 : f32 to vector<16x32xf32>
    %340 = arith.addf %339, %338 : vector<16x32xf32>
    %341 = arith.divf %339, %340 : vector<16x32xf32>
    %c1_202 = arith.constant 1 : index
    %c0_203 = arith.constant 0 : index
    %c0_204 = arith.constant 0 : index
    %342 = vector.load %arg27[%c1_202, %c0_203, %c0_204] : memref<2x64x32xbf16, #tpu.memory_space<vmem>>, vector<1x64x32xbf16>
    %343 = vector.shape_cast %342 : vector<1x64x32xbf16> to vector<64x32xbf16>
    %344 = arith.truncf %328 : vector<16x64xf32> to vector<16x64xbf16>
    %cst_205 = arith.constant dense<0.000000e+00> : vector<16x32xf32>
    %345 = tpu.matmul %344, %343, %cst_205 {dimension_numbers = #tpu.dot_dimension_numbers<[1], [0], [0], [1], [0, 0, 1, 1], [], []>} : vector<16x64xbf16>, vector<64x32xbf16>, vector<16x32xf32> -> vector<16x32xf32>
    %c1_206 = arith.constant 1 : index
    %c0_207 = arith.constant 0 : index
    %c0_208 = arith.constant 0 : index
    %346 = vector.load %arg28[%c1_206, %c0_207, %c0_208] : memref<2x1x32xf32, #tpu.memory_space<vmem>>, vector<1x1x32xf32>
    %347 = vector.shape_cast %346 : vector<1x1x32xf32> to vector<1x32xf32>
    %348 = vector.broadcast %347 : vector<1x32xf32> to vector<16x32xf32>
    %349 = arith.addf %345, %348 : vector<16x32xf32>
    %350 = arith.negf %349 : vector<16x32xf32>
    %351 = math.exp %350 : vector<16x32xf32>
    %cst_209 = arith.constant 1.000000e+00 : f32
    %352 = vector.broadcast %cst_209 : f32 to vector<16x32xf32>
    %353 = arith.addf %352, %351 : vector<16x32xf32>
    %354 = arith.divf %352, %353 : vector<16x32xf32>
    %c0_210 = arith.constant 0 : index
    %c0_211 = arith.constant 0 : index
    %355 = vector.load %arg29[%c0_210, %c0_211] : memref<32x32xbf16, #tpu.memory_space<vmem>>, vector<32x32xbf16>
    %356 = arith.truncf %232 : vector<16x32xf32> to vector<16x32xbf16>
    %cst_212 = arith.constant dense<0.000000e+00> : vector<16x32xf32>
    %357 = tpu.matmul %356, %355, %cst_212 {dimension_numbers = #tpu.dot_dimension_numbers<[1], [0], [0], [1], [0, 0, 1, 1], [], []>} : vector<16x32xbf16>, vector<32x32xbf16>, vector<16x32xf32> -> vector<16x32xf32>
    %c0_213 = arith.constant 0 : index
    %c0_214 = arith.constant 0 : index
    %358 = vector.load %arg31[%c0_213, %c0_214] : memref<1x32xf32, #tpu.memory_space<vmem>>, vector<1x32xf32>
    %359 = vector.broadcast %358 : vector<1x32xf32> to vector<16x32xf32>
    %360 = arith.addf %357, %359 : vector<16x32xf32>
    %c0_215 = arith.constant 0 : index
    %c0_216 = arith.constant 0 : index
    %361 = vector.load %arg30[%c0_215, %c0_216] : memref<32x32xbf16, #tpu.memory_space<vmem>>, vector<32x32xbf16>
    %362 = arith.truncf %216 : vector<16x32xf32> to vector<16x32xbf16>
    %cst_217 = arith.constant dense<0.000000e+00> : vector<16x32xf32>
    %363 = tpu.matmul %362, %361, %cst_217 {dimension_numbers = #tpu.dot_dimension_numbers<[1], [0], [0], [1], [0, 0, 1, 1], [], []>} : vector<16x32xbf16>, vector<32x32xbf16>, vector<16x32xf32> -> vector<16x32xf32>
    %c0_218 = arith.constant 0 : index
    %c0_219 = arith.constant 0 : index
    %364 = vector.load %arg32[%c0_218, %c0_219] : memref<1x32xf32, #tpu.memory_space<vmem>>, vector<1x32xf32>
    %365 = vector.broadcast %364 : vector<1x32xf32> to vector<16x32xf32>
    %366 = arith.addf %363, %365 : vector<16x32xf32>
    %367 = arith.mulf %341, %366 : vector<16x32xf32>
    %368 = arith.addf %360, %367 : vector<16x32xf32>
    %369 = math.tanh %368 : vector<16x32xf32>
    %cst_220 = arith.constant 1.000000e+00 : f32
    %370 = vector.broadcast %cst_220 : f32 to vector<16x32xf32>
    %371 = arith.subf %370, %354 : vector<16x32xf32>
    %372 = arith.mulf %371, %369 : vector<16x32xf32>
    %373 = arith.mulf %354, %216 : vector<16x32xf32>
    %374 = arith.addf %372, %373 : vector<16x32xf32>
    %c0_221 = arith.constant 0 : index
    %c0_222 = arith.constant 0 : index
    %375 = vector.load %arg46[%c0_221, %c0_222] : memref<32x1xbf16, #tpu.memory_space<vmem>>, vector<32x1xbf16>
    %376 = arith.truncf %374 : vector<16x32xf32> to vector<16x32xbf16>
    %cst_223 = arith.constant dense<0.000000e+00> : vector<16x1xf32>
    %377 = tpu.matmul %376, %375, %cst_223 {dimension_numbers = #tpu.dot_dimension_numbers<[1], [0], [0], [1], [0, 0, 1, 1], [], []>} : vector<16x32xbf16>, vector<32x1xbf16>, vector<16x1xf32> -> vector<16x1xf32>
    %c0_224 = arith.constant 0 : index
    %c0_225 = arith.constant 0 : index
    %378 = vector.load %arg47[%c0_224, %c0_225] : memref<1x1xf32, #tpu.memory_space<vmem>>, vector<1x1xf32>
    %379 = vector.broadcast %378 : vector<1x1xf32> to vector<16x1xf32>
    %380 = arith.addf %377, %379 : vector<16x1xf32>
    %381 = vector.extract_strided_slice %380 {offsets = [0, 0], sizes = [8, 1], strides = [1, 1]} : vector<16x1xf32> to vector<8x1xf32>
    %382 = vector.extract_strided_slice %374 {offsets = [0, 0], sizes = [8, 32], strides = [1, 1]} : vector<16x32xf32> to vector<8x32xf32>
    %cst_226 = arith.constant dense<0xFF800000> : vector<1xf32>
    %383 = vector.multi_reduction <maximumf>, %381, %cst_226 [0] : vector<8x1xf32> to vector<1xf32>
    %384 = vector.shape_cast %383 : vector<1xf32> to vector<1x1xf32>
    %385 = vector.broadcast %384 : vector<1x1xf32> to vector<8x1xf32>
    %386 = arith.subf %381, %385 : vector<8x1xf32>
    %387 = math.exp %386 : vector<8x1xf32>
    %cst_227 = arith.constant dense<0.000000e+00> : vector<1xf32>
    %388 = vector.multi_reduction <add>, %387, %cst_227 [0] : vector<8x1xf32> to vector<1xf32>
    %389 = vector.shape_cast %388 : vector<1xf32> to vector<1x1xf32>
    %390 = tpu.reciprocal %389 {approx = true} : vector<1x1xf32> -> vector<1x1xf32>
    %391 = vector.broadcast %390 : vector<1x1xf32> to vector<8x1xf32>
    %392 = arith.mulf %387, %391 : vector<8x1xf32>
    %393 = vector.broadcast %392 : vector<8x1xf32> to vector<8x32xf32>
    %394 = arith.mulf %393, %382 : vector<8x32xf32>
    %cst_228 = arith.constant dense<0.000000e+00> : vector<32xf32>
    %395 = vector.multi_reduction <add>, %394, %cst_228 [0] : vector<8x32xf32> to vector<32xf32>
    %396 = vector.shape_cast %395 : vector<32xf32> to vector<1x32xf32>
    %cst_229 = arith.constant dense<0xFF800000> : vector<32xf32>
    %397 = vector.multi_reduction <maximumf>, %382, %cst_229 [0] : vector<8x32xf32> to vector<32xf32>
    %398 = vector.shape_cast %397 : vector<32xf32> to vector<1x32xf32>
    %399 = vector.extract_strided_slice %380 {offsets = [8, 0], sizes = [8, 1], strides = [1, 1]} : vector<16x1xf32> to vector<8x1xf32>
    %400 = vector.extract_strided_slice %374 {offsets = [8, 0], sizes = [8, 32], strides = [1, 1]} : vector<16x32xf32> to vector<8x32xf32>
    %cst_230 = arith.constant dense<0xFF800000> : vector<1xf32>
    %401 = vector.multi_reduction <maximumf>, %399, %cst_230 [0] : vector<8x1xf32> to vector<1xf32>
    %402 = vector.shape_cast %401 : vector<1xf32> to vector<1x1xf32>
    %403 = vector.broadcast %402 : vector<1x1xf32> to vector<8x1xf32>
    %404 = arith.subf %399, %403 : vector<8x1xf32>
    %405 = math.exp %404 : vector<8x1xf32>
    %cst_231 = arith.constant dense<0.000000e+00> : vector<1xf32>
    %406 = vector.multi_reduction <add>, %405, %cst_231 [0] : vector<8x1xf32> to vector<1xf32>
    %407 = vector.shape_cast %406 : vector<1xf32> to vector<1x1xf32>
    %408 = tpu.reciprocal %407 {approx = true} : vector<1x1xf32> -> vector<1x1xf32>
    %409 = vector.broadcast %408 : vector<1x1xf32> to vector<8x1xf32>
    %410 = arith.mulf %405, %409 : vector<8x1xf32>
    %411 = vector.broadcast %410 : vector<8x1xf32> to vector<8x32xf32>
    %412 = arith.mulf %411, %400 : vector<8x32xf32>
    %cst_232 = arith.constant dense<0.000000e+00> : vector<32xf32>
    %413 = vector.multi_reduction <add>, %412, %cst_232 [0] : vector<8x32xf32> to vector<32xf32>
    %414 = vector.shape_cast %413 : vector<32xf32> to vector<1x32xf32>
    %cst_233 = arith.constant dense<0xFF800000> : vector<32xf32>
    %415 = vector.multi_reduction <maximumf>, %400, %cst_233 [0] : vector<8x32xf32> to vector<32xf32>
    %416 = vector.shape_cast %415 : vector<32xf32> to vector<1x32xf32>
    %417 = tpu.concatenate %396, %414 in 0 : vector<1x32xf32>, vector<1x32xf32> -> vector<2x32xf32>
    %418 = tpu.concatenate %398, %416 in 0 : vector<1x32xf32>, vector<1x32xf32> -> vector<2x32xf32>
    %c0_234 = arith.constant 0 : index
    %c0_235 = arith.constant 0 : index
    %419 = vector.load %arg48[%c0_234, %c0_235] : memref<32x1xbf16, #tpu.memory_space<vmem>>, vector<32x1xbf16>
    %420 = arith.truncf %327 : vector<8x32xf32> to vector<8x32xbf16>
    %cst_236 = arith.constant dense<0.000000e+00> : vector<8x1xf32>
    %421 = tpu.matmul %420, %419, %cst_236 {dimension_numbers = #tpu.dot_dimension_numbers<[1], [0], [0], [1], [0, 0, 1, 1], [], []>} : vector<8x32xbf16>, vector<32x1xbf16>, vector<8x1xf32> -> vector<8x1xf32>
    %c0_237 = arith.constant 0 : index
    %c0_238 = arith.constant 0 : index
    %422 = vector.load %arg49[%c0_237, %c0_238] : memref<1x1xf32, #tpu.memory_space<vmem>>, vector<1x1xf32>
    %423 = vector.broadcast %422 : vector<1x1xf32> to vector<8x1xf32>
    %424 = arith.addf %421, %423 : vector<8x1xf32>
    %425 = vector.extract_strided_slice %424 {offsets = [0, 0], sizes = [4, 1], strides = [1, 1]} : vector<8x1xf32> to vector<4x1xf32>
    %426 = vector.extract_strided_slice %327 {offsets = [0, 0], sizes = [4, 32], strides = [1, 1]} : vector<8x32xf32> to vector<4x32xf32>
    %cst_239 = arith.constant dense<0xFF800000> : vector<1xf32>
    %427 = vector.multi_reduction <maximumf>, %425, %cst_239 [0] : vector<4x1xf32> to vector<1xf32>
    %428 = vector.shape_cast %427 : vector<1xf32> to vector<1x1xf32>
    %429 = vector.broadcast %428 : vector<1x1xf32> to vector<4x1xf32>
    %430 = arith.subf %425, %429 : vector<4x1xf32>
    %431 = math.exp %430 : vector<4x1xf32>
    %cst_240 = arith.constant dense<0.000000e+00> : vector<1xf32>
    %432 = vector.multi_reduction <add>, %431, %cst_240 [0] : vector<4x1xf32> to vector<1xf32>
    %433 = vector.shape_cast %432 : vector<1xf32> to vector<1x1xf32>
    %434 = tpu.reciprocal %433 {approx = true} : vector<1x1xf32> -> vector<1x1xf32>
    %435 = vector.broadcast %434 : vector<1x1xf32> to vector<4x1xf32>
    %436 = arith.mulf %431, %435 : vector<4x1xf32>
    %437 = vector.broadcast %436 : vector<4x1xf32> to vector<4x32xf32>
    %438 = arith.mulf %437, %426 : vector<4x32xf32>
    %cst_241 = arith.constant dense<0.000000e+00> : vector<32xf32>
    %439 = vector.multi_reduction <add>, %438, %cst_241 [0] : vector<4x32xf32> to vector<32xf32>
    %440 = vector.shape_cast %439 : vector<32xf32> to vector<1x32xf32>
    %cst_242 = arith.constant dense<0xFF800000> : vector<32xf32>
    %441 = vector.multi_reduction <maximumf>, %426, %cst_242 [0] : vector<4x32xf32> to vector<32xf32>
    %442 = vector.shape_cast %441 : vector<32xf32> to vector<1x32xf32>
    %443 = vector.extract_strided_slice %424 {offsets = [4, 0], sizes = [4, 1], strides = [1, 1]} : vector<8x1xf32> to vector<4x1xf32>
    %444 = vector.extract_strided_slice %327 {offsets = [4, 0], sizes = [4, 32], strides = [1, 1]} : vector<8x32xf32> to vector<4x32xf32>
    %cst_243 = arith.constant dense<0xFF800000> : vector<1xf32>
    %445 = vector.multi_reduction <maximumf>, %443, %cst_243 [0] : vector<4x1xf32> to vector<1xf32>
    %446 = vector.shape_cast %445 : vector<1xf32> to vector<1x1xf32>
    %447 = vector.broadcast %446 : vector<1x1xf32> to vector<4x1xf32>
    %448 = arith.subf %443, %447 : vector<4x1xf32>
    %449 = math.exp %448 : vector<4x1xf32>
    %cst_244 = arith.constant dense<0.000000e+00> : vector<1xf32>
    %450 = vector.multi_reduction <add>, %449, %cst_244 [0] : vector<4x1xf32> to vector<1xf32>
    %451 = vector.shape_cast %450 : vector<1xf32> to vector<1x1xf32>
    %452 = tpu.reciprocal %451 {approx = true} : vector<1x1xf32> -> vector<1x1xf32>
    %453 = vector.broadcast %452 : vector<1x1xf32> to vector<4x1xf32>
    %454 = arith.mulf %449, %453 : vector<4x1xf32>
    %455 = vector.broadcast %454 : vector<4x1xf32> to vector<4x32xf32>
    %456 = arith.mulf %455, %444 : vector<4x32xf32>
    %cst_245 = arith.constant dense<0.000000e+00> : vector<32xf32>
    %457 = vector.multi_reduction <add>, %456, %cst_245 [0] : vector<4x32xf32> to vector<32xf32>
    %458 = vector.shape_cast %457 : vector<32xf32> to vector<1x32xf32>
    %cst_246 = arith.constant dense<0xFF800000> : vector<32xf32>
    %459 = vector.multi_reduction <maximumf>, %444, %cst_246 [0] : vector<4x32xf32> to vector<32xf32>
    %460 = vector.shape_cast %459 : vector<32xf32> to vector<1x32xf32>
    %461 = tpu.concatenate %440, %458 in 0 : vector<1x32xf32>, vector<1x32xf32> -> vector<2x32xf32>
    %462 = tpu.concatenate %442, %460 in 0 : vector<1x32xf32>, vector<1x32xf32> -> vector<2x32xf32>
    %c0_247 = arith.constant 0 : index
    %c0_248 = arith.constant 0 : index
    %463 = vector.load %arg2[%c0_247, %c0_248] : memref<2x10xf32, #tpu.memory_space<vmem>>, vector<2x10xf32>
    %464 = arith.truncf %374 : vector<16x32xf32> to vector<16x32xbf16>
    %cst_249 = arith.constant dense<0.000000e+00> : vector<32x32xf32>
    %465 = tpu.matmul %34, %464, %cst_249 {dimension_numbers = #tpu.dot_dimension_numbers<[1], [0], [0], [1], [0, 0, 1, 1], [], []>} : vector<32x16xbf16>, vector<16x32xbf16>, vector<32x32xf32> -> vector<32x32xf32>
    %c0_250 = arith.constant 0 : index
    %c0_251 = arith.constant 0 : index
    %466 = vector.load %arg6[%c0_250, %c0_251] : memref<32x16xbf16, #tpu.memory_space<vmem>>, vector<32x16xbf16>
    %467 = arith.truncf %374 : vector<16x32xf32> to vector<16x32xbf16>
    %cst_252 = arith.constant dense<0.000000e+00> : vector<32x32xf32>
    %468 = tpu.matmul %466, %467, %cst_252 {dimension_numbers = #tpu.dot_dimension_numbers<[1], [0], [0], [1], [0, 0, 1, 1], [], []>} : vector<32x16xbf16>, vector<16x32xbf16>, vector<32x32xf32> -> vector<32x32xf32>
    %c0_253 = arith.constant 0 : index
    %c0_254 = arith.constant 0 : index
    %469 = vector.load %arg50[%c0_253, %c0_254] : memref<32x128xbf16, #tpu.memory_space<vmem>>, vector<32x128xbf16>
    %470 = arith.truncf %465 : vector<32x32xf32> to vector<32x32xbf16>
    %cst_255 = arith.constant dense<0.000000e+00> : vector<32x128xf32>
    %471 = tpu.matmul %470, %469, %cst_255 {dimension_numbers = #tpu.dot_dimension_numbers<[1], [0], [0], [1], [0, 0, 1, 1], [], []>} : vector<32x32xbf16>, vector<32x128xbf16>, vector<32x128xf32> -> vector<32x128xf32>
    %c0_256 = arith.constant 0 : index
    %c0_257 = arith.constant 0 : index
    %472 = vector.load %arg51[%c0_256, %c0_257] : memref<32x128xbf16, #tpu.memory_space<vmem>>, vector<32x128xbf16>
    %473 = arith.truncf %468 : vector<32x32xf32> to vector<32x32xbf16>
    %cst_258 = arith.constant dense<0.000000e+00> : vector<32x128xf32>
    %474 = tpu.matmul %473, %472, %cst_258 {dimension_numbers = #tpu.dot_dimension_numbers<[1], [0], [0], [1], [0, 0, 1, 1], [], []>} : vector<32x32xbf16>, vector<32x128xbf16>, vector<32x128xf32> -> vector<32x128xf32>
    %475 = arith.addf %471, %474 : vector<32x128xf32>
    %c0_259 = arith.constant 0 : index
    %c0_260 = arith.constant 0 : index
    %476 = vector.load %arg52[%c0_259, %c0_260] : memref<1x128xf32, #tpu.memory_space<vmem>>, vector<1x128xf32>
    %477 = vector.broadcast %476 : vector<1x128xf32> to vector<32x128xf32>
    %478 = arith.addf %475, %477 : vector<32x128xf32>
    %cst_261 = arith.constant 0.000000e+00 : f32
    %479 = vector.broadcast %cst_261 : f32 to vector<32x128xf32>
    %480 = arith.maximumf %478, %479 : vector<32x128xf32>
    %c0_262 = arith.constant 0 : index
    %c0_263 = arith.constant 0 : index
    %481 = vector.load %arg53[%c0_262, %c0_263] : memref<128x1xbf16, #tpu.memory_space<vmem>>, vector<128x1xbf16>
    %482 = arith.truncf %480 : vector<32x128xf32> to vector<32x128xbf16>
    %cst_264 = arith.constant dense<0.000000e+00> : vector<32x1xf32>
    %483 = tpu.matmul %482, %481, %cst_264 {dimension_numbers = #tpu.dot_dimension_numbers<[1], [0], [0], [1], [0, 0, 1, 1], [], []>} : vector<32x128xbf16>, vector<128x1xbf16>, vector<32x1xf32> -> vector<32x1xf32>
    %c0_265 = arith.constant 0 : index
    %c0_266 = arith.constant 0 : index
    %484 = vector.load %arg54[%c0_265, %c0_266] : memref<1x1xf32, #tpu.memory_space<vmem>>, vector<1x1xf32>
    %485 = vector.broadcast %484 : vector<1x1xf32> to vector<32x1xf32>
    %486 = arith.addf %483, %485 : vector<32x1xf32>
    %487 = tpu.iota {dimensions = array<i32: 0>} : vector<32x32xi32>
    %488 = tpu.iota {dimensions = array<i32: 1>} : vector<32x32xi32>
    %489 = arith.cmpi eq, %487, %488 : vector<32x32xi32>
    %490 = arith.extui %489 : vector<32x32xi1> to vector<32x32xi32>
    %491 = arith.sitofp %490 : vector<32x32xi32> to vector<32x32xf32>
    %492 = vector.broadcast %486 : vector<32x1xf32> to vector<32x32xf32>
    %493 = arith.mulf %492, %491 : vector<32x32xf32>
    %cst_267 = arith.constant dense<0.000000e+00> : vector<32xf32>
    %494 = vector.multi_reduction <add>, %493, %cst_267 [0] : vector<32x32xf32> to vector<32xf32>
    %495 = vector.shape_cast %494 : vector<32xf32> to vector<1x32xf32>
    %c0_268 = arith.constant 0 : index
    %c0_269 = arith.constant 0 : index
    %496 = vector.load %arg61[%c0_268, %c0_269] : memref<1x32xf32, #tpu.memory_space<vmem>>, vector<1x32xf32>
    tpu.vector_store %arg61[%c0_268, %c0_269], %495 {strides = array<i32>} : memref<1x32xf32, #tpu.memory_space<vmem>>, vector<1x32xf32>,
    %c0_270 = arith.constant 0 : index
    %c0_271 = arith.constant 0 : index
    %497 = vector.load %arg55[%c0_270, %c0_271] : memref<32x128xbf16, #tpu.memory_space<vmem>>, vector<32x128xbf16>
    %498 = arith.truncf %461 : vector<2x32xf32> to vector<2x32xbf16>
    %cst_272 = arith.constant dense<0.000000e+00> : vector<2x128xf32>
    %499 = tpu.matmul %498, %497, %cst_272 {dimension_numbers = #tpu.dot_dimension_numbers<[1], [0], [0], [1], [0, 0, 1, 1], [], []>} : vector<2x32xbf16>, vector<32x128xbf16>, vector<2x128xf32> -> vector<2x128xf32>
    %c0_273 = arith.constant 0 : index
    %c0_274 = arith.constant 0 : index
    %500 = vector.load %arg56[%c0_273, %c0_274] : memref<32x128xbf16, #tpu.memory_space<vmem>>, vector<32x128xbf16>
    %501 = arith.truncf %462 : vector<2x32xf32> to vector<2x32xbf16>
    %cst_275 = arith.constant dense<0.000000e+00> : vector<2x128xf32>
    %502 = tpu.matmul %501, %500, %cst_275 {dimension_numbers = #tpu.dot_dimension_numbers<[1], [0], [0], [1], [0, 0, 1, 1], [], []>} : vector<2x32xbf16>, vector<32x128xbf16>, vector<2x128xf32> -> vector<2x128xf32>
    %503 = arith.addf %499, %502 : vector<2x128xf32>
    %c0_276 = arith.constant 0 : index
    %c0_277 = arith.constant 0 : index
    %504 = vector.load %arg57[%c0_276, %c0_277] : memref<10x128xbf16, #tpu.memory_space<vmem>>, vector<10x128xbf16>
    %505 = arith.truncf %463 : vector<2x10xf32> to vector<2x10xbf16>
    %cst_278 = arith.constant dense<0.000000e+00> : vector<2x128xf32>
    %506 = tpu.matmul %505, %504, %cst_278 {dimension_numbers = #tpu.dot_dimension_numbers<[1], [0], [0], [1], [0, 0, 1, 1], [], []>} : vector<2x10xbf16>, vector<10x128xbf16>, vector<2x128xf32> -> vector<2x128xf32>
    %507 = arith.addf %503, %506 : vector<2x128xf32>
    %c0_279 = arith.constant 0 : index
    %c0_280 = arith.constant 0 : index
    %508 = vector.load %arg58[%c0_279, %c0_280] : memref<1x128xf32, #tpu.memory_space<vmem>>, vector<1x128xf32>
    %509 = vector.broadcast %508 : vector<1x128xf32> to vector<2x128xf32>
    %510 = arith.addf %507, %509 : vector<2x128xf32>
    %cst_281 = arith.constant 0.000000e+00 : f32
    %511 = vector.broadcast %cst_281 : f32 to vector<2x128xf32>
    %512 = arith.maximumf %510, %511 : vector<2x128xf32>
    %c0_282 = arith.constant 0 : index
    %c0_283 = arith.constant 0 : index
    %513 = vector.load %arg59[%c0_282, %c0_283] : memref<128x32xbf16, #tpu.memory_space<vmem>>, vector<128x32xbf16>
    %514 = arith.truncf %512 : vector<2x128xf32> to vector<2x128xbf16>
    %cst_284 = arith.constant dense<0.000000e+00> : vector<2x32xf32>
    %515 = tpu.matmul %514, %513, %cst_284 {dimension_numbers = #tpu.dot_dimension_numbers<[1], [0], [0], [1], [0, 0, 1, 1], [], []>} : vector<2x128xbf16>, vector<128x32xbf16>, vector<2x32xf32> -> vector<2x32xf32>
    %c0_285 = arith.constant 0 : index
    %c0_286 = arith.constant 0 : index
    %516 = vector.load %arg60[%c0_285, %c0_286] : memref<1x32xf32, #tpu.memory_space<vmem>>, vector<1x32xf32>
    %517 = vector.broadcast %516 : vector<1x32xf32> to vector<2x32xf32>
    %518 = arith.addf %515, %517 : vector<2x32xf32>
    %c0_287 = arith.constant 0 : index
    %c0_288 = arith.constant 0 : index
    %519 = vector.load %arg62[%c0_287, %c0_288] : memref<2x32xf32, #tpu.memory_space<vmem>>, vector<2x32xf32>
    tpu.vector_store %arg62[%c0_287, %c0_288], %518 {strides = array<i32>} : memref<2x32xf32, #tpu.memory_space<vmem>>, vector<2x32xf32>,
    %520 = tpu.concatenate %417, %418, %461, %462, %463 in 1 : vector<2x32xf32>, vector<2x32xf32>, vector<2x32xf32>, vector<2x32xf32>, vector<2x10xf32> -> vector<2x138xf32>
    %c0_289 = arith.constant 0 : index
    %c0_290 = arith.constant 0 : index
    %521 = vector.load %arg63[%c0_289, %c0_290] : memref<2x138xf32, #tpu.memory_space<vmem>>, vector<2x138xf32>
    tpu.vector_store %arg63[%c0_289, %c0_290], %520 {strides = array<i32>} : memref<2x138xf32, #tpu.memory_space<vmem>>, vector<2x138xf32>,
    return
  }
}

</mosaic_0001>

<bundles_post_ra>
// kernel: forward.1
= control target key start
LH: loop header
LB: loop body
LE: loop exit
PB: predicated region body
PF: predicated region fallthrough
CT: control target
= control target key end

     0   :  { %s8267_s6 = smov 1   ;;  %s8268_s10 = smov 2   ;;  %s9789_s0 = inlined_call_operand.smem [shape: u32[64], index: -1, kind: input, shape index: {}] }
   0x1   :  { %s8355_s5 = sld [smem:[%s9789_s0]]   ;;  %s8269_s14 = smov 3  }
   0x2   :  { %s8360_s9 = sld [smem:[%s9789_s0 + %s8267_s6]]   ;;  %s8270_s18 = smov 4  }
   0x3   :  { %s8365_s13 = sld [smem:[%s9789_s0 + %s8268_s10]]   ;;  %s8271_s22 = smov 5  }
   0x4   :  { %s8370_s17 = sld [smem:[%s9789_s0 + %s8269_s14]]   ;;  %s8272_s26 = smov 6  }
   0x5   :  { %s8375_s21 = sld [smem:[%s9789_s0 + %s8270_s18]]   ;;  %s8273_s30 = smov 7  }
   0x6   :  { %s8380_s25 = sld [smem:[%s9789_s0 + %s8271_s22]]   ;;  %s8274_s4 = smov 8  }
   0x7   :  { %s8385_s29 = sld [smem:[%s9789_s0 + %s8272_s26]]   ;;  %s8275_s10 = smov 9  }
   0x8   :  { %s8390_s3 = sld [smem:[%s9789_s0 + %s8273_s30]]   ;;  %s8276_s15 = smov 10  }
   0x9   :  { %9847 = sst [smem:[#allocation27_spill]] %s8365_s13  ;;  %s8277_s20 = smov 11  }
   0xa   :  { %s8395_s8 = sld [smem:[%s9789_s0 + %s8274_s4]]   ;;  %s8278_s26 = smov 12  }
   0xb   :  { %9848 = sst [smem:[#allocation28_spill]] %s8375_s21  ;;  %s8279_s1 = smov 13  }
   0xc   :  { %9849 = sst [smem:[#allocation29_spill]] %s8380_s25  ;;  %s8280_s7 = smov 14  }
   0xd   :  { %9850 = sst [smem:[#allocation30_spill]] %s8385_s29  ;;  %s8282_s22 = smov 16  }
   0xe   :  { %9851 = sst [smem:[#allocation31_spill]] %s8390_s3  ;;  %s8283_s28 = smov 17  }
   0xf   :  { %s8400_s14 = sld [smem:[%s9789_s0 + %s8275_s10]]   ;;  %s8314_s23 = smov 48  }
  0x10   :  { %9852 = sst [smem:[#allocation32_spill]] %s8395_s8  ;;  %s8316_s10 = smov 51  }
  0x11   :  { %s8405_s19 = sld [smem:[%s9789_s0 + %s8276_s15]]   ;;  %s8281_s15 = smov 15  }
  0x12   :  { %s8410_s24 = sld [smem:[%s9789_s0 + %s8277_s20]]   ;;  %s8317_s16 = smov 52  }
  0x13   :  { %s8415_s30 = sld [smem:[%s9789_s0 + %s8278_s26]]  }
  0x14   :  { %s8420_s6 = sld [smem:[%s9789_s0 + %s8279_s1]]   ;;  %s8315_s1 = smov 50  }
  0x15   :  { %9853 = sst [smem:[#allocation33_spill]] %s8400_s14 }
  0x16   :  { %s8425_s12 = sld [smem:[%s9789_s0 + %s8280_s7]]   ;;  %s8284_s7 = smov 18  }
  0x17   :  { %9854 = sst [smem:[#allocation34_spill]] %s8405_s19 }
  0x18   :  { %9855 = sst [smem:[#allocation35_spill]] %s8410_s24 }
  0x19   :  { %9856 = sst [smem:[#allocation36_spill]] %s8415_s30 }
  0x1a   :  { %s8430_s20 = sld [smem:[%s9789_s0 + %s8281_s15]]   ;;  %s8285_s15 = smov 19  }
  0x1b   :  { %s8435_s27 = sld [smem:[%s9789_s0 + %s8282_s22]]   ;;  %s8286_s22 = smov 20  }
  0x1c   :  { %9857 = sst [smem:[#allocation37_spill]] %s8425_s12 }
  0x1d   :  { %s8440_s4 = sld [smem:[%s9789_s0 + %s8283_s28]]   ;;  %s8287_s28 = smov 21  }
  0x1e   :  { %s8445_s13 = sld [smem:[%s9789_s0 + %s8284_s7]]   ;;  %s8288_s7 = smov 22  }
  0x1f   :  { %s8450_s29 = sld [smem:[%s9789_s0 + %s8285_s15]]   ;;  %s8289_s15 = smov 23  }
  0x20   :  { %s8455_s19 = sld [smem:[%s9789_s0 + %s8286_s22]]   ;;  %s8290_s22 = smov 24  }
  0x21   :  { %9858 = sst [smem:[#allocation38_spill]] %s8435_s27 }
  0x22   :  { %s8460_s14 = sld [smem:[%s9789_s0 + %s8287_s28]]   ;;  %s8291_s28 = smov 25  }
  0x23   :  { %s8465_s3 = sld [smem:[%s9789_s0 + %s8288_s7]]   ;;  %s8292_s7 = smov 26  }
  0x24   :  { %9859 = sst [smem:[#allocation39_spill]] %s8445_s13 }
  0x25   :  { %9860 = sst [smem:[#allocation40_spill]] %s8450_s29 }
  0x26   :  { %9861 = sst [smem:[#allocation41_spill]] %s8455_s19 }
  0x27   :  { %s8470_s30 = sld [smem:[%s9789_s0 + %s8289_s15]]   ;;  %s8293_s15 = smov 27  }
  0x28   :  { %s8475_s8 = sld [smem:[%s9789_s0 + %s8290_s22]]   ;;  %s8294_s22 = smov 28  }
  0x29   :  { %9862 = sst [smem:[#allocation42_spill]] %s8465_s3 }
  0x2a   :  { %s8480_s19 = sld [smem:[%s9789_s0 + %s8291_s28]]   ;;  %s8295_s28 = smov 29  }
  0x2b   :  { %s8485_s3 = sld [smem:[%s9789_s0 + %s8292_s7]]   ;;  %s8296_s7 = smov 30  }
  0x2c   :  { %s8495_s24 = sld [smem:[%s9789_s0 + %s8294_s22]]   ;;  %s8298_s22 = smov 32  }
  0x2d   :  { %9863 = sst [smem:[#allocation43_spill]] %s8470_s30 }
  0x2e   :  { %9864 = sst [smem:[#allocation44_spill]] %s8475_s8 }
  0x2f   :  { %s8490_s30 = sld [smem:[%s9789_s0 + %s8293_s15]]   ;;  %s8297_s15 = smov 31  }
  0x30   :  { %9865 = sst [smem:[#allocation45_spill]] %s8480_s19 }
  0x31   :  { %9866 = sst [smem:[#allocation46_spill]] %s8485_s3 }
  0x32   :  { %9868 = sst [smem:[#allocation48_spill]] %s8495_s24 }
  0x33   :  { %s8500_s19 = sld [smem:[%s9789_s0 + %s8295_s28]]   ;;  %s8299_s28 = smov 33  }
  0x34   :  { %s8505_s3 = sld [smem:[%s9789_s0 + %s8296_s7]]   ;;  %s8300_s7 = smov 34  }
  0x35   :  { %9867 = sst [smem:[#allocation47_spill]] %s8490_s30 }
  0x36   :  { %s8510_s30 = sld [smem:[%s9789_s0 + %s8297_s15]]   ;;  %s8301_s15 = smov 35  }
  0x37   :  { %s8515_s24 = sld [smem:[%s9789_s0 + %s8298_s22]]   ;;  %s8302_s22 = smov 36  }
  0x38   :  { %s8535_s27 = sld [smem:[%s9789_s0 + %s8302_s22]]   ;;  %s8306_s22 = smov 40  }
  0x39   :  { %9869 = sst [smem:[#allocation49_spill]] %s8500_s19 }
  0x3a   :  { %9870 = sst [smem:[#allocation50_spill]] %s8505_s3 }
  0x3b   :  { %s8520_s19 = sld [smem:[%s9789_s0 + %s8299_s28]]   ;;  %s8303_s28 = smov 37  }
  0x3c   :  { %9871 = sst [smem:[#allocation51_spill]] %s8510_s30 }
  0x3d   :  { %s8525_s3 = sld [smem:[%s9789_s0 + %s8300_s7]]   ;;  %s8304_s7 = smov 38  }
  0x3e   :  { %s8530_s30 = sld [smem:[%s9789_s0 + %s8301_s15]]   ;;  %s8305_s15 = smov 39  }
  0x3f   :  { %9875 = sst [smem:[#allocation55_spill]] %s8535_s27 }
  0x40   :  { %s8555_s27 = sld [smem:[%s9789_s0 + %s8306_s22]]   ;;  %s8310_s22 = smov 44  }
  0x41   :  { %9872 = sst [smem:[#allocation52_spill]] %s8520_s19 }
  0x42   :  { %s8540_s19 = sld [smem:[%s9789_s0 + %s8303_s28]]   ;;  %s8307_s28 = smov 41  }
  0x43   :  { %9873 = sst [smem:[#allocation53_spill]] %s8525_s3 }
  0x44   :  { %9874 = sst [smem:[#allocation54_spill]] %s8530_s30 }
  0x45   :  { %s8545_s3 = sld [smem:[%s9789_s0 + %s8304_s7]]   ;;  %s8308_s7 = smov 42  }
  0x46   :  { %s8550_s30 = sld [smem:[%s9789_s0 + %s8305_s15]]   ;;  %s8309_s15 = smov 43  }
  0x47   :  { %9877 = sst [smem:[#allocation57_spill]] %s8555_s27 }
  0x48   :  { %s8560_s25 = sld [smem:[%s9789_s0 + %s8307_s28]]   ;;  %s8311_s28 = smov 45  }
  0x49   :  { %s8565_s29 = sld [smem:[%s9789_s0 + %s8308_s7]]   ;;  %s8312_s7 = smov 46  }
  0x4a   :  { %s8575_s27 = sld [smem:[%s9789_s0 + %s8310_s22]]   ;;  %s8322_s22 = smov 58  }
  0x4b   :  { %s8608_s12 = sld [smem:[%s9789_s0 + %s8317_s16]]   ;;  %s8321_s16 = smov 57  }
  0x4c   :  { %9876 = sst [smem:[#allocation56_spill]] %s8550_s30 }
  0x4d   :  { %s8570_s30 = sld [smem:[%s9789_s0 + %s8309_s15]]   ;;  %s8313_s15 = smov 47  }
  0x4e   :  { %9878 = sst [smem:[#allocation58_spill]] %s8560_s25 }
  0x4f   :  { %9879 = sst [smem:[#allocation59_spill]] %s8565_s29 }
  0x50   :  { %9880 = sst [smem:[#allocation60_spill]] %s8575_s27 }
  0x51   :  { %s8580_s25 = sld [smem:[%s9789_s0 + %s8311_s28]]  }
  0x52   :  { %s8585_s29 = sld [smem:[%s9789_s0 + %s8312_s7]]  }
  0x53   :  { %s6334_s13 = sld [smem:[%s9789_s0 + %s8313_s15]]  }
  0x54   :  { %s8593_s27 = sld [smem:[%s9789_s0 + %s8314_s23]]   ;;  %s8318_s23 = smov 53  }
  0x57   :  { %9881 = sst [smem:[#allocation61_spill]] %s8580_s25 }
  0x58   :  { %9882 = sst [smem:[#allocation62_spill]] %s8585_s29 }
  0x59   :  { %s8598_s25 = sld [smem:[%s9789_s0 + %s8315_s1]]   ;;  %s8319_s1 = smov 55   ;;  %v133_v0 = vstv %s6334_s13 }
  0x5a   :  { %9883 = sst [smem:[#allocation63_spill]] %s8593_s27  ;;  %134 = vst [vmem:[#allocation2] sm:$0x1] %v133_v0  ;;  %s8323_s13 = smov 59  }
  0x5b   :  { %s8603_s29 = sld [smem:[%s9789_s0 + %s8316_s10]]   ;;  %s8320_s10 = smov 56  }
  0x5c   :  { %s8613_s27 = sld [smem:[%s9789_s0 + %s8318_s23]]  }
  0x5d   :  { %s8623_s15 = sld [smem:[%s9789_s0 + %s8320_s10]]   ;;  %s8324_s10 = smov 60  }
  0x5e   :  { %s8628_s23 = sld [smem:[%s9789_s0 + %s8321_s16]]   ;;  %s8329_s16 = smov 54  }
  0x5f   :  { %9884 = sst [smem:[#allocation64_spill]] %s8598_s25 }
  0x60   :  { %s8618_s25 = sld [smem:[%s9789_s0 + %s8319_s1]]  }
  0x61   :  { %9885 = sst [smem:[#allocation65_spill]] %s8603_s29  ;;  %s8325_s29 = smov 61  }
  0x62   :  { %9886 = sst [smem:[#allocation66_spill]] %s8613_s27  ;;  %s8326_s27 = smov 62  }
  0x63   :  { %9888 = sst [smem:[#allocation68_spill]] %s8623_s15 }
  0x64   :  { %9889 = sst [smem:[#allocation69_spill]] %s8628_s23 }
  0x65   :  { %s8633_s1 = sld [smem:[%s9789_s0 + %s8322_s22]]  }
  0x66   :  { %9887 = sst [smem:[#allocation67_spill]] %s8618_s25  ;;  %s8328_s25 = smov 49  }
  0x67   :  { %s8638_s7 = sld [smem:[%s9789_s0 + %s8323_s13]]   ;;  %s8327_s13 = smov 63  }
  0x68   :  { %s8643_s15 = sld [smem:[%s9789_s0 + %s8324_s10]]  }
  0x69   :  { %s8648_s23 = sld [smem:[%s9789_s0 + %s8325_s29]]  }
  0x6a   :  { %s8653_s21 = sld [smem:[%s9789_s0 + %s8326_s27]]  }
  0x6b   :  { %s6336_s8 = sld [smem:[%s9789_s0 + %s8328_s25]]  }
  0x6d   :  { %9890 = sst [smem:[#allocation70_spill]] %s8638_s7 }
  0x6e   :  { %s8658_s7 = sld [smem:[%s9789_s0 + %s8327_s13]]  }
  0x6f   :  { %9891 = sst [smem:[#allocation71_spill]] %s8648_s23 }
  0x70   :  { %s6341_s23 = sld [smem:[%s9789_s0 + %s8329_s16]]  }
  0x71   :  { %v135_v1 = vstv %s6336_s8 }
  0x72   :  { %136 = vst [vmem:[#allocation3] sm:$0x1] %v135_v1 }
  0x76   :  { %v137_v2 = vstv %s6341_s23 }
  0x77   :  { %138 = vst [vmem:[#allocation4] sm:$0x1] %v137_v2 }
  0x78   :  { %139 = vsyncpa [#allocation6], 0 }
  0x79   :  { %140 = vsyncpa [#allocation9], 0 }
  0x7a   :  { %141 = vsyncpa [#allocation12], 0 }
  0x7b   :  { %142 = vsyncpa [#allocation15], 0 }
  0x7c   :  { %143 = vsyncpa [#allocation7], 0 }
  0x7d   :  { %144 = vsyncpa [#allocation19], 0  ;;  %s8330_s27 = smov [#allocation8]   ;;  %s8331_s26 = smov [#allocation11]  }
  0x7e   :  { %s233_s22 = sshll.u32 %s8330_s27, 4  ;;  %s261_s13 = sshll.u32 %s8331_s26, 4  ;;  %s234_s22 = int_to_ptr.vmem [resolvable:$true] %s233_s22  ;;  %s262_s13 = int_to_ptr.vmem [resolvable:$true] %s261_s13 }
  0x7f   :  { %s8035_s0 = scalar_lea.hbm %s8540_s19, 16 }
  0x80   :  { %p8036_p0 = scmp.ne.s32.totalorder %s8540_s19, %s8035_s0  ;;  %p8039_p1 = scmp.lt.u32.totalorder %s8035_s0, %s8540_s19 }
  0x82   :  { %p8041_p2 = pnand %p8039_p1, %p8036_p0 }
  0x84   :  { %8044 = shalt.err (!%p8041_p2)
}
  0x85   :  { %s8045_s8 = scalar_lea.vmem %s234_s22, 16  ;;  %s8049_s23 = scalar_lea.vmem %s234_s22, 32 }
  0x86   :  { %p8046_p3 = scmp.ne.s32.totalorder %s234_s22, %s8045_s8  ;;  %p8050_p4 = scmp.lt.s32.totalorder %s234_s22, %s234_s22 }
  0x87   :  { %p8051_p5 = scmp.lt.s32.totalorder %s8049_s23, %s8045_s8 }
  0x89   :  { %p8052_p6 = por %p8051_p5, %p8050_p4 }
  0x8b   :  { %p8053_p7 = pnand %p8052_p6, %p8046_p3 }
  0x8d   :  { %8056 = shalt.err (!%p8053_p7)
}
  0x8e   :  { %236 = dma.hbm_to_vmem [thread:$0]  %s8540_s19, 16, %s234_s22, [#allocation9]  }
  0x8f   :  { %s8057_s28 = scalar_lea.hbm %s8570_s30, 16 }
  0x90   :  { %p8058_p8 = scmp.ne.s32.totalorder %s8570_s30, %s8057_s28  ;;  %p8061_p9 = scmp.lt.u32.totalorder %s8057_s28, %s8570_s30 }
  0x92   :  { %p8063_p10 = pnand %p8061_p9, %p8058_p8 }
  0x94   :  { %8066 = shalt.err (!%p8063_p10)
}
  0x95   :  { %s8067_s2 = scalar_lea.vmem %s262_s13, 16  ;;  %s8071_s25 = scalar_lea.vmem %s262_s13, 32 }
  0x96   :  { %p8068_p11 = scmp.ne.s32.totalorder %s262_s13, %s8067_s2  ;;  %p8072_p12 = scmp.lt.s32.totalorder %s262_s13, %s262_s13 }
  0x97   :  { %p8073_p13 = scmp.lt.s32.totalorder %s8071_s25, %s8067_s2 }
  0x99   :  { %p8074_p0 = por %p8073_p13, %p8072_p12 }
  0x9b   :  { %p8075_p1 = pnand %p8074_p0, %p8068_p11 }
  0x9d   :  { %8078 = shalt.err (!%p8075_p1)
}
  0x9e   :  { %264 = dma.hbm_to_vmem [thread:$0]  %s8570_s30, 16, %s262_s13, [#allocation12]  }
  0x9f   :  { %s8332_s10 = smov [#allocation14]   ;;  %s8333_s11 = smov [#allocation5]  }
  0xa0   :  { %s307_s19 = sshll.u32 %s8332_s10, 4  ;;  %s215_s16 = sshll.u32 %s8333_s11, 4  ;;  %s308_s19 = int_to_ptr.vmem [resolvable:$true] %s307_s19  ;;  %s216_s16 = int_to_ptr.vmem [resolvable:$true] %s215_s16 }
  0xa1   :  { %s8079_s29 = scalar_lea.hbm %s8633_s1, 16 }
  0xa2   :  { %p8080_p2 = scmp.ne.s32.totalorder %s8633_s1, %s8079_s29  ;;  %p8083_p3 = scmp.lt.u32.totalorder %s8079_s29, %s8633_s1 }
  0xa4   :  { %p8085_p4 = pnand %p8083_p3, %p8080_p2 }
  0xa6   :  { %8088 = shalt.err (!%p8085_p4)
}
  0xa7   :  { %s8089_s18 = scalar_lea.vmem %s308_s19, 16  ;;  %s8093_s27 = scalar_lea.vmem %s308_s19, 32 }
  0xa8   :  { %p8090_p5 = scmp.ne.s32.totalorder %s308_s19, %s8089_s18  ;;  %p8094_p6 = scmp.lt.s32.totalorder %s308_s19, %s308_s19 }
  0xa9   :  { %p8095_p7 = scmp.lt.s32.totalorder %s8093_s27, %s8089_s18 }
  0xab   :  { %p8096_p8 = por %p8095_p7, %p8094_p6 }
  0xad   :  { %p8097_p9 = pnand %p8096_p8, %p8090_p5 }
  0xaf   :  { %8100 = shalt.err (!%p8097_p9)
}
  0xb0   :  { %310 = dma.hbm_to_vmem [thread:$0]  %s8633_s1, 16, %s308_s19, [#allocation15]  }
  0xb1   :  { %s8101_s30 = scalar_lea.hbm %s8515_s24, 16 }
  0xb2   :  { %p8102_p10 = scmp.ne.s32.totalorder %s8515_s24, %s8101_s30  ;;  %p8105_p11 = scmp.lt.u32.totalorder %s8101_s30, %s8515_s24 }
  0xb4   :  { %p8107_p12 = pnand %p8105_p11, %p8102_p10 }
  0xb6   :  { %8110 = shalt.err (!%p8107_p12)
}
  0xb7   :  { %s8111_s22 = scalar_lea.vmem %s216_s16, 16  ;;  %s8115_s26 = scalar_lea.vmem %s216_s16, 32 }
  0xb8   :  { %p8112_p13 = scmp.ne.s32.totalorder %s216_s16, %s8111_s22  ;;  %p8116_p0 = scmp.lt.s32.totalorder %s216_s16, %s216_s16 }
  0xb9   :  { %p8117_p1 = scmp.lt.s32.totalorder %s8115_s26, %s8111_s22 }
  0xbb   :  { %p8118_p2 = por %p8117_p1, %p8116_p0 }
  0xbd   :  { %p8119_p3 = pnand %p8118_p2, %p8112_p13 }
  0xbf   :  { %8122 = shalt.err (!%p8119_p3)
}
  0xc0   :  { %218 = dma.hbm_to_vmem [thread:$0]  %s8515_s24, 16, %s216_s16, [#allocation6]  }
  0xc1   :  { %s8334_s13 = smov [#allocation10]   ;;  %s8335_s0 = smov [#allocation13]  }
  0xc2   :  { %s243_s1 = sshll.u32 %s8334_s13, 4  ;;  %s287_s8 = sshll.u32 %s8335_s0, 4  ;;  %s244_s1 = int_to_ptr.vmem [resolvable:$true] %s243_s1  ;;  %s288_s8 = int_to_ptr.vmem [resolvable:$true] %s287_s8 }
  0xc3   :  { %s8123_s23 = scalar_lea.hbm %s8545_s3, 16 }
  0xc4   :  { %p8124_p4 = scmp.ne.s32.totalorder %s8545_s3, %s8123_s23  ;;  %p8127_p5 = scmp.lt.u32.totalorder %s8123_s23, %s8545_s3 }
  0xc6   :  { %p8129_p6 = pnand %p8127_p5, %p8124_p4 }
  0xc8   :  { %8132 = shalt.err (!%p8129_p6)
}
  0xc9   :  { %s8133_s28 = scalar_lea.vmem %s244_s1, 16  ;;  %s8137_s2 = scalar_lea.vmem %s244_s1, 32 }
  0xca   :  { %p8134_p7 = scmp.ne.s32.totalorder %s244_s1, %s8133_s28  ;;  %p8138_p8 = scmp.lt.s32.totalorder %s244_s1, %s244_s1 }
  0xcb   :  { %p8139_p9 = scmp.lt.s32.totalorder %s8137_s2, %s8133_s28 }
  0xcd   :  { %p8140_p10 = por %p8139_p9, %p8138_p8 }
  0xcf   :  { %p8141_p11 = pnand %p8140_p10, %p8134_p7 }
  0xd1   :  { %8144 = shalt.err (!%p8141_p11)
}
  0xd2   :  { %246 = dma.hbm_to_vmem [thread:$0]  %s8545_s3, 16, %s244_s1, [#allocation9]  }
  0xd3   :  { %s8145_s24 = scalar_lea.hbm %s8608_s12, 16 }
  0xd4   :  { %p8146_p12 = scmp.ne.s32.totalorder %s8608_s12, %s8145_s24  ;;  %p8149_p13 = scmp.lt.u32.totalorder %s8145_s24, %s8608_s12 }
  0xd6   :  { %p8151_p0 = pnand %p8149_p13, %p8146_p12 }
  0xd8   :  { %8154 = shalt.err (!%p8151_p0)
}
  0xd9   :  { %s8155_s25 = scalar_lea.vmem %s288_s8, 16  ;;  %s8159_s10 = scalar_lea.vmem %s288_s8, 32 }
  0xda   :  { %p8156_p1 = scmp.ne.s32.totalorder %s288_s8, %s8155_s25  ;;  %p8160_p2 = scmp.lt.s32.totalorder %s288_s8, %s288_s8 }
  0xdb   :  { %p8161_p3 = scmp.lt.s32.totalorder %s8159_s10, %s8155_s25 }
  0xdd   :  { %p8162_p4 = por %p8161_p3, %p8160_p2 }
  0xdf   :  { %p8163_p5 = pnand %p8162_p4, %p8156_p1 }
  0xe1   :  { %8166 = shalt.err (!%p8163_p5)
}
  0xe2   :  { %290 = dma.hbm_to_vmem [thread:$0]  %s8608_s12, 16, %s288_s8, [#allocation12]  }
  0xe3   :  { %s8336_s19 = smov [#allocation16]   ;;  %s8167_s11 = scalar_lea.hbm %s8643_s15, 16 }
  0xe4   :  { %s319_s3 = sshll.u32 %s8336_s19, 4  ;;  %p8168_p6 = scmp.ne.s32.totalorder %s8643_s15, %s8167_s11  ;;  %s320_s3 = int_to_ptr.vmem [resolvable:$true] %s319_s3 }
  0xe5   :  { %p8171_p7 = scmp.lt.u32.totalorder %s8167_s11, %s8643_s15 }
  0xe7   :  { %p8173_p8 = pnand %p8171_p7, %p8168_p6 }
  0xe9   :  { %8176 = shalt.err (!%p8173_p8)
}
  0xea   :  { %s8177_s16 = scalar_lea.vmem %s320_s3, 16  ;;  %s8181_s29 = scalar_lea.vmem %s320_s3, 32 }
  0xeb   :  { %p8178_p9 = scmp.ne.s32.totalorder %s320_s3, %s8177_s16  ;;  %p8182_p10 = scmp.lt.s32.totalorder %s320_s3, %s320_s3 }
  0xec   :  { %p8183_p11 = scmp.lt.s32.totalorder %s8181_s29, %s8177_s16 }
  0xee   :  { %p8184_p12 = por %p8183_p11, %p8182_p10 }
  0xf0   :  { %p8185_p13 = pnand %p8184_p12, %p8178_p9 }
  0xf2   :  { %8188 = shalt.err (!%p8185_p13)
}
  0xf3   :  { %322 = dma.hbm_to_vmem [thread:$0]  %s8643_s15, 16, %s320_s3, [#allocation15]  }
  0xf4   :  { %8255 = dma.done.wait [#allocation6], 16  }
  0xf5   :  { %8256 = vsyncadd [#allocation6], 4294967280 }
  0xf6   :  { %8257 = dma.done.wait [#allocation9], 32  }
  0xf7   :  { %8258 = vsyncadd [#allocation9], 4294967264 }
  0xf8   :  { %8259 = dma.done.wait [#allocation12], 32  }
  0xf9   :  { %8260 = vsyncadd [#allocation12], 4294967264 }
  0xfa   :  { %8261 = dma.done.wait [#allocation15], 32  }
  0xfb   :  { %8262 = vsyncadd [#allocation15], 4294967264  ;;  %v9829_v3 = vmov 0.0   ;;  %vm8338_vm0 = vmmov 0   ;;  %v7675_v4 = vld [vmem:[%s8420_s6] sm:$0xff]   ;;  %v346_v6 = vld [vmem:[%s8355_s5 + $0x8] sm:$0xff] }
  0xfc   :  { %7129 = vmatprep.subr.bf16.mxu0 %v9829_v3  ;;  %7131 = vmatprep.mubr.msk.bf16.mxu0 %vm8338_vm0, %v9829_v3  ;;  %v345_v5 = vld [vmem:[%s8355_s5] sm:$0xff]  ;;  %vm501_vm1 = vcmask 1045504   ;;  %vm363_vm2 = vcmask 130048   ;;  %vm497_vm3 = vcmask 97280   ;;  %v7678_v13 = vld [vmem:[%s8430_s20 + $0x8] sm:$0xff]   ;;  %vm847_vm4 = vcmask 1043456  }
  0xfd   :  { %7135 = vmatprep.subr.bf16.mxu1 %v9829_v3  ;;  %7139 = vmatprep.mubr.msk.bf16.mxu1 %vm8338_vm0, %v9829_v3  ;;  %v349_v7 = vpack.c.bf16 %v346_v6, %v345_v5  ;;  %v7676_v8 = vld [vmem:[%s8440_s4] sm:$0x3f]   ;;  %v769_v16 = vld [vmem:[%s8370_s17 + $0x8] sm:$0xff]  ;;  %v9827_v19 = vmov 0   ;;  %v774_v23 = vld [vmem:[%s8460_s14 + $0x10] sm:$0xff]  ;;  %s9892_s5 = sld [smem:[#allocation44_spill]] }
  0xfe   :  { %7130 = vmatpush3.bf16.msra.mxu0 %v7675_v4  ;;  %v503_v9 = vsel %vm501_vm1, %v7676_v8, 0  ;;  %v481_v10 = vld [vmem:[%s8360_s9] sm:$0xff]  ;;  %v773_v20 = vld [vmem:[%s8460_s14 + $0x8] sm:$0xff]  ;;  %7674 = vset.pattern.permute.xlu1 %v9827_v19  ;;  %vm840_vm5 = vcmask 64512   ;;  %v6370_v27 = vcombine.high %v774_v23, %v774_v23  ;;  %v770_v28 = vld [vmem:[%s8370_s17 + $0x10] sm:$0xff]  ;;  %v6369_v31 = vcombine.low %v774_v23, %v774_v23  ;;  %s9893_s9 = sld [smem:[#allocation28_spill]] }
  0xff   :  { %7143 = vmatprep.subr.bf16.mxu0 %v9829_v3  ;;  %v484_v11 = vpack.c.bf16 %v481_v10, %v481_v10  ;;  %v7677_v12 = vld [vmem:[%s8430_s20] sm:$0xff]   ;;  %v6368_v21 = vcombine.high %v773_v20, %v773_v20  ;;  %v6367_v22 = vcombine.low %v773_v20, %v773_v20  ;;  %7673 = vset.pattern.permute.xlu0 %v9827_v19  ;;  %v771_v29 = vld [vmem:[%s8370_s17 + $0x18] sm:$0xff]  ;;  %s9895_s6 = sld [smem:[#allocation39_spill]]  ;;  %s9896_s12 = sld [smem:[#allocation40_spill]]  ;;  %vm434_vm6 = vcmask 261120  }
 0x100   :  { %7136 = vmatpush3.bf16.msra.mxu1 %v7677_v12  ;;  %v772_v14 = vld [vmem:[%s8460_s14] sm:$0xff]  ;;  %v8733_v30 = vpack.c.bf16 %v771_v29, %v770_v28  ;;  %v861_v33 = vsel %vm847_vm4, %v6369_v31, 0  ;;  %v775_v57 = vld [vmem:[%s8460_s14 + $0x18] sm:$0xff]  ;;  %s9897_s20 = sld [smem:[#allocation29_spill]]  ;;  %s9898_s14 = sld [smem:[#allocation38_spill]]  ;;  %vm2910_vm7 = vcmask 1041408  }
 0x101   :  { %7132 = vmatmul.mubr.msk.bf16.vlgmr.msra.gmra.mrb[0].mxu0 %vm363_vm2, %v349_v7  ;;  %7137 = vmatprep.subr.bf16.mxu1 %v9829_v3  ;;  %v768_v15 = vld [vmem:[%s8370_s17] sm:$0xff]  ;;  %v6366_v17 = vcombine.high %v772_v14, %v772_v14  ;;  %v6365_v18 = vcombine.low %v772_v14, %v772_v14  ;;  %v855_v26 = vsel %vm847_vm4, %v6367_v22, 0  ;;  %s9894_s17 = sld [smem:[#allocation37_spill]]  ;;  %v6372_v0 = vcombine.high %v775_v57, %v775_v57  ;;  %s9899_s4 = sld [smem:[#allocation35_spill]] }
 0x102   :  { %7144 = vmatpush3.bf16.msra.mxu0 %v503_v9  ;;  %7145 = vmatprep.mubr.msk.bf16.mxu0 %vm8338_vm0, %v9829_v3  ;;  %v8723_v25 = vpack.c.bf16 %v769_v16, %v768_v15  ;;  %v6371_v1 = vcombine.low %v775_v57, %v775_v57  ;;  %s9900_s15 = sld [smem:[#allocation41_spill]]  ;;  %s9901_s18 = sld [smem:[#allocation42_spill]]  ;;  %v9826_v22 = vlaneseq  ;;  %vm2906_vm8 = vcmask 31744  }
 0x103   :  { %6373 = vmatprep.subr.msk.bf16.mxu0 %vm847_vm4, %v6366_v17  ;;  %v849_v24 = vsel %vm847_vm4, %v6365_v18, 0  ;;  %v1086_v32 = vld [vmem:[%s9892_s5] sm:$0xff]  ;;  %v1088_v36 = vld [vmem:[%s9892_s5 + $0x10] sm:$0xff]  ;;  %v1087_v5 = vld [vmem:[%s9892_s5 + $0x8] sm:$0xff]  ;;  %s9903_s27 = sld [smem:[#allocation32_spill]]  ;;  %s8340_s30 = smov 32  }
 0x104   :  { %7138 = vmatpush3.bf16.msra.mxu1 %v7678_v13  ;;  %v6386_v34 = vcombine.high %v1086_v32, %v1086_v32  ;;  %v6385_v35 = vcombine.low %v1086_v32, %v1086_v32  ;;  %v6390_v38 = vcombine.high %v1088_v36, %v1088_v36  ;;  %v1084_v39 = vld [vmem:[%s9893_s9] sm:$0xff]  ;;  %v1085_v40 = vld [vmem:[%s9893_s9 + $0x8] sm:$0xff]  ;;  %v6389_v41 = vcombine.low %v1088_v36, %v1088_v36  ;;  %v1089_v10 = vld [vmem:[%s9892_s5 + $0x18] sm:$0xff]  ;;  %s9906_s22 = sld [smem:[#allocation45_spill]]  ;;  %s9918_s26 = sld [smem:[#allocation36_spill]] }
 0x105   :  { %7149 = vmatprep.subr.bf16.mxu1 %v9829_v3  ;;  %v1090_v42 = vpack.c.bf16 %v1085_v40, %v1084_v39  ;;  %v6358_v53 = vld [vmem:[%s9895_s6] ss:$0 sm:$0xff]  ;;  %v7680_v60 = vld [vmem:[%s9896_s12 + $0x8] sm:$0xff]   ;;  %v867_v4 = vsel %vm847_vm4, %v6371_v1, 0  ;;  %v6388_v6 = vcombine.high %v1087_v5, %v1087_v5  ;;  %v6387_v7 = vcombine.low %v1087_v5, %v1087_v5  ;;  %s9921_s13 = sld [smem:[#allocation31_spill]]  ;;  %s9922_s1 = sld [smem:[#allocation33_spill]] }
 0x106   :  { %v1157_v37 = vsel %vm847_vm4, %v6385_v35, 0  ;;  %v1169_v43 = vsel %vm847_vm4, %v6389_v41, 0  ;;  %v7679_v54 = vld [vmem:[%s9896_s12] sm:$0xff]   ;;  %v6391_v12 = vcombine.low %v1089_v10, %v1089_v10  ;;  %s9923_s0 = sld [smem:[#allocation57_spill]]  ;;  %s9924_s8 = sld [smem:[#allocation43_spill]]  ;;  %vm3070_vm9 = vcmask 523264  }
 0x107   :  { %v6351_v44 = vld [vmem:[%s9894_s17] ss:$0 sm:$0xff]  ;;  %v1163_v8 = vsel %vm847_vm4, %v6387_v7, 0  ;;  %v8807_v32 = vld [vmem:[%s9899_s4 + $0x8] sm:$0xff]  ;;  %s9925_s23 = sld [smem:[#allocation34_spill]]  ;;  %s9927_s2 = sld [smem:[#allocation46_spill]] }
 0x108   :  { %v7695_v9 = vld [vmem:[%s9897_s20] sm:$0xff]   ;;  %v1175_v13 = vsel %vm847_vm4, %v6391_v12, 0  ;;  %s9926_s28 = sld [smem:[#allocation58_spill]]  ;;  %s9928_s24 = sld [smem:[#allocation56_spill]]  ;;  %vm5363_vm10 = vcmask 3072   ;;  %vm5404_vm11 = vcmask 7172  }
 0x109   :  { %7146 = vmatmul.mubr.msk.bf16.vlgmr.msra.gmra.mrb[4].mxu0 %vm497_vm3, %v484_v11  ;;  %v6392_v11 = vcombine.high %v1089_v10, %v1089_v10  ;;  %v6354_v14 = vld [vmem:[%s9898_s14] ss:$0 sm:$0xff]  ;;  %s9929_s25 = sld [smem:[#allocation60_spill]]  ;;  %s9930_s10 = sld [smem:[#allocation61_spill]]  ;;  %vm5389_vm12 = vcmask 257024   ;;  %vm5443_vm13 = vcmask 261124  }
 0x10a   :  { %904 = vmatprep.mubr.bf16.mxu0 %v9827_v19  ;;  %873 = vmatpush1.bf16.msra.mxu0 %v849_v24  ;;  %v624_v24 = vld [vmem:[%s9899_s4] sm:$0xff]  ;;  %s9931_s19 = sld [smem:[#allocation59_spill]]  ;;  %s9932_s3 = sld [smem:[#allocation52_spill]]  ;;  %vm5214_vm14 = vcmask 7168   ;;  %vm5293_vm15 = vcmask 1040384   ;;  %vm6045_vm1 = vcmask 1044480  }
 0x10b   :  { %6376 = vmatprep.subr.msk.bf16.mxu0 %vm847_vm4, %v6368_v21  ;;  %v628_v28 = vld [vmem:[%s9899_s4 + $0x20] sm:$0xff]  ;;  %s9933_s11 = sld [smem:[#allocation54_spill]]  ;;  %s9934_s16 = sld [smem:[#allocation55_spill]] }
 0x10c   :  { %v6361_v29 = vld [vmem:[%s9900_s15] ss:$0 sm:$0xff]  ;;  %s9935_s29 = sld [smem:[#allocation47_spill]]  ;;  %s9936_s5 = sld [smem:[#allocation49_spill]] }
 0x10d   :  { %v8817_v35 = vld [vmem:[%s9901_s18] sm:$0xff]  ;;  %s9937_s9 = sld [smem:[#allocation50_spill]]  ;;  %s9938_s17 = sld [smem:[#allocation53_spill]] }
 0x10e   :  { %s9939_s6 = sld [smem:[#allocation48_spill]]  ;;  %s9940_s12 = sld [smem:[#allocation51_spill]] }
 0x10f   :  { %s9956_s14 = sld [smem:[#allocation63_spill]]  ;;  %s9958_s15 = sld [smem:[#allocation30_spill]] }
 0x110   :  { %s9959_s18 = sld [smem:[#allocation65_spill]] }
 0x111   :  { %6374 = vmatmul.mubr.msk.bf16.vlgmr.msra.gmra.mrb[8].mxu0 %vm840_vm5, %v8723_v25 }
 0x112   :  { %914 = vmatprep.mubr.bf16.mxu0 %v9827_v19  ;;  %926 = vmatpush1.bf16.msra.mxu0 %v855_v26 }
 0x113   :  { %6379 = vmatprep.subr.msk.bf16.mxu0 %vm847_vm4, %v6370_v27 }
 0x119   :  { %6375 = vmatmul.mubr.msk.bf16.gmra.mrb[12].mxu0 %vm840_vm5, %v8733_v30 }
 0x11a   :  { %957 = vmatprep.mubr.bf16.mxu0 %v9827_v19 }
 0x121   :  { %6377 = vmatmul.mubr.msk.bf16.vlgmr.msra.gmra.mrb[16].mxu0 %vm840_vm5, %v8723_v25 }
 0x122   :  { %967 = vmatprep.mubr.bf16.mxu0 %v9827_v19  ;;  %979 = vmatpush1.bf16.msra.mxu0 %v861_v33  ;;  %v8810_v33 = vld [vmem:[%s9899_s4 + $0x28] sm:$0xff] }
 0x123   :  { %6393 = vmatprep.subr.msk.bf16.mxu0 %vm847_vm4, %v6386_v34 }
 0x129   :  { %6378 = vmatmul.mubr.msk.bf16.gmra.mrb[20].mxu0 %vm840_vm5, %v8733_v30 }
 0x12a   :  { %1010 = vmatprep.mubr.bf16.mxu0 %v9827_v19 }
 0x131   :  { %6380 = vmatmul.mubr.msk.bf16.vlgmr.msra.gmra.mrb[24].mxu0 %vm840_vm5, %v8723_v25 }
 0x132   :  { %1020 = vmatprep.mubr.bf16.mxu0 %v9827_v19  ;;  %1181 = vmatpush1.bf16.msra.mxu0 %v1157_v37  ;;  %v8819_v37 = vcombine.high %v624_v24, %v628_v28 }
 0x133   :  { %6397 = vmatprep.subr.msk.bf16.mxu0 %vm847_vm4, %v6390_v38 }
 0x139   :  { %6381 = vmatmul.mubr.msk.bf16.gmra.mrb[28].mxu0 %vm840_vm5, %v8733_v30 }
 0x13a   :  { %1212 = vmatprep.mubr.bf16.mxu0 %v9827_v19 }
 0x141   :  { %6394 = vmatmul.mubr.msk.bf16.vlgmr.msra.gmra.mrb[32].mxu0 %vm840_vm5, %v1090_v42 }
 0x142   :  { %1267 = vmatpush1.bf16.msra.mxu0 %v1169_v43  ;;  %1298 = vmatprep.mubr.bf16.mxu0 %v9827_v19 }
 0x149   :  { %6398 = vmatmul.mubr.msk.bf16.vlgmr.msra.gmra.mrb[36].mxu0 %vm840_vm5, %v1090_v42 }
 0x14a   :  { %7159 = vmatprep.mubr.msk.bf16.mxu0 %vm363_vm2, %v7695_v9 }
 0x1d4   :  { %v401_v45 = vpop.f32.mrb[0].mxu0 }
 0x1d5   :  { %v402_v46 = vadd.f32 %v6351_v44, %v401_v45  ;;  %v7133_v47 = vpop.f32.mrb[1].mxu0  ;;  %v7696_v45 = vld [vmem:[%s9897_s20 + $0x8] sm:$0xff]  }
 0x1d6   :  { %v404_v48 = vpop.f32.mrb[2].mxu0 }
 0x1d7   :  { %v405_v49 = vadd.f32 %v6351_v44, %v404_v48  ;;  %v7134_v50 = vpop.f32.mrb[3].mxu0  ;;  %v408_v51 = vmax.f32 %v402_v46, 0.0 }
 0x1d8   :  { %v8833_v50 = vcombine.high %v8807_v32, %v8810_v33 }
 0x1d9   :  { %v409_v52 = vmax.f32 %v405_v49, 0.0  ;;  %v8829_v49 = vcombine.low %v624_v24, %v628_v28 }
 0x1db   :  { %v414_v55 = vpack.c.bf16 %v409_v52, %v408_v51 }
 0x1dc   :  { %v539_v56 = vpop.f32.mrb[4].mxu0 }
 0x1dd   :  { %7140 = vmatmul.mubr.msk.bf16.vlgmr.msra.gmra.mrb[0].mxu1 %vm434_vm6, %v414_v55  ;;  %v540_v58 = vadd.f32 %v6358_v53, %v539_v56  ;;  %v7147_v59 = vpop.f32.mrb[5].mxu0 }
 0x1de   :  { %7150 = vmatpush3.bf16.msra.mxu1 %v7679_v54  ;;  %7153 = vmatprep.mubr.msk.bf16.mxu1 %vm8338_vm0, %v9829_v3  ;;  %v542_v61 = vpop.f32.mrb[6].mxu0 }
 0x1df   :  { %v545_v62 = vmax.f32 %v540_v58, 0.0  ;;  %7151 = vmatprep.subr.bf16.mxu1 %v9829_v3  ;;  %v7148_v63 = vpop.f32.mrb[7].mxu0 }
 0x1e1   :  { %v550_v2 = vpack.c.bf16 %v545_v62, %v545_v62 }
 0x1e2   :  { %7152 = vmatpush3.bf16.msra.mxu1 %v7680_v60 }
 0x1e3   :  { %6382 = vmatprep.subr.msk.bf16.mxu1 %vm847_vm4, %v6372_v0 }
 0x1e4   :  { %v906_v23 = vpop.f32.mrb[8].mxu0 }
 0x1e5   :  { %7154 = vmatmul.mubr.msk.bf16.vlgmr.msra.gmra.mrb[4].mxu1 %vm434_vm6, %v550_v2  ;;  %v908_v27 = vpop.f32.mrb[9].mxu0 }
 0x1e6   :  { %1032 = vmatpush1.bf16.msra.mxu1 %v867_v4  ;;  %1063 = vmatprep.mubr.bf16.mxu1 %v9827_v19  ;;  %v910_v31 = vpop.f32.mrb[10].mxu0 }
 0x1e7   :  { %6395 = vmatprep.subr.msk.bf16.mxu1 %vm847_vm4, %v6388_v6  ;;  %v912_v36 = vpop.f32.mrb[11].mxu0 }
 0x1ec   :  { %v916_v41 = vpop.f32.mrb[12].mxu0 }
 0x1ed   :  { %6383 = vmatmul.mubr.msk.bf16.vlgmr.msra.gmra.mrb[8].mxu1 %vm840_vm5, %v8723_v25  ;;  %v918_v48 = vpop.f32.mrb[13].mxu0 }
 0x1ee   :  { %1073 = vmatprep.mubr.bf16.mxu1 %v9827_v19  ;;  %1224 = vmatpush1.bf16.msra.mxu1 %v1163_v8  ;;  %v920_v54 = vpop.f32.mrb[14].mxu0 }
 0x1ef   :  { %6399 = vmatprep.subr.msk.bf16.mxu1 %vm847_vm4, %v6392_v11  ;;  %v922_v59 = vpop.f32.mrb[15].mxu0 }
 0x1f4   :  { %v959_v4 = vpop.f32.mrb[16].mxu0 }
 0x1f5   :  { %6384 = vmatmul.mubr.msk.bf16.gmra.mrb[12].mxu1 %vm840_vm5, %v8733_v30  ;;  %v8804_v30 = vshrl.u32 %v9826_v22, 7  ;;  %v961_v8 = vpop.f32.mrb[17].mxu0  ;;  %v7735_v22 = vld [vmem:[%s9918_s26 + $0x180] sm:$0xff]  }
 0x1f6   :  { %1255 = vmatprep.mubr.bf16.mxu1 %v9827_v19 }
 0x1f7   :  { %9902 = vst [vmem:[#allocation72_spill] sm:$0xff] %v8804_v30  ;;  %v782_v39 = vsub.s32 0, %v8804_v30  ;;  %v786_v40 = vsub.s32 1, %v8804_v30  ;;  %v794_v43 = vsub.s32 3, %v8804_v30  ;;  %v798_v55 = vsub.s32 4, %v8804_v30 }
 0x1f8   :  { %v802_v56 = vsub.s32 5, %v8804_v30  ;;  %v806_v62 = vsub.s32 6, %v8804_v30  ;;  %v810_v9 = vsub.s32 7, %v8804_v30 }
 0x1f9   :  { %v783_v52 = vrot.slane %v8817_v35, %v782_v39  ;;  %v787_v53 = vrot.slane %v8817_v35, %v786_v40  ;;  %v795_v61 = vrot.slane %v8817_v35, %v794_v43 }
 0x1fb   :  { %v907_v63 = vadd.f32 %v906_v23, %v783_v52  ;;  %v909_v0 = vadd.f32 %v908_v27, %v787_v53  ;;  %v911_v1 = vadd.f32 %v910_v31, %v783_v52  ;;  %v913_v2 = vadd.f32 %v912_v36, %v787_v53 }
 0x1fc   :  { %v917_v6 = vadd.f32 %v916_v41, %v783_v52  ;;  %v919_v7 = vadd.f32 %v918_v48, %v787_v53  ;;  %v921_v12 = vadd.f32 %v920_v54, %v783_v52  ;;  %v8877_v31 = vcombine.low %v8807_v32, %v8810_v33 }
 0x1fd   :  { %6396 = vmatmul.mubr.msk.bf16.vlgmr.msra.gmra.mrb[16].mxu1 %vm840_vm5, %v1090_v42  ;;  %v8862_v10 = vpack.c.bf16 %v911_v1, %v907_v63  ;;  %v8864_v11 = vpack.c.bf16 %v913_v2, %v909_v0  ;;  %v803_v33 = vrot.slane %v8817_v35, %v802_v56 }
 0x1fe   :  { %1341 = vmatprep.mubr.bf16.mxu1 %v9827_v19  ;;  %1310 = vmatpush1.bf16.msra.mxu1 %v1175_v13  ;;  %v923_v13 = vadd.f32 %v922_v59, %v787_v53  ;;  %v8871_v23 = vpack.c.bf16 %v921_v12, %v917_v6 }
 0x1ff   :  { %7163 = vmatprep.subr.bf16.mxu1 %v9829_v3  ;;  %9904 = vst [vmem:[#allocation73_spill] sm:$0xff] %v8862_v10 }
 0x200   :  { %v8873_v24 = vpack.c.bf16 %v923_v13, %v919_v7 }
 0x205   :  { %6400 = vmatmul.mubr.msk.bf16.vlgmr.msra.gmra.mrb[20].mxu1 %vm840_vm5, %v1090_v42  ;;  %v790_v42 = vsub.s32 2, %v8804_v30  ;;  %v7736_v30 = vld [vmem:[%s9918_s26 + $0x148] sm:$0xff]  }
 0x206   :  { %7165 = vmatprep.mubr.msk.bf16.mxu1 %vm8338_vm0, %v9829_v3 }
 0x207   :  { %v791_v60 = vrot.slane %v8817_v35, %v790_v42 }
 0x2b0   :  { %v472_v15 = vpop.f32.mrb[0].mxu1 }
 0x2b1   :  { %v473_v16 = vadd.f32 %v6354_v14, %v472_v15  ;;  %v7141_v17 = vpop.f32.mrb[1].mxu1 }
 0x2b2   :  { %v475_v18 = vpop.f32.mrb[2].mxu1  ;;  %v960_v17 = vadd.f32 %v959_v4, %v791_v60 }
 0x2b3   :  { %v476_v20 = vadd.f32 %v6354_v14, %v475_v18  ;;  %v7142_v21 = vpop.f32.mrb[3].mxu1  ;;  %v8797_v25 = vmax.f32 %v473_v16, 0.0  ;;  %v963_v14 = vpop.f32.mrb[18].mxu0  ;;  %v7699_v16 = vld [vmem:[%s9903_s27] sm:$0xff]   ;;  %v962_v18 = vadd.f32 %v961_v8, %v795_v61 }
 0x2b4   :  { %v965_v21 = vpop.f32.mrb[19].mxu0 }
 0x2b5   :  { %v8799_v26 = vmax.f32 %v476_v20, 0.0  ;;  %v964_v20 = vadd.f32 %v963_v14, %v791_v60  ;;  %v966_v27 = vadd.f32 %v965_v21, %v795_v61  ;;  %v969_v28 = vpop.f32.mrb[20].mxu0  ;;  %v8907_v14 = vld [vmem:[%s9906_s22] sm:$0xff]  ;;  %s9962_s22 = sld [smem:[#allocation67_spill]] }
 0x2b6   :  { %v971_v41 = vpop.f32.mrb[21].mxu0 }
 0x2b7   :  { %v8814_v34 = vpack.c.bf16 %v8799_v26, %v8797_v25  ;;  %v7663_v46 = vpack.i.bf16 %v8799_v26, %v8797_v25  ;;  %v8880_v36 = vpack.c.bf16 %v964_v20, %v960_v17  ;;  %v8888_v48 = vpack.c.bf16 %v966_v27, %v962_v18  ;;  %v973_v32 = vpop.f32.mrb[22].mxu0 }
 0x2b8   :  { %v607_v38 = vpop.f32.mrb[4].mxu1  ;;  %v974_v53 = vadd.f32 %v973_v32, %v791_v60  ;;  %v975_v54 = vpop.f32.mrb[23].mxu0 }
 0x2b9   :  { %v608_v44 = vadd.f32 %v6361_v29, %v607_v38  ;;  %7157 = vmatprep.subr.bf16.mxu0 %v8814_v34  ;;  %v7155_v47 = vpop.f32.mrb[5].mxu1  ;;  %9905 = vst [vmem:[#allocation74_spill] sm:$0xff] %v8880_v36  ;;  %v970_v38 = vadd.f32 %v969_v28, %v791_v60  ;;  %v976_v0 = vadd.f32 %v975_v54, %v795_v61  ;;  %v1012_v1 = vpop.f32.mrb[24].mxu0 }
 0x2ba   :  { %7158 = vmatpush3.bf16.msra.mxu0 %v8814_v34  ;;  %v610_v51 = vpop.f32.mrb[6].mxu1  ;;  %v1014_v7 = vpop.f32.mrb[25].mxu0 }
 0x2bb   :  { %v8844_v57 = vmax.f32 %v608_v44, 0.0  ;;  %v7156_v58 = vpop.f32.mrb[7].mxu1  ;;  %1592 = vmatprep.subr.bf16.mxu0 %v8819_v37  ;;  %v799_v44 = vrot.slane %v8817_v35, %v798_v55  ;;  %v972_v51 = vadd.f32 %v971_v41, %v795_v61  ;;  %v1015_v12 = vadd.f32 %v1014_v7, %v803_v33  ;;  %v1016_v13 = vpop.f32.mrb[26].mxu0 }
 0x2bd   :  { %v8856_v5 = vpack.c.bf16 %v8844_v57, %v8844_v57  ;;  %7160 = vmatmul.mubr.msk.bf16.vlgmr.msra.gmra.mrb[40].mxu0 %vm363_vm2, %v7696_v45  ;;  %3026 = vrot.lane.b32.xlu0 %v8844_v57, %s8340_s30  ;;  %v807_v45 = vrot.slane %v8817_v35, %v806_v62  ;;  %v1013_v6 = vadd.f32 %v1012_v1, %v799_v44 }
 0x2be   :  { %1593 = vmatpush1.bf16.msra.mxu0 %v8829_v49  ;;  %1624 = vmatprep.mubr.bf16.mxu0 %v9827_v19  ;;  %v8904_v60 = vpack.c.bf16 %v976_v0, %v972_v51 }
 0x2bf   :  { %v1457_v15 = vsel %vm847_vm4, %v8856_v5, 0 }
 0x2c0   :  { %7164 = vmatpush3.bf16.msra.mxu1 %v1457_v15  ;;  %v1065_v29 = vpop.f32.mrb[8].mxu1  ;;  %v1017_v15 = vadd.f32 %v1016_v13, %v799_v44 }
 0x2c1   :  { %7664 = vrot.lane.b32.xlu0 %v7663_v46, %s8340_s30  ;;  %v1067_v47 = vpop.f32.mrb[9].mxu1  ;;  %v811_v46 = vrot.slane %v8817_v35, %v810_v9  ;;  %1655 = vmatprep.subr.bf16.mxu1 %v8833_v50  ;;  %v1066_v58 = vadd.f32 %v1065_v29, %v807_v45  ;;  %v8900_v35 = vpack.c.bf16 %v974_v53, %v970_v38 }
 0x2c2   :  { %v1069_v52 = vpop.f32.mrb[10].mxu1  ;;  %v8911_v21 = vpack.c.bf16 %v1017_v15, %v1013_v6  ;;  %v1096_v29 = vrot.slane %v8907_v14, %v782_v39 }
 0x2c3   :  { %7166 = vmatmul.mubr.msk.bf16.vlgmr.msra.gmra.mrb[24].mxu1 %vm840_vm5, %v7699_v16  ;;  %v1070_v59 = vadd.f32 %v1069_v52, %v807_v45  ;;  %v1071_v63 = vpop.f32.mrb[11].mxu1  ;;  %v1068_v2 = vadd.f32 %v1067_v47, %v811_v46  ;;  %v1018_v16 = vpop.f32.mrb[27].mxu0  ;;  %v1100_v52 = vrot.slane %v8907_v14, %v786_v40 }
 0x2c4   :  { %v1072_v4 = vadd.f32 %v1071_v63, %v811_v46  ;;  %1656 = vmatpush1.bf16.msra.mxu1 %v8877_v31  ;;  %1687 = vmatprep.mubr.bf16.mxu1 %v9827_v19  ;;  %v1019_v17 = vadd.f32 %v1018_v16, %v803_v33  ;;  %v1022_v18 = vpop.f32.mrb[28].mxu0  ;;  %9909 = vst [vmem:[#allocation77_spill] sm:$0xff] %v8911_v21 }
 0x2c5   :  { %v8902_v8 = vpack.c.bf16 %v1070_v59, %v1066_v58  ;;  %v1023_v27 = vadd.f32 %v1022_v18, %v799_v44  ;;  %v1024_v28 = vpop.f32.mrb[29].mxu0 }
 0x2c6   :  { %v8909_v61 = vpack.c.bf16 %v1072_v4, %v1068_v2  ;;  %v8916_v47 = vpack.c.bf16 %v1019_v17, %v1015_v12  ;;  %v1025_v51 = vadd.f32 %v1024_v28, %v803_v33  ;;  %v1026_v32 = vpop.f32.mrb[30].mxu0  ;;  %v1112_v12 = vrot.slane %v8907_v14, %v798_v55 }
 0x2c7   :  { %9907 = vst [vmem:[#allocation75_spill] sm:$0xff] %v8902_v8  ;;  %v1027_v58 = vadd.f32 %v1026_v32, %v799_v44  ;;  %v1028_v59 = vpop.f32.mrb[31].mxu0 }
 0x2c8   :  { %9908 = vst [vmem:[#allocation76_spill] sm:$0xff] %v8909_v61  ;;  %v1075_v20 = vpop.f32.mrb[12].mxu1  ;;  %v1029_v1 = vadd.f32 %v1028_v59, %v803_v33  ;;  %v1214_v2 = vpop.f32.mrb[32].mxu0 }
 0x2c9   :  { %v1076_v38 = vadd.f32 %v1075_v20, %v807_v45  ;;  %v1077_v41 = vpop.f32.mrb[13].mxu1  ;;  %v8921_v39 = vpack.c.bf16 %v1027_v58, %v1023_v27  ;;  %v1215_v6 = vadd.f32 %v1214_v2, %v1096_v29  ;;  %v1216_v7 = vpop.f32.mrb[33].mxu0  ;;  %v636_v58 = vld [vmem:[%s9899_s4 + $0x60] sm:$0xff] }
 0x2ca   :  { %v1078_v53 = vadd.f32 %v1077_v41, %v811_v46  ;;  %v1079_v54 = vpop.f32.mrb[14].mxu1  ;;  %v8928_v40 = vpack.c.bf16 %v1029_v1, %v1025_v51  ;;  %v1217_v15 = vadd.f32 %v1216_v7, %v1100_v52  ;;  %v1218_v44 = vpop.f32.mrb[34].mxu0  ;;  %v1108_v7 = vrot.slane %v8907_v14, %v794_v43 }
 0x2cb   :  { %v1080_v63 = vadd.f32 %v1079_v54, %v807_v45  ;;  %v1081_v0 = vpop.f32.mrb[15].mxu1  ;;  %9910 = vst [vmem:[#allocation78_spill] sm:$0xff] %v8921_v39  ;;  %v1116_v45 = vrot.slane %v8907_v14, %v802_v56  ;;  %v1220_v16 = vpop.f32.mrb[35].mxu0  ;;  %v632_v54 = vld [vmem:[%s9899_s4 + $0x40] sm:$0xff]  ;;  %v1124_v43 = vrot.slane %v8907_v14, %v810_v9  ;;  %v631_v9 = vld [vmem:[%s9899_s4 + $0x38] sm:$0xff] }
 0x2cc   :  { %v1082_v4 = vadd.f32 %v1081_v0, %v811_v46  ;;  %9912 = vst [vmem:[#allocation80_spill] sm:$0xff] %v8928_v40  ;;  %v1219_v46 = vadd.f32 %v1218_v44, %v1096_v29  ;;  %v1221_v17 = vadd.f32 %v1220_v16, %v1100_v52  ;;  %v1300_v18 = vpop.f32.mrb[36].mxu0  ;;  %v633_v52 = vld [vmem:[%s9899_s4 + $0x48] sm:$0xff]  ;;  %v8946_v59 = vcombine.high %v632_v54, %v636_v58 }
 0x2cd   :  { %v8926_v13 = vpack.c.bf16 %v1080_v63, %v1076_v38  ;;  %v1301_v20 = vadd.f32 %v1300_v18, %v1112_v12  ;;  %v1302_v27 = vpop.f32.mrb[37].mxu0  ;;  %v637_v63 = vld [vmem:[%s9899_s4 + $0x68] sm:$0xff]  ;;  %v8949_v0 = vcombine.low %v632_v54, %v636_v58 }
 0x2ce   :  { %v8933_v33 = vpack.c.bf16 %v1082_v4, %v1078_v53  ;;  %v8935_v55 = vpack.c.bf16 %v1219_v46, %v1215_v6  ;;  %v8937_v28 = vpack.c.bf16 %v1221_v17, %v1217_v15  ;;  %v1303_v38 = vadd.f32 %v1302_v27, %v1116_v45  ;;  %v1304_v41 = vpop.f32.mrb[38].mxu0  ;;  %1594 = vmatprep.subr.bf16.mxu0 %v8946_v59 }
 0x2cf   :  { %9911 = vst [vmem:[#allocation79_spill] sm:$0xff] %v8926_v13  ;;  %v1305_v51 = vadd.f32 %v1304_v41, %v1112_v12  ;;  %v1306_v56 = vpop.f32.mrb[39].mxu0  ;;  %v8951_v1 = vcombine.low %v633_v52, %v637_v63  ;;  %v8953_v2 = vcombine.high %v633_v52, %v637_v63  ;;  %1595 = vmatpush1.bf16.msra.mxu0 %v8949_v0  ;;  %v626_v63 = vld [vmem:[%s9899_s4 + $0x10] sm:$0xff] }
 0x2d0   :  { %9913 = vst [vmem:[#allocation81_spill] sm:$0xff] %v8933_v33  ;;  %v1307_v32 = vadd.f32 %v1306_v56, %v1116_v45  ;;  %v1104_v4 = vrot.slane %v8907_v14, %v790_v42  ;;  %v1257_v6 = vpop.f32.mrb[16].mxu1  ;;  %v1120_v42 = vrot.slane %v8907_v14, %v806_v62 }
 0x2d1   :  { %v8939_v53 = vpack.c.bf16 %v1305_v51, %v1301_v20  ;;  %1657 = vmatprep.subr.bf16.mxu1 %v8953_v2  ;;  %v1259_v12 = vpop.f32.mrb[17].mxu1 }
 0x2d2   :  { %v8941_v29 = vpack.c.bf16 %v1307_v32, %v1303_v38  ;;  %1658 = vmatpush1.bf16.msra.mxu1 %v8951_v1  ;;  %v1258_v15 = vadd.f32 %v1257_v6, %v1104_v4  ;;  %v1260_v44 = vadd.f32 %v1259_v12, %v1108_v7  ;;  %v1261_v45 = vpop.f32.mrb[18].mxu1  ;;  %v627_v6 = vld [vmem:[%s9899_s4 + $0x18] sm:$0xff] }
 0x2d3   :  { %9914 = vst [vmem:[#allocation82_spill] sm:$0xff] %v8939_v53  ;;  %v1262_v46 = vadd.f32 %v1261_v45, %v1104_v4  ;;  %v1263_v16 = vpop.f32.mrb[19].mxu1  ;;  %v630_v4 = vld [vmem:[%s9899_s4 + $0x30] sm:$0xff]  ;;  %v8987_v12 = vcombine.low %v627_v6, %v631_v9 }
 0x2d4   :  { %9915 = vst [vmem:[#allocation83_spill] sm:$0xff] %v8941_v29  ;;  %v1264_v17 = vadd.f32 %v1263_v16, %v1108_v7  ;;  %v8982_v7 = vcombine.high %v626_v63, %v630_v4  ;;  %v8985_v14 = vcombine.low %v626_v63, %v630_v4 }
 0x2d5   :  { %v8965_v18 = vpack.c.bf16 %v1262_v46, %v1258_v15  ;;  %v8989_v15 = vcombine.high %v627_v6, %v631_v9  ;;  %v634_v46 = vld [vmem:[%s9899_s4 + $0x50] sm:$0xff] }
 0x2d6   :  { %v8970_v27 = vpack.c.bf16 %v1264_v17, %v1260_v44  ;;  %1718 = vmatprep.subr.bf16.mxu0 %v8982_v7  ;;  %v638_v17 = vld [vmem:[%s9899_s4 + $0x70] sm:$0xff] }
 0x2d7   :  { %1781 = vmatprep.subr.bf16.mxu1 %v8989_v15  ;;  %v9007_v63 = vcombine.low %v634_v46, %v638_v17 }
 0x2d8   :  { %v1343_v20 = vpop.f32.mrb[20].mxu1 }
 0x2d9   :  { %v1345_v38 = vpop.f32.mrb[21].mxu1  ;;  %v1344_v41 = vadd.f32 %v1343_v20, %v1120_v42  ;;  %v639_v20 = vld [vmem:[%s9899_s4 + $0x78] sm:$0xff] }
 0x2da   :  { %v1346_v51 = vadd.f32 %v1345_v38, %v1124_v43  ;;  %v1347_v56 = vpop.f32.mrb[22].mxu1 }
 0x2db   :  { %v1348_v32 = vadd.f32 %v1347_v56, %v1120_v42  ;;  %v1349_v54 = vpop.f32.mrb[23].mxu1  ;;  %v635_v42 = vld [vmem:[%s9899_s4 + $0x58] sm:$0xff]  ;;  %s9957_s4 = sld [smem:[#allocation62_spill]] }
 0x2dc   :  { %v1350_v58 = vadd.f32 %v1349_v54, %v1124_v43  ;;  %v8999_v56 = vcombine.high %v635_v42, %v639_v20  ;;  %v9009_v4 = vcombine.low %v635_v42, %v639_v20  ;;  %v7705_v42 = vld [vmem:[%s9918_s26 + $0xc8] sm:$0xff]  }
 0x2dd   :  { %v8975_v52 = vpack.c.bf16 %v1348_v32, %v1344_v41  ;;  %v7706_v20 = vld [vmem:[%s9918_s26 + $0x8] sm:$0xff]  }
 0x2de   :  { %v8977_v62 = vpack.c.bf16 %v1350_v58, %v1346_v51  ;;  %v8997_v51 = vcombine.high %v634_v46, %v638_v17  ;;  %9919 = vst [vmem:[#allocation86_spill] sm:$0xff] %v9009_v4  ;;  %v7702_v46 = vld [vmem:[%s9918_s26] sm:$0xff]   ;;  %v7704_v17 = vld [vmem:[%s9918_s26 + $0x48] sm:$0xff]  }
 0x2df   :  { %9916 = vst [vmem:[#allocation84_spill] sm:$0xff] %v8975_v52 }
 0x2e0   :  { %9917 = vst [vmem:[#allocation85_spill] sm:$0xff] %v8977_v62 }
 0x390   :  { %v7161_v44 = vpop.f32.mrb[40].mxu0 }
 0x391   :  { %v1432_v45 = vpop.f32.mrb[41].mxu0 }
 0x392   :  { %v7162_v16 = vpop.f32.mrb[42].mxu0 }
 0x393   :  { %v1501_v43 = vpack.c.bf16 %v7162_v16, %v7161_v44  ;;  %v1435_v38 = vpop.f32.mrb[43].mxu0  ;;  %v7700_v44 = vld [vmem:[%s9918_s26 + $0x40] sm:$0xff]  }
 0x394   :  { %v1500_v41 = vpack.c.bf16 %v1435_v38, %v1432_v45  ;;  %v7701_v45 = vld [vmem:[%s9918_s26 + $0xc0] sm:$0xff]   ;;  %v7707_v38 = vld [vmem:[%s9918_s26 + $0x88] sm:$0xff]  }
 0x395   :  { %v7703_v16 = vld [vmem:[%s9918_s26 + $0x80] sm:$0xff]  }
 0x396   :  { %6423 = vmatmul.mubr.msk.bf16.vlgmr.msra.gmra.mrb[44].mxu0 %vm434_vm6, %v1500_v41  ;;  %6426 = vmatmul.mubr.msk.bf16.vlgmr.msra.gmra.mrb[28].mxu1 %vm434_vm6, %v1500_v41  ;;  %v1493_v32 = vpop.f32.mrb[24].mxu1 }
 0x397   :  { %1634 = vmatprep.mubr.bf16.mxu0 %v9827_v19  ;;  %1697 = vmatprep.mubr.bf16.mxu1 %v9827_v19  ;;  %v7167_v54 = vpop.f32.mrb[25].mxu1 }
 0x398   :  { %v1496_v58 = vpop.f32.mrb[26].mxu1  ;;  %1719 = vmatpush1.bf16.msra.mxu0 %v8985_v14  ;;  %1782 = vmatpush1.bf16.msra.mxu1 %v8987_v12  ;;  %v7709_v54 = vld [vmem:[%s9918_s26 + $0xd0] sm:$0xff]  }
 0x399   :  { %v9011_v6 = vpack.c.bf16 %v1496_v58, %v1493_v32  ;;  %v7168_v9 = vpop.f32.mrb[27].mxu1  ;;  %1720 = vmatprep.subr.bf16.mxu0 %v8997_v51  ;;  %1783 = vmatprep.subr.bf16.mxu1 %v8999_v56  ;;  %v7708_v32 = vld [vmem:[%s9918_s26 + $0x50] sm:$0xff]  }
 0x39a   :  { %v7710_v58 = vld [vmem:[%s9918_s26 + $0x10] sm:$0xff]   ;;  %v7712_v9 = vld [vmem:[%s9918_s26 + $0x58] sm:$0xff]  }
 0x39c   :  { %1721 = vmatpush1.bf16.msra.mxu0 %v9007_v63  ;;  %1784 = vmatpush1.bf16.msra.mxu1 %v9009_v4  ;;  %v7737_v4 = vld [vmem:[%s9918_s26 + $0x1c8] sm:$0xff]  }
 0x39d   :  { %6693 = vmatprep.subr.bf16.mxu0 %v7700_v44  ;;  %6727 = vmatprep.subr.bf16.mxu1 %v7701_v45  ;;  %v7713_v44 = vld [vmem:[%s9918_s26 + $0xd8] sm:$0xff]  }
 0x39e   :  { %6424 = vmatmul.mubr.msk.bf16.gmra.mrb[48].mxu0 %vm434_vm6, %v1501_v43  ;;  %6427 = vmatmul.mubr.msk.bf16.gmra.mrb[32].mxu1 %vm434_vm6, %v1501_v43  ;;  %v7714_v45 = vld [vmem:[%s9918_s26 + $0x18] sm:$0xff]  }
 0x39f   :  { %1644 = vmatprep.mubr.bf16.mxu0 %v9827_v19  ;;  %1707 = vmatprep.mubr.bf16.mxu1 %v9827_v19 }
 0x3a6   :  { %6425 = vmatmul.mubr.msk.bf16.gmra.mrb[52].mxu0 %vm434_vm6, %v9011_v6  ;;  %6428 = vmatmul.mubr.msk.bf16.gmra.mrb[36].mxu1 %vm434_vm6, %v9011_v6 }
 0x3a7   :  { %1750 = vmatprep.mubr.bf16.mxu0 %v9827_v19  ;;  %1813 = vmatprep.mubr.bf16.mxu1 %v9827_v19 }
 0x3ae   :  { %6429 = vmatmul.mubr.msk.bf16.vlgmr.msra.gmra.mrb[56].mxu0 %vm434_vm6, %v1500_v41  ;;  %6432 = vmatmul.mubr.msk.bf16.vlgmr.msra.gmra.mrb[40].mxu1 %vm434_vm6, %v1500_v41  ;;  %v7711_v41 = vld [vmem:[%s9918_s26 + $0x90] sm:$0xff]  }
 0x3af   :  { %1760 = vmatprep.mubr.bf16.mxu0 %v9827_v19  ;;  %1823 = vmatprep.mubr.bf16.mxu1 %v9827_v19 }
 0x3b0   :  { %6694 = vmatpush3.bf16.msra.mxu0 %v7702_v46  ;;  %6728 = vmatpush3.bf16.msra.mxu1 %v7703_v16  ;;  %v7715_v46 = vld [vmem:[%s9918_s26 + $0x98] sm:$0xff]   ;;  %v7716_v16 = vld [vmem:[%s9918_s26 + $0x60] sm:$0xff]  }
 0x3b1   :  { %6695 = vmatprep.subr.bf16.mxu0 %v7704_v17  ;;  %6729 = vmatprep.subr.bf16.mxu1 %v7705_v42  ;;  %v7717_v17 = vld [vmem:[%s9918_s26 + $0xe0] sm:$0xff]  }
 0x3b2   :  { %v7718_v42 = vld [vmem:[%s9918_s26 + $0x20] sm:$0xff]  }
 0x3b4   :  { %6696 = vmatpush3.bf16.msra.mxu0 %v7706_v20  ;;  %6730 = vmatpush3.bf16.msra.mxu1 %v7707_v38  ;;  %v7720_v20 = vld [vmem:[%s9918_s26 + $0x68] sm:$0xff]  }
 0x3b5   :  { %6697 = vmatprep.subr.bf16.mxu0 %v7708_v32  ;;  %6731 = vmatprep.subr.bf16.mxu1 %v7709_v54  ;;  %v7721_v38 = vld [vmem:[%s9918_s26 + $0xe8] sm:$0xff]  }
 0x3b6   :  { %6430 = vmatmul.mubr.msk.bf16.gmra.mrb[60].mxu0 %vm434_vm6, %v1501_v43  ;;  %6433 = vmatmul.mubr.msk.bf16.gmra.mrb[44].mxu1 %vm434_vm6, %v1501_v43  ;;  %v7719_v43 = vld [vmem:[%s9918_s26 + $0xa0] sm:$0xff]   ;;  %v7722_v32 = vld [vmem:[%s9918_s26 + $0x28] sm:$0xff]  }
 0x3b7   :  { %1770 = vmatprep.mubr.bf16.mxu0 %v9827_v19  ;;  %1833 = vmatprep.mubr.bf16.mxu1 %v9827_v19  ;;  %v7723_v54 = vld [vmem:[%s9918_s26 + $0xa8] sm:$0xff]  }
 0x3b8   :  { %6698 = vmatpush3.bf16.msra.mxu0 %v7710_v58  ;;  %6732 = vmatpush3.bf16.msra.mxu1 %v7711_v41  ;;  %v7724_v58 = vld [vmem:[%s9918_s26 + $0x70] sm:$0xff]  }
 0x3b9   :  { %6699 = vmatprep.subr.bf16.mxu0 %v7712_v9  ;;  %6733 = vmatprep.subr.bf16.mxu1 %v7713_v44  ;;  %v7725_v41 = vld [vmem:[%s9918_s26 + $0xf0] sm:$0xff]  }
 0x3ba   :  { %v7726_v9 = vld [vmem:[%s9918_s26 + $0x30] sm:$0xff]  }
 0x3bb   :  { %v7727_v44 = vld [vmem:[%s9918_s26 + $0xb0] sm:$0xff]  }
 0x3bc   :  { %6700 = vmatpush3.bf16.msra.mxu0 %v7714_v45  ;;  %6734 = vmatpush3.bf16.msra.mxu1 %v7715_v46  ;;  %v7729_v45 = vld [vmem:[%s9918_s26 + $0xf8] sm:$0xff]  }
 0x3bd   :  { %6701 = vmatprep.subr.bf16.mxu0 %v7716_v16  ;;  %6735 = vmatprep.subr.bf16.mxu1 %v7717_v17  ;;  %v7730_v46 = vld [vmem:[%s9918_s26 + $0x38] sm:$0xff]   ;;  %v7732_v17 = vld [vmem:[%s9918_s26 + $0x140] sm:$0xff]  }
 0x3be   :  { %6431 = vmatmul.mubr.msk.bf16.gmra.mrb[64].mxu0 %vm434_vm6, %v9011_v6  ;;  %6434 = vmatmul.mubr.msk.bf16.gmra.mrb[48].mxu1 %vm434_vm6, %v9011_v6  ;;  %v7728_v6 = vld [vmem:[%s9918_s26 + $0x78] sm:$0xff]  }
 0x3bf   :  { %v7731_v16 = vld [vmem:[%s9918_s26 + $0xb8] sm:$0xff]  }
 0x3c0   :  { %6702 = vmatpush3.bf16.msra.mxu0 %v7718_v42  ;;  %6736 = vmatpush3.bf16.msra.mxu1 %v7719_v43  ;;  %v7733_v42 = vld [vmem:[%s9918_s26 + $0x1c0] sm:$0xff]  }
 0x3c1   :  { %6703 = vmatprep.subr.bf16.mxu0 %v7720_v20  ;;  %6737 = vmatprep.subr.bf16.mxu1 %v7721_v38 }
 0x3c4   :  { %6704 = vmatpush3.bf16.msra.mxu0 %v7722_v32  ;;  %6738 = vmatpush3.bf16.msra.mxu1 %v7723_v54 }
 0x3c5   :  { %6705 = vmatprep.subr.bf16.mxu0 %v7724_v58  ;;  %6739 = vmatprep.subr.bf16.mxu1 %v7725_v41 }
 0x3c8   :  { %6706 = vmatpush3.bf16.msra.mxu0 %v7726_v9  ;;  %6740 = vmatpush3.bf16.msra.mxu1 %v7727_v44 }
 0x3c9   :  { %6707 = vmatprep.subr.bf16.mxu0 %v7728_v6  ;;  %6741 = vmatprep.subr.bf16.mxu1 %v7729_v45 }
 0x3cc   :  { %6708 = vmatpush3.bf16.msra.mxu0 %v7730_v46  ;;  %6742 = vmatpush3.bf16.msra.mxu1 %v7731_v16 }
 0x3cd   :  { %6761 = vmatprep.subr.bf16.mxu0 %v7732_v17  ;;  %6795 = vmatprep.subr.bf16.mxu1 %v7733_v42  ;;  %v7734_v42 = vld [vmem:[%s9918_s26 + $0x100] sm:$0xff]  }
 0x469   :  { %v1626_v43 = vpop.f32.mrb[44].mxu0  ;;  %v1689_v20 = vpop.f32.mrb[28].mxu1 }
 0x46a   :  { %v1628_v38 = vpop.f32.mrb[45].mxu0  ;;  %v1691_v32 = vpop.f32.mrb[29].mxu1 }
 0x46b   :  { %v1630_v54 = vpop.f32.mrb[46].mxu0  ;;  %v1693_v58 = vpop.f32.mrb[30].mxu1 }
 0x46c   :  { %v1844_v41 = vpack.c.bf16 %v1630_v54, %v1626_v43  ;;  %v1846_v9 = vpack.c.bf16 %v1693_v58, %v1689_v20  ;;  %v1632_v44 = vpop.f32.mrb[47].mxu0  ;;  %v1695_v6 = vpop.f32.mrb[31].mxu1 }
 0x46d   :  { %v1845_v45 = vpack.c.bf16 %v1632_v44, %v1628_v38  ;;  %v1847_v46 = vpack.c.bf16 %v1695_v6, %v1691_v32 }
 0x46e   :  { %v1868_v19 = vmul.bf16 %v1844_v41, %v8862_v10  ;;  %v1870_v3 = vmul.bf16 %v1846_v9, %v8880_v36  ;;  %v7738_v41 = vld [vmem:[%s9918_s26 + $0x108] sm:$0xff]   ;;  %v7742_v36 = vld [vmem:[%s9918_s26 + $0x110] sm:$0xff]  }
 0x46f   :  { %v1869_v16 = vmul.bf16 %v1845_v45, %v8864_v11  ;;  %v1871_v17 = vmul.bf16 %v1847_v46, %v8888_v48  ;;  %v7739_v9 = vld [vmem:[%s9918_s26 + $0x188] sm:$0xff]   ;;  %v7743_v10 = vld [vmem:[%s9918_s26 + $0x190] sm:$0xff]  }
 0x471   :  { %v1636_v43 = vpop.f32.mrb[48].mxu0  ;;  %v1699_v20 = vpop.f32.mrb[32].mxu1  ;;  %2308 = vmatprep.mubr.bf16.mxu0 %v1869_v16  ;;  %2365 = vmatprep.mubr.bf16.mxu1 %v1871_v17  ;;  %v7740_v16 = vld [vmem:[%s9918_s26 + $0x150] sm:$0xff]  }
 0x472   :  { %v1638_v38 = vpop.f32.mrb[49].mxu0  ;;  %v1701_v32 = vpop.f32.mrb[33].mxu1  ;;  %2309 = vmatmul.mubr.bf16.vlgmr.msra.gmra.mrb[68].mxu0 %v1868_v19  ;;  %2366 = vmatmul.mubr.bf16.vlgmr.msra.gmra.mrb[52].mxu1 %v1870_v3  ;;  %v7741_v17 = vld [vmem:[%s9918_s26 + $0x1d0] sm:$0xff]  }
 0x473   :  { %6762 = vmatpush3.bf16.msra.mxu0 %v7734_v42  ;;  %6796 = vmatpush3.bf16.msra.mxu1 %v7735_v22  ;;  %v1640_v54 = vpop.f32.mrb[50].mxu0  ;;  %v1703_v58 = vpop.f32.mrb[34].mxu1 }
 0x474   :  { %v1852_v44 = vpack.c.bf16 %v1640_v54, %v1636_v43  ;;  %v1854_v6 = vpack.c.bf16 %v1703_v58, %v1699_v20  ;;  %v1642_v45 = vpop.f32.mrb[51].mxu0  ;;  %v1705_v46 = vpop.f32.mrb[35].mxu1  ;;  %6763 = vmatprep.subr.bf16.mxu0 %v7736_v30  ;;  %6797 = vmatprep.subr.bf16.mxu1 %v7737_v4  ;;  %v7744_v30 = vld [vmem:[%s9918_s26 + $0x158] sm:$0xff]  }
 0x475   :  { %v1853_v19 = vpack.c.bf16 %v1642_v45, %v1638_v38  ;;  %v1855_v3 = vpack.c.bf16 %v1705_v46, %v1701_v32  ;;  %v7745_v4 = vld [vmem:[%s9918_s26 + $0x1d8] sm:$0xff]  }
 0x476   :  { %v1876_v43 = vmul.bf16 %v1852_v44, %v8871_v23  ;;  %v1878_v20 = vmul.bf16 %v1854_v6, %v8900_v35  ;;  %v7746_v44 = vld [vmem:[%s9918_s26 + $0x118] sm:$0xff]  }
 0x477   :  { %v1877_v22 = vmul.bf16 %v1853_v19, %v8873_v24  ;;  %v1879_v42 = vmul.bf16 %v1855_v3, %v8904_v60  ;;  %6764 = vmatpush3.bf16.msra.mxu0 %v7738_v41  ;;  %6798 = vmatpush3.bf16.msra.mxu1 %v7739_v9  ;;  %v7747_v6 = vld [vmem:[%s9918_s26 + $0x198] sm:$0xff]   ;;  %v7748_v19 = vld [vmem:[%s9918_s26 + $0x160] sm:$0xff]  }
 0x478   :  { %6765 = vmatprep.subr.bf16.mxu0 %v7740_v16  ;;  %6799 = vmatprep.subr.bf16.mxu1 %v7741_v17  ;;  %v7749_v3 = vld [vmem:[%s9918_s26 + $0x1e0] sm:$0xff]  }
 0x479   :  { %v1646_v38 = vpop.f32.mrb[52].mxu0  ;;  %v1709_v32 = vpop.f32.mrb[36].mxu1  ;;  %2316 = vmatprep.mubr.bf16.mxu0 %v1877_v22  ;;  %2373 = vmatprep.mubr.bf16.mxu1 %v1879_v42 }
 0x47a   :  { %v1648_v54 = vpop.f32.mrb[53].mxu0  ;;  %v1711_v58 = vpop.f32.mrb[37].mxu1  ;;  %2317 = vmatmul.mubr.bf16.gmra.mrb[72].mxu0 %v1876_v43  ;;  %2374 = vmatmul.mubr.bf16.gmra.mrb[56].mxu1 %v1878_v20  ;;  %v7750_v43 = vld [vmem:[%s9918_s26 + $0x120] sm:$0xff]  }
 0x47b   :  { %6766 = vmatpush3.bf16.msra.mxu0 %v7742_v36  ;;  %6800 = vmatpush3.bf16.msra.mxu1 %v7743_v10  ;;  %v1650_v41 = vpop.f32.mrb[54].mxu0  ;;  %v1713_v9 = vpop.f32.mrb[38].mxu1  ;;  %v7751_v20 = vld [vmem:[%s9918_s26 + $0x1a0] sm:$0xff]  }
 0x47c   :  { %v1860_v45 = vpack.c.bf16 %v1650_v41, %v1646_v38  ;;  %v1862_v46 = vpack.c.bf16 %v1713_v9, %v1709_v32  ;;  %v1652_v16 = vpop.f32.mrb[55].mxu0  ;;  %v1715_v17 = vpop.f32.mrb[39].mxu1  ;;  %6767 = vmatprep.subr.bf16.mxu0 %v7744_v30  ;;  %6801 = vmatprep.subr.bf16.mxu1 %v7745_v4  ;;  %v7752_v30 = vld [vmem:[%s9918_s26 + $0x168] sm:$0xff]  }
 0x47d   :  { %v1861_v22 = vpack.c.bf16 %v1652_v16, %v1648_v54  ;;  %v1863_v42 = vpack.c.bf16 %v1715_v17, %v1711_v58  ;;  %v7753_v4 = vld [vmem:[%s9918_s26 + $0x1e8] sm:$0xff]  }
 0x47e   :  { %v1884_v38 = vmul.bf16 %v1860_v45, %v8935_v55  ;;  %v1886_v32 = vmul.bf16 %v1862_v46, %v8965_v18  ;;  %v7754_v45 = vld [vmem:[%s9918_s26 + $0x128] sm:$0xff]  }
 0x47f   :  { %v1885_v10 = vmul.bf16 %v1861_v22, %v8937_v28  ;;  %v1887_v36 = vmul.bf16 %v1863_v42, %v8970_v27  ;;  %6768 = vmatpush3.bf16.msra.mxu0 %v7746_v44  ;;  %6802 = vmatpush3.bf16.msra.mxu1 %v7747_v6  ;;  %v7755_v46 = vld [vmem:[%s9918_s26 + $0x1a8] sm:$0xff]   ;;  %v7756_v22 = vld [vmem:[%s9918_s26 + $0x170] sm:$0xff]  }
 0x480   :  { %6769 = vmatprep.subr.bf16.mxu0 %v7748_v19  ;;  %6803 = vmatprep.subr.bf16.mxu1 %v7749_v3  ;;  %v7757_v42 = vld [vmem:[%s9918_s26 + $0x1f0] sm:$0xff]  }
 0x481   :  { %v1752_v54 = vpop.f32.mrb[56].mxu0  ;;  %v1815_v58 = vpop.f32.mrb[40].mxu1  ;;  %2324 = vmatprep.mubr.bf16.mxu0 %v1885_v10  ;;  %2381 = vmatprep.mubr.bf16.mxu1 %v1887_v36 }
 0x482   :  { %v1754_v41 = vpop.f32.mrb[57].mxu0  ;;  %v1817_v9 = vpop.f32.mrb[41].mxu1  ;;  %2325 = vmatmul.mubr.bf16.gmra.mrb[76].mxu0 %v1884_v38  ;;  %2382 = vmatmul.mubr.bf16.gmra.mrb[60].mxu1 %v1886_v32  ;;  %v7758_v38 = vld [vmem:[%s9918_s26 + $0x130] sm:$0xff]  }
 0x483   :  { %6770 = vmatpush3.bf16.msra.mxu0 %v7750_v43  ;;  %6804 = vmatpush3.bf16.msra.mxu1 %v7751_v20  ;;  %v1756_v44 = vpop.f32.mrb[58].mxu0  ;;  %v1819_v6 = vpop.f32.mrb[42].mxu1  ;;  %v7759_v32 = vld [vmem:[%s9918_s26 + $0x1b0] sm:$0xff]  }
 0x484   :  { %v1848_v16 = vpack.c.bf16 %v1756_v44, %v1752_v54  ;;  %v1850_v17 = vpack.c.bf16 %v1819_v6, %v1815_v58  ;;  %v1758_v19 = vpop.f32.mrb[59].mxu0  ;;  %v1821_v3 = vpop.f32.mrb[43].mxu1  ;;  %6771 = vmatprep.subr.bf16.mxu0 %v7752_v30  ;;  %6805 = vmatprep.subr.bf16.mxu1 %v7753_v4  ;;  %v7760_v54 = vld [vmem:[%s9918_s26 + $0x178] sm:$0xff]  }
 0x485   :  { %v1849_v10 = vpack.c.bf16 %v1758_v19, %v1754_v41  ;;  %v1851_v36 = vpack.c.bf16 %v1821_v3, %v1817_v9  ;;  %v7761_v58 = vld [vmem:[%s9918_s26 + $0x1f8] sm:$0xff]  }
 0x487   :  { %v1873_v43 = vmul.bf16 %v1849_v10, %v8916_v47  ;;  %v1875_v20 = vmul.bf16 %v1851_v36, %v8909_v61  ;;  %6772 = vmatpush3.bf16.msra.mxu0 %v7754_v45  ;;  %6806 = vmatpush3.bf16.msra.mxu1 %v7755_v46  ;;  %v7762_v45 = vld [vmem:[%s9918_s26 + $0x138] sm:$0xff]  }
 0x488   :  { %6773 = vmatprep.subr.bf16.mxu0 %v7756_v22  ;;  %6807 = vmatprep.subr.bf16.mxu1 %v7757_v42  ;;  %v7763_v46 = vld [vmem:[%s9918_s26 + $0x1b8] sm:$0xff]  }
 0x489   :  { %v1762_v30 = vpop.f32.mrb[60].mxu0  ;;  %v1825_v4 = vpop.f32.mrb[44].mxu1  ;;  %2422 = vmatprep.mubr.bf16.mxu0 %v1873_v43  ;;  %2479 = vmatprep.mubr.bf16.mxu1 %v1875_v20  ;;  %v1872_v20 = vmul.bf16 %v1848_v16, %v8911_v21 }
 0x48a   :  { %v1764_v41 = vpop.f32.mrb[61].mxu0  ;;  %v1827_v9 = vpop.f32.mrb[45].mxu1 }
 0x48b   :  { %6774 = vmatpush3.bf16.msra.mxu0 %v7758_v38  ;;  %6808 = vmatpush3.bf16.msra.mxu1 %v7759_v32  ;;  %v1766_v44 = vpop.f32.mrb[62].mxu0  ;;  %v1829_v6 = vpop.f32.mrb[46].mxu1  ;;  %v1874_v38 = vmul.bf16 %v1850_v17, %v8902_v8  ;;  %v9920_v32 = vmov 0.0  }
 0x48c   :  { %v1856_v19 = vpack.c.bf16 %v1766_v44, %v1762_v30  ;;  %v1858_v3 = vpack.c.bf16 %v1829_v6, %v1825_v4  ;;  %v1768_v10 = vpop.f32.mrb[63].mxu0  ;;  %v1831_v36 = vpop.f32.mrb[47].mxu1  ;;  %6775 = vmatprep.subr.bf16.mxu0 %v7760_v54  ;;  %6809 = vmatprep.subr.bf16.mxu1 %v7761_v58 }
 0x48d   :  { %v1857_v22 = vpack.c.bf16 %v1768_v10, %v1764_v41  ;;  %v1859_v42 = vpack.c.bf16 %v1831_v36, %v1827_v9 }
 0x48f   :  { %v1881_v61 = vmul.bf16 %v1857_v22, %v8928_v40  ;;  %v1883_v43 = vmul.bf16 %v1859_v42, %v8933_v33  ;;  %6776 = vmatpush3.bf16.msra.mxu0 %v7762_v45  ;;  %6810 = vmatpush3.bf16.msra.mxu1 %v7763_v46  ;;  %v1880_v22 = vmul.bf16 %v1856_v19, %v8921_v39 }
 0x490   :  { %7169 = vmatprep.subr.bf16.mxu0 %v9920_v32  ;;  %7177 = vmatprep.subr.bf16.mxu1 %v9920_v32  ;;  %v1882_v42 = vmul.bf16 %v1858_v3, %v8926_v13 }
 0x491   :  { %v1772_v30 = vpop.f32.mrb[64].mxu0  ;;  %v1835_v4 = vpop.f32.mrb[48].mxu1 }
 0x492   :  { %2423 = vmatmul.mubr.bf16.vlgmr.msra.gmra.mrb[80].mxu0 %v1872_v20  ;;  %2480 = vmatmul.mubr.bf16.vlgmr.msra.gmra.mrb[64].mxu1 %v1874_v38  ;;  %v1774_v54 = vpop.f32.mrb[65].mxu0  ;;  %v1837_v58 = vpop.f32.mrb[49].mxu1 }
 0x493   :  { %2430 = vmatprep.mubr.bf16.mxu0 %v1881_v61  ;;  %2487 = vmatprep.mubr.bf16.mxu1 %v1883_v43  ;;  %v1776_v41 = vpop.f32.mrb[66].mxu0  ;;  %v1839_v9 = vpop.f32.mrb[50].mxu1 }
 0x494   :  { %v1864_v44 = vpack.c.bf16 %v1776_v41, %v1772_v30  ;;  %v1866_v6 = vpack.c.bf16 %v1839_v9, %v1835_v4  ;;  %v1778_v45 = vpop.f32.mrb[67].mxu0  ;;  %v1841_v16 = vpop.f32.mrb[51].mxu1 }
 0x495   :  { %v1865_v46 = vpack.c.bf16 %v1778_v45, %v1774_v54  ;;  %v1867_v17 = vpack.c.bf16 %v1841_v16, %v1837_v58 }
 0x496   :  { %v1888_v61 = vmul.bf16 %v1864_v44, %v8939_v53  ;;  %v1890_v43 = vmul.bf16 %v1866_v6, %v8975_v52 }
 0x497   :  { %v1889_v10 = vmul.bf16 %v1865_v46, %v8941_v29  ;;  %v1891_v36 = vmul.bf16 %v1867_v17, %v8977_v62 }
 0x49a   :  { %2431 = vmatmul.mubr.bf16.gmra.mrb[84].mxu0 %v1880_v22  ;;  %2488 = vmatmul.mubr.bf16.gmra.mrb[68].mxu1 %v1882_v42 }
 0x49b   :  { %2438 = vmatprep.mubr.bf16.mxu0 %v1889_v10  ;;  %2495 = vmatprep.mubr.bf16.mxu1 %v1891_v36 }
 0x4a2   :  { %2439 = vmatmul.mubr.bf16.gmra.mrb[88].mxu0 %v1888_v61  ;;  %2496 = vmatmul.mubr.bf16.gmra.mrb[72].mxu1 %v1890_v43 }
 0x4a3   :  { %7173 = vmatprep.mubr.msk.bf16.mxu0 %vm8338_vm0, %v9920_v32  ;;  %7179 = vmatprep.mubr.msk.bf16.mxu1 %vm8338_vm0, %v9920_v32 }
 0x545   :  { %v6709_v20 = vpop.f32.mrb[68].mxu0  ;;  %v6743_v19 = vpop.f32.mrb[52].mxu1 }
 0x546   :  { %v6710_v38 = vpop.f32.mrb[69].mxu0  ;;  %v6744_v3 = vpop.f32.mrb[53].mxu1 }
 0x547   :  { %v6711_v30 = vadd.f32 %v6710_v38, %v6709_v20  ;;  %v6745_v4 = vadd.f32 %v6744_v3, %v6743_v19  ;;  %v6712_v54 = vpop.f32.mrb[70].mxu0  ;;  %v6746_v58 = vpop.f32.mrb[54].mxu1 }
 0x548   :  { %v6713_v41 = vpop.f32.mrb[71].mxu0  ;;  %v6747_v9 = vpop.f32.mrb[55].mxu1 }
 0x549   :  { %v2368_v44 = vadd.f32 %v6745_v4, %v6711_v30  ;;  %v6714_v6 = vadd.f32 %v6713_v41, %v6712_v54  ;;  %v6748_v45 = vadd.f32 %v6747_v9, %v6746_v58 }
 0x54b   :  { %v2371_v16 = vadd.f32 %v6748_v45, %v6714_v6 }
 0x54d   :  { %v6715_v46 = vpop.f32.mrb[72].mxu0  ;;  %v6749_v17 = vpop.f32.mrb[56].mxu1 }
 0x54e   :  { %v6716_v10 = vpop.f32.mrb[73].mxu0  ;;  %v6750_v36 = vpop.f32.mrb[57].mxu1 }
 0x54f   :  { %v6717_v22 = vadd.f32 %v6716_v10, %v6715_v46  ;;  %v6751_v42 = vadd.f32 %v6750_v36, %v6749_v17  ;;  %v6718_v61 = vpop.f32.mrb[74].mxu0  ;;  %v6752_v43 = vpop.f32.mrb[58].mxu1 }
 0x550   :  { %v6719_v52 = vpop.f32.mrb[75].mxu0  ;;  %v6753_v53 = vpop.f32.mrb[59].mxu1 }
 0x551   :  { %v2376_v20 = vadd.f32 %v6751_v42, %v6717_v22  ;;  %v6720_v19 = vadd.f32 %v6719_v52, %v6718_v61  ;;  %v6754_v38 = vadd.f32 %v6753_v53, %v6752_v43 }
 0x553   :  { %v2379_v3 = vadd.f32 %v6754_v38, %v6720_v19 }
 0x555   :  { %v6721_v13 = vpop.f32.mrb[76].mxu0  ;;  %v6755_v39 = vpop.f32.mrb[60].mxu1 }
 0x556   :  { %v6722_v30 = vpop.f32.mrb[77].mxu0  ;;  %v6756_v4 = vpop.f32.mrb[61].mxu1 }
 0x557   :  { %v6723_v54 = vadd.f32 %v6722_v30, %v6721_v13  ;;  %v6757_v58 = vadd.f32 %v6756_v4, %v6755_v39  ;;  %v6724_v41 = vpop.f32.mrb[78].mxu0  ;;  %v6758_v9 = vpop.f32.mrb[62].mxu1 }
 0x558   :  { %v6725_v6 = vpop.f32.mrb[79].mxu0  ;;  %v6759_v45 = vpop.f32.mrb[63].mxu1 }
 0x559   :  { %v2384_v46 = vadd.f32 %v6757_v58, %v6723_v54  ;;  %v6726_v17 = vadd.f32 %v6725_v6, %v6724_v41  ;;  %v6760_v10 = vadd.f32 %v6759_v45, %v6758_v9 }
 0x55b   :  { %v2387_v36 = vadd.f32 %v6760_v10, %v6726_v17 }
 0x565   :  { %v6777_v62 = vpop.f32.mrb[80].mxu0  ;;  %v6811_v29 = vpop.f32.mrb[64].mxu1 }
 0x566   :  { %v6778_v22 = vpop.f32.mrb[81].mxu0  ;;  %v6812_v52 = vpop.f32.mrb[65].mxu1 }
 0x567   :  { %v6779_v53 = vadd.f32 %v6778_v22, %v6777_v62  ;;  %v6813_v42 = vadd.f32 %v6812_v52, %v6811_v29  ;;  %v6780_v61 = vpop.f32.mrb[82].mxu0  ;;  %v6814_v43 = vpop.f32.mrb[66].mxu1 }
 0x568   :  { %v6781_v19 = vpop.f32.mrb[83].mxu0  ;;  %v6815_v38 = vpop.f32.mrb[67].mxu1 }
 0x569   :  { %v2425_v13 = vadd.f32 %v6779_v53, %v2368_v44  ;;  %v6782_v39 = vadd.f32 %v6781_v19, %v6780_v61  ;;  %v6816_v30 = vadd.f32 %v6815_v38, %v6814_v43 }
 0x56b   :  { %v2482_v4 = vadd.f32 %v6813_v42, %v2425_v13  ;;  %v2428_v8 = vadd.f32 %v6782_v39, %v2371_v16 }
 0x56d   :  { %v2485_v21 = vadd.f32 %v6816_v30, %v2428_v8  ;;  %v6783_v54 = vpop.f32.mrb[84].mxu0  ;;  %v6817_v58 = vpop.f32.mrb[68].mxu1 }
 0x56e   :  { %v6784_v41 = vpop.f32.mrb[85].mxu0  ;;  %v6818_v9 = vpop.f32.mrb[69].mxu1 }
 0x56f   :  { %v2504_v6 = vpack.c.bf16 %v2485_v21, %v2482_v4  ;;  %v6785_v45 = vadd.f32 %v6784_v41, %v6783_v54  ;;  %v6819_v17 = vadd.f32 %v6818_v9, %v6817_v58  ;;  %v6786_v10 = vpop.f32.mrb[86].mxu0  ;;  %v6820_v62 = vpop.f32.mrb[70].mxu1  ;;  %v7764_v4 = vld [vmem:[%s9921_s13] sm:$0xff]  }
 0x570   :  { %v6787_v29 = vpop.f32.mrb[87].mxu0  ;;  %v6821_v22 = vpop.f32.mrb[71].mxu1 }
 0x571   :  { %v2433_v52 = vadd.f32 %v6785_v45, %v2376_v20  ;;  %v6788_v33 = vadd.f32 %v6787_v29, %v6786_v10  ;;  %v6822_v40 = vadd.f32 %v6821_v22, %v6820_v62  ;;  %7170 = vmatpush3.bf16.msra.mxu0 %v2504_v6  ;;  %v7765_v6 = vld [vmem:[%s9923_s0] sm:$0xff]  }
 0x572   :  { %7171 = vmatprep.subr.bf16.mxu0 %v9920_v32  ;;  %v6499_v45 = vld [vmem:[%s9924_s8] ss:$0 sm:$0xff] }
 0x573   :  { %v2490_v44 = vadd.f32 %v6819_v17, %v2433_v52  ;;  %v2436_v8 = vadd.f32 %v6788_v33, %v2379_v3 }
 0x575   :  { %v2493_v16 = vadd.f32 %v6822_v40, %v2436_v8  ;;  %v6789_v53 = vpop.f32.mrb[88].mxu0  ;;  %v6823_v42 = vpop.f32.mrb[72].mxu1 }
 0x576   :  { %v6790_v61 = vpop.f32.mrb[89].mxu0  ;;  %v6824_v21 = vpop.f32.mrb[73].mxu1 }
 0x577   :  { %v2505_v43 = vpack.c.bf16 %v2493_v16, %v2490_v44  ;;  %v6791_v19 = vadd.f32 %v6790_v61, %v6789_v53  ;;  %v6825_v38 = vadd.f32 %v6824_v21, %v6823_v42  ;;  %v6792_v13 = vpop.f32.mrb[90].mxu0  ;;  %v6826_v39 = vpop.f32.mrb[74].mxu1 }
 0x578   :  { %v6793_v30 = vpop.f32.mrb[91].mxu0  ;;  %v6827_v20 = vpop.f32.mrb[75].mxu1 }
 0x579   :  { %v2441_v54 = vadd.f32 %v6791_v19, %v2384_v46  ;;  %v6794_v58 = vadd.f32 %v6793_v30, %v6792_v13  ;;  %v6828_v41 = vadd.f32 %v6827_v20, %v6826_v39  ;;  %7172 = vmatpush3.bf16.msra.mxu0 %v2505_v43  ;;  %v622_v46 = vld [vmem:[%s9922_s1] sm:$0xf]  ;;  %v7767_v20 = vld [vmem:[%s9923_s0 + $0x8] sm:$0xff]  }
 0x57a   :  { %7183 = vmatprep.subr.bf16.mxu0 %v9920_v32  ;;  %v623_v43 = vld [vmem:[%s9925_s23] sm:$0xf] }
 0x57b   :  { %v2498_v40 = vadd.f32 %v6825_v38, %v2441_v54  ;;  %v2444_v33 = vadd.f32 %v6794_v58, %v2387_v36  ;;  %v9146_v36 = vpop.permute.xlu0 %3026  ;;  %v7766_v19 = vld [vmem:[%s9926_s28] sm:$0xff]  }
 0x57c   :  { %7174 = vmatmul.mubr.msk.bf16.vlgmr.msra.gmra.mrb[92].mxu0 %vm434_vm6, %v7764_v4  ;;  %v7768_v4 = vld [vmem:[%s9926_s28 + $0x8] sm:$0xff]   ;;  %v6502_v54 = vld [vmem:[%s9927_s2] ss:$0 sm:$0xff] }
 0x57d   :  { %v2501_v3 = vadd.f32 %v6828_v41, %v2444_v33  ;;  %7185 = vmatprep.mubr.msk.bf16.mxu0 %vm8338_vm0, %v9920_v32 }
 0x57f   :  { %v2562_v9 = vpack.c.bf16 %v2501_v3, %v2498_v40  ;;  %v7665_v17 = vpop.permute.xlu0 %7664  ;;  %v7769_v40 = vld [vmem:[%s9928_s24] sm:$0xff]  }
 0x580   :  { %v7667_v52 = vunpack.i.h.bf16 %v7665_v17  ;;  %v7666_v44 = vunpack.i.l.bf16 %v7665_v17  ;;  %v7772_v17 = vld [vmem:[%s9929_s25 + $0x8] sm:$0xff]  }
 0x581   :  { %7178 = vmatpush3.bf16.msra.mxu1 %v2562_v9 }
 0x582   :  { %7189 = vmatprep.subr.bf16.mxu1 %v9920_v32 }
 0x584   :  { %7180 = vmatmul.mubr.msk.bf16.vlgmr.msra.gmra.mrb[76].mxu1 %vm363_vm2, %v622_v46 }
 0x585   :  { %7193 = vmatprep.mubr.msk.bf16.mxu1 %vm8338_vm0, %v9920_v32  ;;  %7190 = vmatpush3.bf16.msra.mxu1 %v7765_v6  ;;  %v7770_v6 = vld [vmem:[%s9928_s24 + $0x8] sm:$0xff]  }
 0x586   :  { %7191 = vmatprep.subr.bf16.mxu1 %v9920_v32 }
 0x589   :  { %7192 = vmatpush3.bf16.msra.mxu1 %v7767_v20 }
 0x58a   :  { %7205 = vmatprep.subr.bf16.mxu1 %v9920_v32 }
 0x64f   :  { %v2555_v10 = vpop.f32.mrb[92].mxu0 }
 0x650   :  { %v2556_v62 = vadd.f32 %v6499_v45, %v2555_v10  ;;  %v7175_v29 = vpop.f32.mrb[93].mxu0 }
 0x651   :  { %v2558_v22 = vpop.f32.mrb[94].mxu0 }
 0x652   :  { %v2559_v8 = vadd.f32 %v6499_v45, %v2558_v22  ;;  %v7176_v16 = vpop.f32.mrb[95].mxu0  ;;  %v3352_v53 = vsel %vm434_vm6, %v2556_v62, %v7666_v44  ;;  %v7771_v45 = vld [vmem:[%s9929_s25] sm:$0xff]  }
 0x654   :  { %v9150_v42 = vpack.c.bf16 %v2559_v8, %v2556_v62  ;;  %v3353_v61 = vsel %vm434_vm6, %v2559_v8, %v7667_v52 }
 0x655   :  { %v9153_v21 = vpack.c.bf16 %v3353_v61, %v3352_v53 }
 0x656   :  { %7184 = vmatpush3.bf16.msra.mxu0 %v9150_v42 }
 0x657   :  { %7197 = vmatprep.subr.bf16.mxu0 %v9920_v32  ;;  %v2607_v38 = vpop.f32.mrb[76].mxu1 }
 0x658   :  { %v7181_v13 = vpop.f32.mrb[77].mxu1  ;;  %v2608_v58 = vadd.f32 %v6502_v54, %v2607_v38 }
 0x659   :  { %7186 = vmatmul.mubr.msk.bf16.vlgmr.msra.gmra.mrb[96].mxu0 %vm363_vm2, %v623_v43  ;;  %v2610_v39 = vpop.f32.mrb[78].mxu1 }
 0x65a   :  { %7198 = vmatpush3.bf16.msra.mxu0 %v7766_v19  ;;  %7201 = vmatprep.mubr.msk.bf16.mxu0 %vm8338_vm0, %v9920_v32  ;;  %v7182_v30 = vpop.f32.mrb[79].mxu1 }
 0x65b   :  { %7199 = vmatprep.subr.bf16.mxu0 %v9920_v32  ;;  %v1380_v30 = vld [vmem:[%s9930_s10] sm:$0x3] }
 0x65c   :  { %v9191_v20 = vsel %vm2910_vm7, %v1380_v30, 0 }
 0x65e   :  { %7200 = vmatpush3.bf16.msra.mxu0 %v7768_v4 }
 0x65f   :  { %7213 = vmatprep.subr.bf16.mxu0 %v9920_v32 }
 0x72c   :  { %v2651_v41 = vpop.f32.mrb[96].mxu0 }
 0x72d   :  { %v2661_v33 = vpack.c.bf16 %v2608_v58, %v2651_v41  ;;  %v7187_v3 = vpop.f32.mrb[97].mxu0 }
 0x72e   :  { %v2654_v9 = vpop.f32.mrb[98].mxu0 }
 0x72f   :  { %v7188_v46 = vpop.f32.mrb[99].mxu0  ;;  %7194 = vmatmul.mubr.msk.bf16.vlgmr.msra.gmra.mrb[80].mxu1 %vm434_vm6, %v2661_v33  ;;  %7202 = vmatmul.mubr.msk.bf16.vlgmr.msra.gmra.mrb[100].mxu0 %vm434_vm6, %v2661_v33 }
 0x730   :  { %7206 = vmatpush3.bf16.msra.mxu1 %v7769_v40  ;;  %7209 = vmatprep.mubr.msk.bf16.mxu1 %vm8338_vm0, %v9920_v32 }
 0x731   :  { %7207 = vmatprep.subr.bf16.mxu1 %v9920_v32  ;;  %7217 = vmatprep.mubr.msk.bf16.mxu0 %vm8338_vm0, %v9920_v32 }
 0x732   :  { %7214 = vmatpush3.bf16.msra.mxu0 %v7771_v45 }
 0x733   :  { %7215 = vmatprep.subr.bf16.mxu0 %v9920_v32 }
 0x734   :  { %7208 = vmatpush3.bf16.msra.mxu1 %v7770_v6 }
 0x735   :  { %7221 = vmatprep.subr.bf16.mxu1 %v9920_v32 }
 0x736   :  { %7216 = vmatpush3.bf16.msra.mxu0 %v7772_v17 }
 0x737   :  { %7210 = vmatmul.mubr.msk.bf16.vlgmr.msra.gmra.mrb[84].mxu1 %vm434_vm6, %v8856_v5  ;;  %7227 = vmatprep.subr.bf16.mxu0 %v9920_v32 }
 0x738   :  { %7223 = vmatprep.mubr.msk.bf16.mxu1 %vm8338_vm0, %v9920_v32  ;;  %7222 = vmatpush3.bf16.msra.mxu1 %v9191_v20 }
 0x739   :  { %7235 = vmatprep.subr.bf16.mxu1 %v9920_v32 }
 0x802   :  { %v2711_v10 = vpop.f32.mrb[80].mxu1  ;;  %v2768_v62 = vpop.f32.mrb[100].mxu0 }
 0x803   :  { %v7195_v29 = vpop.f32.mrb[81].mxu1  ;;  %v7203_v22 = vpop.f32.mrb[101].mxu0 }
 0x804   :  { %v2714_v52 = vpop.f32.mrb[82].mxu1  ;;  %v2771_v44 = vpop.f32.mrb[102].mxu0 }
 0x805   :  { %v7196_v8 = vpop.f32.mrb[83].mxu1  ;;  %v7204_v16 = vpop.f32.mrb[103].mxu0 }
 0x80a   :  { %v2827_v53 = vpop.f32.mrb[84].mxu1 }
 0x80b   :  { %v2833_v61 = vmul.f32 %v2827_v53, %v2711_v10  ;;  %v2834_v43 = vmul.f32 %v2827_v53, %v2714_v52  ;;  %v7211_v19 = vpop.f32.mrb[85].mxu1  ;;  %v7773_v53 = vld [vmem:[%s9931_s19] sm:$0xff]  }
 0x80c   :  { %v2830_v38 = vpop.f32.mrb[86].mxu1  ;;  %v7777_v19 = vld [vmem:[%s9932_s3 + $0x8] sm:$0xff]  }
 0x80d   :  { %v2835_v13 = vpack.c.bf16 %v2834_v43, %v2833_v61  ;;  %v7212_v39 = vpop.f32.mrb[87].mxu1  ;;  %v7774_v61 = vld [vmem:[%s9931_s19 + $0x8] sm:$0xff]   ;;  %v7775_v43 = vld [vmem:[%s9932_s3] sm:$0xff]   ;;  %v7779_v38 = vld [vmem:[%s9932_s3 + $0x10] sm:$0xff]  }
 0x80f   :  { %7218 = vmatmul.mubr.msk.bf16.vlgmr.msra.gmra.mrb[104].mxu0 %vm434_vm6, %v2835_v13 }
 0x810   :  { %7231 = vmatprep.mubr.msk.bf16.mxu0 %vm8338_vm0, %v9920_v32  ;;  %7228 = vmatpush3.bf16.msra.mxu0 %v7773_v53  ;;  %v7785_v53 = vld [vmem:[%s9933_s11 + $0x8] sm:$0xff]  }
 0x811   :  { %7229 = vmatprep.subr.bf16.mxu0 %v9920_v32 }
 0x814   :  { %7230 = vmatpush3.bf16.msra.mxu0 %v7774_v61  ;;  %v7786_v61 = vld [vmem:[%s9934_s16 + $0x8] sm:$0xff]  }
 0x815   :  { %7247 = vmatprep.subr.bf16.mxu0 %v9920_v32 }
 0x8e2   :  { %v2885_v4 = vpop.f32.mrb[104].mxu0 }
 0x8e3   :  { %v7219_v54 = vpop.f32.mrb[105].mxu0  ;;  %v2892_v41 = vmul.f32 0.125, %v2885_v4 }
 0x8e4   :  { %v2888_v58 = vpop.f32.mrb[106].mxu0 }
 0x8e5   :  { %v2893_v40 = vmul.f32 0.125, %v2888_v58  ;;  %v7220_v33 = vpop.f32.mrb[107].mxu0 }
 0x8e7   :  { %v2894_v3 = vmax.f32 %v2892_v41, %v2893_v40 }
 0x8e9   :  { %v2895_v9 = vsub.f32 %v2892_v41, %v2894_v3  ;;  %v2898_v46 = vsub.f32 %v2893_v40, %v2894_v3  ;;  %v7776_v40 = vld [vmem:[%s9932_s3 + $0x20] sm:$0xff]   ;;  %v7778_v3 = vld [vmem:[%s9932_s3 + $0x28] sm:$0xff]  }
 0x8eb   :  { %v2896_v6 = vmul.f32 1.442695, %v2895_v9  ;;  %v2899_v45 = vmul.f32 1.442695, %v2898_v46  ;;  %v7782_v9 = vld [vmem:[%s9932_s3 + $0x38] sm:$0xff]  }
 0x8ec   :  { %v6518_v46 = vld [vmem:[#allocation11] ss:$0 sm:$0xff] }
 0x8ed   :  { %7830 = vpow2.f32 %v2896_v6 }
 0x8ee   :  { %7832 = vpow2.f32 %v2899_v45 }
 0x8f7   :  { %v7831_v17 = vpop.eup %7830 }
 0x8f8   :  { %v7833_v10 = vpop.eup %7832 }
 0x8f9   :  { %v2901_v29 = vadd.f32 %v7833_v10, %v7831_v17 }
 0x8fb   :  { %7834 = vrcp.f32 %v2901_v29 }
 0x905   :  { %v7835_v22 = vpop.eup %7834 }
 0x906   :  { %v2903_v52 = vmul.f32 %v7835_v22, %v7831_v17  ;;  %v2904_v8 = vmul.f32 %v7835_v22, %v7833_v10 }
 0x908   :  { %v2905_v16 = vpack.c.bf16 %v2904_v8, %v2903_v52  ;;  %v7783_v52 = vld [vmem:[%s9933_s11] sm:$0xff]  }
 0x909   :  { %v7784_v8 = vld [vmem:[%s9934_s16] sm:$0xff]  }
 0x90a   :  { %7224 = vmatmul.mubr.msk.bf16.vlgmr.msra.gmra.mrb[88].mxu1 %vm2906_vm8, %v2905_v16 }
 0x90b   :  { %7243 = vmatprep.mubr.msk.bf16.mxu1 %vm8338_vm0, %v9920_v32  ;;  %7236 = vmatpush3.bf16.msra.mxu1 %v7775_v43  ;;  %v7788_v43 = vld [vmem:[%s9935_s29 + $0x20] sm:$0xff]  }
 0x90c   :  { %7237 = vmatprep.subr.bf16.mxu1 %v9920_v32 }
 0x90f   :  { %7238 = vmatpush3.bf16.msra.mxu1 %v7777_v19 }
 0x910   :  { %7239 = vmatprep.subr.bf16.mxu1 %v9920_v32 }
 0x913   :  { %7240 = vmatpush3.bf16.msra.mxu1 %v7779_v38  ;;  %v7789_v38 = vld [vmem:[%s9935_s29 + $0x8] sm:$0xff]  }
 0x914   :  { %7241 = vmatprep.subr.bf16.mxu1 %v9920_v32 }
 0x9dd   :  { %v2948_v13 = vpop.f32.mrb[88].mxu1 }
 0x9de   :  { %v2955_v39 = vmul.f32 %v2948_v13, %v2768_v62  ;;  %v7225_v30 = vpop.f32.mrb[89].mxu1  ;;  %v7780_v62 = vld [vmem:[%s9932_s3 + $0x30] sm:$0xff]   ;;  %v7790_v13 = vld [vmem:[%s9935_s29 + $0x28] sm:$0xff]  }
 0x9df   :  { %v2951_v4 = vpop.f32.mrb[90].mxu1  ;;  %v7793_v30 = vld [vmem:[%s9935_s29 + $0x18] sm:$0xff]  }
 0x9e0   :  { %v2956_v54 = vmul.f32 %v2951_v4, %v2771_v44  ;;  %v7226_v58 = vpop.f32.mrb[91].mxu1  ;;  %v7781_v44 = vld [vmem:[%s9932_s3 + $0x18] sm:$0xff]  }
 0x9e1   :  { %7242 = vmatpush3.bf16.msra.mxu1 %v7781_v44  ;;  %v7794_v4 = vld [vmem:[%s9935_s29 + $0x38] sm:$0xff]   ;;  %v7796_v58 = vld [vmem:[%s9937_s9] sm:$0xff]  }
 0x9e2   :  { %v2957_v41 = vadd.f32 %v2956_v54, %v2955_v39  ;;  %7259 = vmatprep.subr.bf16.mxu1 %v9920_v32  ;;  %v7792_v39 = vld [vmem:[%s9935_s29 + $0x30] sm:$0xff]   ;;  %v7795_v54 = vld [vmem:[%s9936_s5] sm:$0xff]  }
 0x9e4   :  { %v2962_v33 = vpack.c.bf16 %v2957_v41, %v2957_v41  ;;  %v7797_v41 = vld [vmem:[%s9936_s5 + $0x8] sm:$0xff]  }
 0x9e6   :  { %7232 = vmatmul.mubr.msk.bf16.vlgmr.msra.gmra.mrb[108].mxu0 %vm434_vm6, %v2962_v33  ;;  %v6522_v33 = vld [vmem:[%s9938_s17] ss:$0 sm:$0xff] }
 0x9e7   :  { %7248 = vmatpush3.bf16.msra.mxu0 %v7776_v40  ;;  %7255 = vmatprep.mubr.msk.bf16.mxu0 %vm8338_vm0, %v9920_v32  ;;  %v7798_v40 = vld [vmem:[%s9937_s9 + $0x8] sm:$0xff]  }
 0x9e8   :  { %7249 = vmatprep.subr.bf16.mxu0 %v9920_v32 }
 0x9eb   :  { %7250 = vmatpush3.bf16.msra.mxu0 %v7778_v3 }
 0x9ec   :  { %7251 = vmatprep.subr.bf16.mxu0 %v9920_v32 }
 0x9ef   :  { %7252 = vmatpush3.bf16.msra.mxu0 %v7780_v62  ;;  %v6538_v62 = vld [vmem:[%s9938_s17 + $0x1] ss:$0 sm:$0xff] }
 0x9f0   :  { %7253 = vmatprep.subr.bf16.mxu0 %v9920_v32 }
 0x9f3   :  { %7254 = vmatpush3.bf16.msra.mxu0 %v7782_v9 }
 0x9f4   :  { %7267 = vmatprep.subr.bf16.mxu0 %v9920_v32 }
 0xab9   :  { %v3019_v6 = vpop.f32.mrb[108].mxu0 }
 0xaba   :  { %v3020_v45 = vadd.f32 %v6518_v46, %v3019_v6  ;;  %v7233_v17 = vpop.f32.mrb[109].mxu0 }
 0xabb   :  { %v3022_v10 = vpop.f32.mrb[110].mxu0 }
 0xabc   :  { %v3029_v29 = vsel %vm434_vm6, %v3020_v45, %v9146_v36  ;;  %v7234_v22 = vpop.f32.mrb[111].mxu0  ;;  %v7787_v36 = vld [vmem:[%s9935_s29] sm:$0xff]   ;;  %v3211_v19 = vpack.c.bf16 %v3020_v45, %v3020_v45 }
 0xabd   :  { %v3038_v16 = vpack.c.bf16 %v3029_v29, %v3029_v29 }
 0xabf   :  { %7244 = vmatmul.mubr.msk.bf16.vlgmr.msra.gmra.mrb[92].mxu1 %vm3070_vm9, %v3038_v16  ;;  %7256 = vmatmul.mubr.msk.bf16.vlgmr.msra.gmra.mrb[112].mxu0 %vm3070_vm9, %v3038_v16 }
 0xac0   :  { %7260 = vmatpush3.bf16.msra.mxu1 %v7783_v52  ;;  %7268 = vmatpush3.bf16.msra.mxu0 %v7784_v8 }
 0xac1   :  { %7261 = vmatprep.subr.bf16.mxu1 %v9920_v32  ;;  %7269 = vmatprep.subr.bf16.mxu0 %v9920_v32 }
 0xac2   :  { %7263 = vmatprep.mubr.msk.bf16.mxu1 %vm8338_vm0, %v9920_v32  ;;  %7271 = vmatprep.mubr.msk.bf16.mxu0 %vm8338_vm0, %v9920_v32 }
 0xac4   :  { %7262 = vmatpush3.bf16.msra.mxu1 %v7785_v53  ;;  %7270 = vmatpush3.bf16.msra.mxu0 %v7786_v61 }
 0xac5   :  { %7275 = vmatprep.subr.bf16.mxu1 %v9920_v32  ;;  %7287 = vmatprep.subr.bf16.mxu0 %v9920_v32 }
 0xac7   :  { %7264 = vmatmul.mubr.msk.bf16.vlgmr.msra.gmra.mrb[96].mxu1 %vm434_vm6, %v3211_v19  ;;  %7272 = vmatmul.mubr.msk.bf16.vlgmr.msra.gmra.mrb[116].mxu0 %vm434_vm6, %v8856_v5  ;;  %v7791_v5 = vld [vmem:[%s9935_s29 + $0x10] sm:$0xff]  }
 0xac8   :  { %7276 = vmatpush3.bf16.msra.mxu1 %v7787_v36  ;;  %7288 = vmatpush3.bf16.msra.mxu0 %v7788_v43 }
 0xac9   :  { %7277 = vmatprep.subr.bf16.mxu1 %v9920_v32  ;;  %7289 = vmatprep.subr.bf16.mxu0 %v9920_v32 }
 0xaca   :  { %7283 = vmatprep.mubr.msk.bf16.mxu1 %vm8338_vm0, %v9920_v32  ;;  %7295 = vmatprep.mubr.msk.bf16.mxu0 %vm8338_vm0, %v9920_v32 }
 0xacc   :  { %7278 = vmatpush3.bf16.msra.mxu1 %v7789_v38  ;;  %7290 = vmatpush3.bf16.msra.mxu0 %v7790_v13 }
 0xacd   :  { %7279 = vmatprep.subr.bf16.mxu1 %v9920_v32  ;;  %7291 = vmatprep.subr.bf16.mxu0 %v9920_v32 }
 0xad0   :  { %7280 = vmatpush3.bf16.msra.mxu1 %v7791_v5  ;;  %7292 = vmatpush3.bf16.msra.mxu0 %v7792_v39  ;;  %v6553_v39 = vld [vmem:[%s9939_s6] ss:$0 sm:$0xff] }
 0xad1   :  { %7281 = vmatprep.subr.bf16.mxu1 %v9920_v32  ;;  %7293 = vmatprep.subr.bf16.mxu0 %v9920_v32 }
 0xad4   :  { %7282 = vmatpush3.bf16.msra.mxu1 %v7793_v30  ;;  %7294 = vmatpush3.bf16.msra.mxu0 %v7794_v4  ;;  %v6549_v4 = vld [vmem:[#allocation10] ss:$0 sm:$0xff] }
 0xad5   :  { %7299 = vmatprep.subr.bf16.mxu1 %v9920_v32  ;;  %7307 = vmatprep.subr.bf16.mxu0 %v9920_v32 }
 0xad7   :  { %7284 = vmatmul.mubr.msk.bf16.vlgmr.msra.gmra.mrb[100].mxu1 %vm3070_vm9, %v9153_v21  ;;  %7296 = vmatmul.mubr.msk.bf16.vlgmr.msra.gmra.mrb[120].mxu0 %vm3070_vm9, %v9153_v21  ;;  %v7918_v21 = vld [vmem:[%s9897_s20] sm:$0xff]  }
 0xad8   :  { %7300 = vmatpush3.bf16.msra.mxu1 %v7795_v54  ;;  %7308 = vmatpush3.bf16.msra.mxu0 %v7796_v58 }
 0xad9   :  { %7301 = vmatprep.subr.bf16.mxu1 %v9920_v32  ;;  %7309 = vmatprep.subr.bf16.mxu0 %v9920_v32 }
 0xada   :  { %7303 = vmatprep.mubr.msk.bf16.mxu1 %vm8338_vm0, %v9920_v32  ;;  %7311 = vmatprep.mubr.msk.bf16.mxu0 %vm8338_vm0, %v9920_v32 }
 0xadc   :  { %7302 = vmatpush3.bf16.msra.mxu1 %v7797_v41  ;;  %7310 = vmatpush3.bf16.msra.mxu0 %v7798_v40  ;;  %v6570_v40 = vld [vmem:[%s9939_s6 + $0x1] ss:$0 sm:$0xff] }
 0xadd   :  { %7321 = vmatprep.subr.bf16.mxu0 %v9920_v32 }
 0xadf   :  { %7304 = vmatmul.mubr.msk.bf16.vlgmr.msra.gmra.mrb[104].mxu1 %vm434_vm6, %v9150_v42  ;;  %7312 = vmatmul.mubr.msk.bf16.vlgmr.msra.gmra.mrb[124].mxu0 %vm434_vm6, %v8814_v34 }
 0xae0   :  { %7317 = vmatprep.mubr.msk.bf16.mxu1 %vm363_vm2, %v7918_v21  ;;  %7323 = vmatprep.mubr.msk.bf16.mxu0 %vm8338_vm0, %v9920_v32 }
 0xb92   :  { %v3108_v3 = vpop.f32.mrb[92].mxu1  ;;  %v3195_v44 = vpop.f32.mrb[112].mxu0 }
 0xb93   :  { %v3109_v9 = vadd.f32 %v6522_v33, %v3108_v3  ;;  %v7245_v46 = vpop.f32.mrb[93].mxu1  ;;  %v7257_v6 = vpop.f32.mrb[113].mxu0  ;;  %v3196_v42 = vadd.f32 %v6538_v62, %v3195_v44  ;;  %v6545_v3 = vld [vmem:[#allocation8] ss:$0 sm:$0xff] }
 0xb94   :  { %v3111_v45 = vpop.f32.mrb[94].mxu1  ;;  %v3198_v17 = vpop.f32.mrb[114].mxu0 }
 0xb95   :  { %v6528_v10 = vmul.f32 -1.442695, %v3109_v9  ;;  %v7246_v29 = vpop.f32.mrb[95].mxu1  ;;  %v7258_v22 = vpop.f32.mrb[115].mxu0  ;;  %v6544_v34 = vmul.f32 -1.442695, %v3196_v42 }
 0xb97   :  { %7836 = vpow2.f32 %v6528_v10 }
 0xb98   :  { %7838 = vpow2.f32 %v6544_v34 }
 0xb9a   :  { %v3268_v52 = vpop.f32.mrb[96].mxu1  ;;  %v3331_v8 = vpop.f32.mrb[116].mxu0 }
 0xb9b   :  { %v7265_v16 = vpop.f32.mrb[97].mxu1  ;;  %v7273_v53 = vpop.f32.mrb[117].mxu0  ;;  %v3332_v9 = vadd.f32 %v6549_v4, %v3331_v8  ;;  %v3269_v29 = vadd.f32 %v6545_v3, %v3268_v52 }
 0xb9c   :  { %v3271_v61 = vpop.f32.mrb[98].mxu1  ;;  %v3334_v36 = vpop.f32.mrb[118].mxu0 }
 0xb9d   :  { %v7266_v43 = vpop.f32.mrb[99].mxu1  ;;  %v7274_v19 = vpop.f32.mrb[119].mxu0 }
 0xba1   :  { %v7837_v38 = vpop.eup %7836 }
 0xba2   :  { %v3117_v13 = vadd.f32 1.0, %v7837_v38  ;;  %v7839_v5 = vpop.eup %7838 }
 0xba3   :  { %v3204_v30 = vadd.f32 1.0, %v7839_v5 }
 0xba4   :  { %7840 = vrcp.f32 %v3117_v13 }
 0xba5   :  { %7842 = vrcp.f32 %v3204_v30 }
 0xbaa   :  { %v3431_v54 = vpop.f32.mrb[100].mxu1  ;;  %v3525_v58 = vpop.f32.mrb[120].mxu0 }
 0xbab   :  { %v3432_v41 = vadd.f32 %v6553_v39, %v3431_v54  ;;  %v7285_v21 = vpop.f32.mrb[101].mxu1  ;;  %v7297_v33 = vpop.f32.mrb[121].mxu0  ;;  %v3526_v42 = vadd.f32 %v6570_v40, %v3525_v58 }
 0xbac   :  { %v3434_v62 = vpop.f32.mrb[102].mxu1  ;;  %v3528_v44 = vpop.f32.mrb[122].mxu0 }
 0xbad   :  { %v6559_v46 = vmul.f32 -1.442695, %v3432_v41  ;;  %v3435_v6 = vadd.f32 %v6553_v39, %v3434_v62  ;;  %v7286_v45 = vpop.f32.mrb[103].mxu1  ;;  %v7298_v17 = vpop.f32.mrb[123].mxu0  ;;  %v3529_v16 = vadd.f32 %v6570_v40, %v3528_v44  ;;  %v6576_v61 = vmul.f32 -1.442695, %v3526_v42 }
 0xbae   :  { %v7841_v10 = vpop.eup %7840  ;;  %v6578_v17 = vld [vmem:[%s9940_s12] ss:$0 sm:$0xff] }
 0xbaf   :  { %v3337_v22 = vmul.f32 %v7841_v10, %v3332_v9  ;;  %7844 = vpow2.f32 %v6559_v46  ;;  %v6560_v34 = vmul.f32 -1.442695, %v3435_v6  ;;  %v6577_v38 = vmul.f32 -1.442695, %v3529_v16  ;;  %v7843_v30 = vpop.eup %7842  ;;  %v6582_v46 = vld [vmem:[#allocation5] ss:$0 sm:$0xff] }
 0xbb0   :  { %v3340_v40 = vsub.f32 1.0, %v7843_v30  ;;  %v3342_v3 = vmul.f32 %v7843_v30, %v8844_v57 }
 0xbb1   :  { %v3338_v53 = vadd.f32 %v3337_v22, %v3269_v29  ;;  %7846 = vpow2.f32 %v6560_v34 }
 0xbb2   :  { %v3604_v36 = vpop.f32.mrb[104].mxu1  ;;  %v3671_v43 = vpop.f32.mrb[124].mxu0 }
 0xbb3   :  { %7848 = vtanh.f32 %v3338_v53  ;;  %v7305_v19 = vpop.f32.mrb[105].mxu1  ;;  %v7313_v8 = vpop.f32.mrb[125].mxu0  ;;  %v3672_v57 = vadd.f32 %v6582_v46, %v3671_v43  ;;  %v3605_v22 = vadd.f32 %v6578_v17, %v3604_v36 }
 0xbb4   :  { %v3607_v13 = vpop.f32.mrb[106].mxu1  ;;  %v3674_v5 = vpop.f32.mrb[126].mxu0  ;;  %7850 = vpow2.f32 %v6576_v61  ;;  %v7919_v61 = vld [vmem:[%s9903_s27] sm:$0xff]   ;;  %s9960_s27 = sld [smem:[#allocation64_spill]] }
 0xbb5   :  { %v7306_v39 = vpop.f32.mrb[107].mxu1  ;;  %v7314_v4 = vpop.f32.mrb[127].mxu0  ;;  %7852 = vpow2.f32 %v6577_v38  ;;  %v3675_v16 = vadd.f32 %v6582_v46, %v3674_v5  ;;  %v3608_v8 = vadd.f32 %v6578_v17, %v3607_v13  ;;  %v7928_v17 = vld [vmem:[%s9918_s26 + $0x88] sm:$0xff]  }
 0xbb6   :  { %v9941_v39 = vmov 0  }
 0xbb9   :  { %v7845_v52 = vpop.eup %7844 }
 0xbba   :  { %v3444_v54 = vadd.f32 1.0, %v7845_v52 }
 0xbbb   :  { %v7847_v58 = vpop.eup %7846 }
 0xbbc   :  { %7854 = vrcp.f32 %v3444_v54  ;;  %v3445_v41 = vadd.f32 1.0, %v7847_v58 }
 0xbbd   :  { %v7849_v21 = vpop.eup %7848 }
 0xbbe   :  { %7856 = vrcp.f32 %v3445_v41  ;;  %v3341_v33 = vmul.f32 %v7849_v21, %v3340_v40  ;;  %v7851_v62 = vpop.eup %7850 }
 0xbbf   :  { %v7853_v9 = vpop.eup %7852  ;;  %v3538_v45 = vadd.f32 1.0, %v7851_v62 }
 0xbc0   :  { %v9288_v44 = vadd.f32 %v3342_v3, %v3341_v33  ;;  %v3539_v42 = vadd.f32 1.0, %v7853_v9 }
 0xbc1   :  { %7858 = vrcp.f32 %v3538_v45 }
 0xbc2   :  { %4733 = vrot.lane.b32.xlu1 %v9288_v44, %s8340_s30  ;;  %v9294_v6 = vpack.c.bf16 %v9288_v44, %v9288_v44  ;;  %7860 = vrcp.f32 %v3539_v42  ;;  %v7930_v42 = vld [vmem:[%s9918_s26 + $0xd0] sm:$0xff]  }
 0xbc4   :  { %v3744_v10 = vsel %vm847_vm4, %v9294_v6, 0 }
 0xbc5   :  { %7322 = vmatpush3.bf16.msra.mxu0 %v3744_v10  ;;  %v7929_v10 = vld [vmem:[%s9918_s26 + $0x50] sm:$0xff]  }
 0xbc6   :  { %v7855_v29 = vpop.eup %7854  ;;  %3862 = vmatprep.subr.bf16.mxu0 %v8833_v50 }
 0xbc7   :  { %v3678_v34 = vmul.f32 %v7855_v29, %v3672_v57  ;;  %v7931_v57 = vld [vmem:[%s9918_s26 + $0x10] sm:$0xff]  }
 0xbc8   :  { %v7857_v53 = vpop.eup %7856  ;;  %7324 = vmatmul.mubr.msk.bf16.vlgmr.msra.gmra.mrb[128].mxu0 %vm840_vm5, %v7919_v61  ;;  %v7932_v29 = vld [vmem:[%s9918_s26 + $0x90] sm:$0xff]   ;;  %v7937_v61 = vld [vmem:[%s9918_s26 + $0x60] sm:$0xff]  }
 0xbc9   :  { %v3680_v19 = vadd.f32 %v3678_v34, %v3605_v22  ;;  %v3679_v38 = vmul.f32 %v7857_v53, %v3675_v16  ;;  %3863 = vmatpush1.bf16.msra.mxu0 %v8877_v31  ;;  %3894 = vmatprep.mubr.bf16.mxu0 %v9941_v39  ;;  %v7933_v22 = vld [vmem:[%s9918_s26 + $0x58] sm:$0xff]  }
 0xbca   :  { %3864 = vmatprep.subr.bf16.mxu0 %v8953_v2  ;;  %v7934_v34 = vld [vmem:[%s9918_s26 + $0xd8] sm:$0xff]  }
 0xbcb   :  { %7862 = vtanh.f32 %v3680_v19  ;;  %v3681_v50 = vadd.f32 %v3679_v38, %v3608_v8  ;;  %v7859_v36 = vpop.eup %7858  ;;  %v7935_v16 = vld [vmem:[%s9918_s26 + $0x18] sm:$0xff]   ;;  %v7938_v19 = vld [vmem:[%s9918_s26 + $0xe0] sm:$0xff]  }
 0xbcc   :  { %v7861_v43 = vpop.eup %7860  ;;  %v3684_v5 = vsub.f32 1.0, %v7859_v36  ;;  %v3688_v31 = vmul.f32 %v7859_v36, %v8797_v25  ;;  %v7920_v25 = vld [vmem:[%s9897_s20 + $0x8] sm:$0xff]   ;;  %v7936_v53 = vld [vmem:[%s9918_s26 + $0x98] sm:$0xff]   ;;  %v7939_v8 = vld [vmem:[%s9918_s26 + $0x20] sm:$0xff]  }
 0xbcd   :  { %7864 = vtanh.f32 %v3681_v50  ;;  %3865 = vmatpush1.bf16.msra.mxu0 %v8951_v1  ;;  %v3685_v13 = vsub.f32 1.0, %v7861_v43  ;;  %v3689_v2 = vmul.f32 %v7861_v43, %v8799_v26  ;;  %v7940_v38 = vld [vmem:[%s9918_s26 + $0xa0] sm:$0xff]   ;;  %v7942_v50 = vld [vmem:[%s9918_s26 + $0xe8] sm:$0xff]  }
 0xbce   :  { %3988 = vmatprep.subr.bf16.mxu0 %v8989_v15  ;;  %v7943_v36 = vld [vmem:[%s9918_s26 + $0x28] sm:$0xff]  }
 0xbcf   :  { %v7944_v43 = vld [vmem:[%s9918_s26 + $0xa8] sm:$0xff]  }
 0xbd5   :  { %v7863_v4 = vpop.eup %7862 }
 0xbd6   :  { %v3686_v30 = vmul.f32 %v7863_v4, %v3684_v5  ;;  %v7945_v5 = vld [vmem:[%s9918_s26 + $0x70] sm:$0xff]  }
 0xbd7   :  { %v7865_v52 = vpop.eup %7864  ;;  %v7946_v4 = vld [vmem:[%s9918_s26 + $0xf0] sm:$0xff]  }
 0xbd8   :  { %v3687_v54 = vmul.f32 %v7865_v52, %v3685_v13  ;;  %v9309_v58 = vadd.f32 %v3688_v31, %v3686_v30  ;;  %v7947_v13 = vld [vmem:[%s9918_s26 + $0x30] sm:$0xff]   ;;  %v7949_v31 = vld [vmem:[%s9918_s26 + $0x78] sm:$0xff]  }
 0xbd9   :  { %v7948_v30 = vld [vmem:[%s9918_s26 + $0xb0] sm:$0xff]   ;;  %v7950_v52 = vld [vmem:[%s9918_s26 + $0xf8] sm:$0xff]  }
 0xbda   :  { %v9311_v41 = vadd.f32 %v3689_v2, %v3687_v54  ;;  %v7951_v54 = vld [vmem:[%s9918_s26 + $0x38] sm:$0xff]  }
 0xbdb   :  { %v7952_v2 = vld [vmem:[%s9918_s26 + $0xb8] sm:$0xff]  }
 0xbdc   :  { %v7668_v1 = vpack.i.bf16 %v9311_v41, %v9309_v58  ;;  %v9317_v15 = vpack.c.bf16 %v9311_v41, %v9309_v58 }
 0xbde   :  { %7669 = vrot.lane.b32.xlu1 %v7668_v1, %s8340_s30  ;;  %7315 = vmatprep.subr.bf16.mxu1 %v9317_v15  ;;  %v7953_v1 = vld [vmem:[%s9918_s26 + $0x140] sm:$0xff]  }
 0xbdf   :  { %7316 = vmatpush3.bf16.msra.mxu1 %v9317_v15 }
 0xbe0   :  { %3799 = vmatprep.subr.bf16.mxu1 %v8819_v37 }
 0xbe2   :  { %7318 = vmatmul.mubr.msk.bf16.vlgmr.msra.gmra.mrb[108].mxu1 %vm363_vm2, %v7920_v25  ;;  %v7954_v25 = vld [vmem:[%s9918_s26 + $0x1c0] sm:$0xff]  }
 0xbe3   :  { %3800 = vmatpush1.bf16.msra.mxu1 %v8829_v49  ;;  %3831 = vmatprep.mubr.bf16.mxu1 %v9941_v39 }
 0xbe4   :  { %3801 = vmatprep.subr.bf16.mxu1 %v8946_v59  ;;  %v9942_v59 = vld [vmem:[#allocation86_spill] sm:$0xff] }
 0xbe7   :  { %3802 = vmatpush1.bf16.msra.mxu1 %v8949_v0  ;;  %v7921_v0 = vld [vmem:[%s9918_s26 + $0x40] sm:$0xff]  }
 0xbe8   :  { %3925 = vmatprep.subr.bf16.mxu1 %v8982_v7  ;;  %v7922_v7 = vld [vmem:[%s9918_s26 + $0xc0] sm:$0xff]  }
 0xc9b   :  { %v3780_v26 = vpop.f32.mrb[128].mxu0 }
 0xc9c   :  { %v7325_v40 = vpop.f32.mrb[129].mxu0 }
 0xc9d   :  { %v3783_v21 = vpop.f32.mrb[130].mxu0 }
 0xc9e   :  { %v9330_v33 = vpack.c.bf16 %v3783_v21, %v3780_v26  ;;  %v7326_v3 = vpop.f32.mrb[131].mxu0 }
 0xcb5   :  { %v7319_v37 = vpop.f32.mrb[108].mxu1 }
 0xcb6   :  { %v3727_v62 = vpop.f32.mrb[109].mxu1 }
 0xcb7   :  { %v7320_v9 = vpop.f32.mrb[110].mxu1 }
 0xcb8   :  { %v3788_v49 = vpack.c.bf16 %v7320_v9, %v7319_v37  ;;  %v3730_v46 = vpop.f32.mrb[111].mxu1 }
 0xcb9   :  { %v3787_v45 = vpack.c.bf16 %v3730_v46, %v3727_v62 }
 0xcbb   :  { %6589 = vmatmul.mubr.msk.bf16.vlgmr.msra.gmra.mrb[112].mxu1 %vm434_vm6, %v3787_v45  ;;  %6592 = vmatmul.mubr.msk.bf16.vlgmr.msra.gmra.mrb[132].mxu0 %vm434_vm6, %v3787_v45 }
 0xcbc   :  { %3841 = vmatprep.mubr.bf16.mxu1 %v9941_v39  ;;  %3904 = vmatprep.mubr.bf16.mxu0 %v9941_v39 }
 0xcbd   :  { %3926 = vmatpush1.bf16.msra.mxu1 %v8985_v14  ;;  %3989 = vmatpush1.bf16.msra.mxu0 %v8987_v12  ;;  %v7923_v14 = vld [vmem:[%s9918_s26] sm:$0xff]  }
 0xcbe   :  { %3927 = vmatprep.subr.bf16.mxu1 %v8997_v51  ;;  %3990 = vmatprep.subr.bf16.mxu0 %v8999_v56  ;;  %v7924_v12 = vld [vmem:[%s9918_s26 + $0x80] sm:$0xff]   ;;  %v7925_v51 = vld [vmem:[%s9918_s26 + $0x48] sm:$0xff]  }
 0xcbf   :  { %v7926_v56 = vld [vmem:[%s9918_s26 + $0xc8] sm:$0xff]  }
 0xcc1   :  { %3928 = vmatpush1.bf16.msra.mxu1 %v9007_v63  ;;  %3991 = vmatpush1.bf16.msra.mxu0 %v9942_v59  ;;  %v7927_v63 = vld [vmem:[%s9918_s26 + $0x8] sm:$0xff]  }
 0xcc2   :  { %6890 = vmatprep.subr.bf16.mxu1 %v7921_v0  ;;  %6924 = vmatprep.subr.bf16.mxu0 %v7922_v7 }
 0xcc3   :  { %6590 = vmatmul.mubr.msk.bf16.gmra.mrb[116].mxu1 %vm434_vm6, %v3788_v49  ;;  %6593 = vmatmul.mubr.msk.bf16.gmra.mrb[136].mxu0 %vm434_vm6, %v3788_v49 }
 0xcc4   :  { %3851 = vmatprep.mubr.bf16.mxu1 %v9941_v39  ;;  %3914 = vmatprep.mubr.bf16.mxu0 %v9941_v39 }
 0xccb   :  { %6591 = vmatmul.mubr.msk.bf16.gmra.mrb[120].mxu1 %vm434_vm6, %v9330_v33  ;;  %6594 = vmatmul.mubr.msk.bf16.gmra.mrb[140].mxu0 %vm434_vm6, %v9330_v33 }
 0xccc   :  { %3957 = vmatprep.mubr.bf16.mxu1 %v9941_v39  ;;  %4020 = vmatprep.mubr.bf16.mxu0 %v9941_v39 }
 0xcd3   :  { %6595 = vmatmul.mubr.msk.bf16.vlgmr.msra.gmra.mrb[124].mxu1 %vm434_vm6, %v3787_v45  ;;  %6598 = vmatmul.mubr.msk.bf16.vlgmr.msra.gmra.mrb[144].mxu0 %vm434_vm6, %v3787_v45 }
 0xcd4   :  { %3967 = vmatprep.mubr.bf16.mxu1 %v9941_v39  ;;  %4030 = vmatprep.mubr.bf16.mxu0 %v9941_v39 }
 0xcd5   :  { %6891 = vmatpush3.bf16.msra.mxu1 %v7923_v14  ;;  %6925 = vmatpush3.bf16.msra.mxu0 %v7924_v12  ;;  %v9943_v14 = vld [vmem:[#allocation73_spill] sm:$0xff] }
 0xcd6   :  { %6892 = vmatprep.subr.bf16.mxu1 %v7925_v51  ;;  %6926 = vmatprep.subr.bf16.mxu0 %v7926_v56  ;;  %v9944_v51 = vld [vmem:[#allocation74_spill] sm:$0xff] }
 0xcd9   :  { %6893 = vmatpush3.bf16.msra.mxu1 %v7927_v63  ;;  %6927 = vmatpush3.bf16.msra.mxu0 %v7928_v17 }
 0xcda   :  { %6894 = vmatprep.subr.bf16.mxu1 %v7929_v10  ;;  %6928 = vmatprep.subr.bf16.mxu0 %v7930_v42 }
 0xcdb   :  { %6596 = vmatmul.mubr.msk.bf16.gmra.mrb[128].mxu1 %vm434_vm6, %v3788_v49  ;;  %6599 = vmatmul.mubr.msk.bf16.gmra.mrb[148].mxu0 %vm434_vm6, %v3788_v49 }
 0xcdc   :  { %3977 = vmatprep.mubr.bf16.mxu1 %v9941_v39  ;;  %4040 = vmatprep.mubr.bf16.mxu0 %v9941_v39  ;;  %v7941_v39 = vld [vmem:[%s9918_s26 + $0x68] sm:$0xff]  }
 0xcdd   :  { %6895 = vmatpush3.bf16.msra.mxu1 %v7931_v57  ;;  %6929 = vmatpush3.bf16.msra.mxu0 %v7932_v29  ;;  %v7955_v57 = vld [vmem:[%s9918_s26 + $0x100] sm:$0xff]  }
 0xcde   :  { %6896 = vmatprep.subr.bf16.mxu1 %v7933_v22  ;;  %6930 = vmatprep.subr.bf16.mxu0 %v7934_v34  ;;  %v7956_v29 = vld [vmem:[%s9918_s26 + $0x180] sm:$0xff]  }
 0xce1   :  { %6897 = vmatpush3.bf16.msra.mxu1 %v7935_v16  ;;  %6931 = vmatpush3.bf16.msra.mxu0 %v7936_v53 }
 0xce2   :  { %6898 = vmatprep.subr.bf16.mxu1 %v7937_v61  ;;  %6932 = vmatprep.subr.bf16.mxu0 %v7938_v19  ;;  %v7957_v61 = vld [vmem:[%s9918_s26 + $0x148] sm:$0xff]  }
 0xce3   :  { %6597 = vmatmul.mubr.msk.bf16.gmra.mrb[132].mxu1 %vm434_vm6, %v9330_v33  ;;  %6600 = vmatmul.mubr.msk.bf16.gmra.mrb[152].mxu0 %vm434_vm6, %v9330_v33  ;;  %v7958_v19 = vld [vmem:[%s9918_s26 + $0x1c8] sm:$0xff]  }
 0xce5   :  { %6899 = vmatpush3.bf16.msra.mxu1 %v7939_v8  ;;  %6933 = vmatpush3.bf16.msra.mxu0 %v7940_v38 }
 0xce6   :  { %6900 = vmatprep.subr.bf16.mxu1 %v7941_v39  ;;  %6934 = vmatprep.subr.bf16.mxu0 %v7942_v50 }
 0xce9   :  { %6901 = vmatpush3.bf16.msra.mxu1 %v7943_v36  ;;  %6935 = vmatpush3.bf16.msra.mxu0 %v7944_v43  ;;  %v7959_v36 = vld [vmem:[%s9918_s26 + $0x108] sm:$0xff]  }
 0xcea   :  { %6902 = vmatprep.subr.bf16.mxu1 %v7945_v5  ;;  %6936 = vmatprep.subr.bf16.mxu0 %v7946_v4  ;;  %v7960_v43 = vld [vmem:[%s9918_s26 + $0x188] sm:$0xff]  }
 0xced   :  { %6903 = vmatpush3.bf16.msra.mxu1 %v7947_v13  ;;  %6937 = vmatpush3.bf16.msra.mxu0 %v7948_v30  ;;  %v7961_v13 = vld [vmem:[%s9918_s26 + $0x150] sm:$0xff]  }
 0xcee   :  { %6904 = vmatprep.subr.bf16.mxu1 %v7949_v31  ;;  %6938 = vmatprep.subr.bf16.mxu0 %v7950_v52  ;;  %v7962_v30 = vld [vmem:[%s9918_s26 + $0x1d0] sm:$0xff]  }
 0xcf1   :  { %6905 = vmatpush3.bf16.msra.mxu1 %v7951_v54  ;;  %6939 = vmatpush3.bf16.msra.mxu0 %v7952_v2  ;;  %v7963_v54 = vld [vmem:[%s9918_s26 + $0x110] sm:$0xff]  }
 0xcf2   :  { %6958 = vmatprep.subr.bf16.mxu1 %v7953_v1  ;;  %6992 = vmatprep.subr.bf16.mxu0 %v7954_v25 }
 0xd8e   :  { %v3833_v26 = vpop.f32.mrb[112].mxu1  ;;  %v3896_v40 = vpop.f32.mrb[132].mxu0 }
 0xd8f   :  { %v3835_v21 = vpop.f32.mrb[113].mxu1  ;;  %v3898_v33 = vpop.f32.mrb[133].mxu0 }
 0xd90   :  { %v3837_v3 = vpop.f32.mrb[114].mxu1  ;;  %v3900_v37 = vpop.f32.mrb[134].mxu0 }
 0xd91   :  { %v4051_v62 = vpack.c.bf16 %v3837_v3, %v3833_v26  ;;  %v4053_v9 = vpack.c.bf16 %v3900_v37, %v3896_v40  ;;  %v3839_v49 = vpop.f32.mrb[115].mxu1  ;;  %v3902_v46 = vpop.f32.mrb[135].mxu0 }
 0xd92   :  { %v4052_v45 = vpack.c.bf16 %v3839_v49, %v3835_v21  ;;  %v4054_v59 = vpack.c.bf16 %v3902_v46, %v3898_v33  ;;  %v7965_v21 = vld [vmem:[%s9918_s26 + $0x158] sm:$0xff]  }
 0xd93   :  { %v4075_v12 = vmul.bf16 %v4051_v62, %v9943_v14  ;;  %v4077_v56 = vmul.bf16 %v4053_v9, %v9944_v51  ;;  %v7966_v33 = vld [vmem:[%s9918_s26 + $0x1d8] sm:$0xff]   ;;  %v7972_v51 = vld [vmem:[%s9918_s26 + $0x1a0] sm:$0xff]  }
 0xd94   :  { %v4076_v0 = vmul.bf16 %v4052_v45, %v8864_v11  ;;  %v4078_v7 = vmul.bf16 %v4054_v59, %v8888_v48  ;;  %v7967_v49 = vld [vmem:[%s9918_s26 + $0x118] sm:$0xff]  }
 0xd95   :  { %v7968_v46 = vld [vmem:[%s9918_s26 + $0x198] sm:$0xff]  }
 0xd96   :  { %v3843_v63 = vpop.f32.mrb[116].mxu1  ;;  %v3906_v17 = vpop.f32.mrb[136].mxu0  ;;  %4131 = vmatprep.mubr.bf16.mxu1 %v4076_v0  ;;  %4188 = vmatprep.mubr.bf16.mxu0 %v4078_v7  ;;  %v7969_v0 = vld [vmem:[%s9918_s26 + $0x160] sm:$0xff]  }
 0xd97   :  { %v3845_v10 = vpop.f32.mrb[117].mxu1  ;;  %v3908_v42 = vpop.f32.mrb[137].mxu0  ;;  %4132 = vmatmul.mubr.bf16.vlgmr.msra.gmra.mrb[136].mxu1 %v4075_v12  ;;  %4189 = vmatmul.mubr.bf16.vlgmr.msra.gmra.mrb[156].mxu0 %v4077_v56  ;;  %v7970_v7 = vld [vmem:[%s9918_s26 + $0x1e0] sm:$0xff]  }
 0xd98   :  { %6959 = vmatpush3.bf16.msra.mxu1 %v7955_v57  ;;  %6993 = vmatpush3.bf16.msra.mxu0 %v7956_v29  ;;  %v3847_v11 = vpop.f32.mrb[118].mxu1  ;;  %v3910_v48 = vpop.f32.mrb[138].mxu0  ;;  %v7973_v57 = vld [vmem:[%s9918_s26 + $0x168] sm:$0xff]  }
 0xd99   :  { %v4059_v22 = vpack.c.bf16 %v3847_v11, %v3843_v63  ;;  %v4061_v34 = vpack.c.bf16 %v3910_v48, %v3906_v17  ;;  %v3849_v16 = vpop.f32.mrb[119].mxu1  ;;  %v3912_v53 = vpop.f32.mrb[139].mxu0  ;;  %6960 = vmatprep.subr.bf16.mxu1 %v7957_v61  ;;  %6994 = vmatprep.subr.bf16.mxu0 %v7958_v19  ;;  %v7974_v29 = vld [vmem:[%s9918_s26 + $0x1e8] sm:$0xff]   ;;  %v7977_v19 = vld [vmem:[%s9918_s26 + $0x170] sm:$0xff]  }
 0xd9a   :  { %v4060_v8 = vpack.c.bf16 %v3849_v16, %v3845_v10  ;;  %v4062_v38 = vpack.c.bf16 %v3912_v53, %v3908_v42  ;;  %v7975_v53 = vld [vmem:[%s9918_s26 + $0x128] sm:$0xff]  }
 0xd9b   :  { %v4083_v5 = vmul.bf16 %v4059_v22, %v8871_v23  ;;  %v4085_v4 = vmul.bf16 %v4061_v34, %v8900_v35  ;;  %v7964_v23 = vld [vmem:[%s9918_s26 + $0x190] sm:$0xff]   ;;  %v9945_v34 = vld [vmem:[#allocation76_spill] sm:$0xff]  ;;  %v7976_v61 = vld [vmem:[%s9918_s26 + $0x1a8] sm:$0xff]  }
 0xd9c   :  { %v4084_v39 = vmul.bf16 %v4060_v8, %v8873_v24  ;;  %v4086_v50 = vmul.bf16 %v4062_v38, %v8904_v60  ;;  %6961 = vmatpush3.bf16.msra.mxu1 %v7959_v36  ;;  %6995 = vmatpush3.bf16.msra.mxu0 %v7960_v43  ;;  %v7978_v8 = vld [vmem:[%s9918_s26 + $0x1f0] sm:$0xff]  }
 0xd9d   :  { %6962 = vmatprep.subr.bf16.mxu1 %v7961_v13  ;;  %6996 = vmatprep.subr.bf16.mxu0 %v7962_v30  ;;  %v7979_v36 = vld [vmem:[%s9918_s26 + $0x130] sm:$0xff]  }
 0xd9e   :  { %v3853_v31 = vpop.f32.mrb[120].mxu1  ;;  %v3916_v52 = vpop.f32.mrb[140].mxu0  ;;  %4139 = vmatprep.mubr.bf16.mxu1 %v4084_v39  ;;  %4196 = vmatprep.mubr.bf16.mxu0 %v4086_v50  ;;  %v7980_v43 = vld [vmem:[%s9918_s26 + $0x1b0] sm:$0xff]  }
 0xd9f   :  { %v3855_v24 = vpop.f32.mrb[121].mxu1  ;;  %v3918_v60 = vpop.f32.mrb[141].mxu0  ;;  %4140 = vmatmul.mubr.bf16.gmra.mrb[140].mxu1 %v4083_v5  ;;  %4197 = vmatmul.mubr.bf16.gmra.mrb[160].mxu0 %v4085_v4 }
 0xda0   :  { %6963 = vmatpush3.bf16.msra.mxu1 %v7963_v54  ;;  %6997 = vmatpush3.bf16.msra.mxu0 %v7964_v23  ;;  %v3857_v35 = vpop.f32.mrb[122].mxu1  ;;  %v3920_v2 = vpop.f32.mrb[142].mxu0 }
 0xda1   :  { %v4067_v1 = vpack.c.bf16 %v3857_v35, %v3853_v31  ;;  %v4069_v25 = vpack.c.bf16 %v3920_v2, %v3916_v52  ;;  %v3859_v26 = vpop.f32.mrb[123].mxu1  ;;  %v3922_v40 = vpop.f32.mrb[143].mxu0  ;;  %6964 = vmatprep.subr.bf16.mxu1 %v7965_v21  ;;  %6998 = vmatprep.subr.bf16.mxu0 %v7966_v33  ;;  %v9946_v35 = vld [vmem:[#allocation80_spill] sm:$0xff]  ;;  %v9948_v21 = vld [vmem:[#allocation77_spill] sm:$0xff] }
 0xda2   :  { %v4068_v3 = vpack.c.bf16 %v3859_v26, %v3855_v24  ;;  %v4070_v37 = vpack.c.bf16 %v3922_v40, %v3918_v60  ;;  %v7981_v24 = vld [vmem:[%s9918_s26 + $0x178] sm:$0xff]  }
 0xda3   :  { %v4091_v45 = vmul.bf16 %v4067_v1, %v8935_v55  ;;  %v4093_v59 = vmul.bf16 %v4069_v25, %v8965_v18  ;;  %v7971_v55 = vld [vmem:[%s9918_s26 + $0x120] sm:$0xff]   ;;  %v7982_v60 = vld [vmem:[%s9918_s26 + $0x1f8] sm:$0xff]  }
 0xda4   :  { %v4092_v62 = vmul.bf16 %v4068_v3, %v8937_v28  ;;  %v4094_v9 = vmul.bf16 %v4070_v37, %v8970_v27  ;;  %6965 = vmatpush3.bf16.msra.mxu1 %v7967_v49  ;;  %6999 = vmatpush3.bf16.msra.mxu0 %v7968_v46  ;;  %v9947_v1 = vld [vmem:[#allocation81_spill] sm:$0xff]  ;;  %v7983_v26 = vld [vmem:[%s9918_s26 + $0x138] sm:$0xff]  }
 0xda5   :  { %6966 = vmatprep.subr.bf16.mxu1 %v7969_v0  ;;  %7000 = vmatprep.subr.bf16.mxu0 %v7970_v7  ;;  %v7984_v40 = vld [vmem:[%s9918_s26 + $0x1b8] sm:$0xff]   ;;  %s9963_s26 = sld [smem:[#allocation66_spill]] }
 0xda6   :  { %v9426_v14 = vpop.f32.mrb[124].mxu1  ;;  %v9428_v12 = vpop.f32.mrb[144].mxu0  ;;  %4147 = vmatprep.mubr.bf16.mxu1 %v4092_v62  ;;  %4204 = vmatprep.mubr.bf16.mxu0 %v4094_v9  ;;  %v9949_v3 = vld [vmem:[#allocation75_spill] sm:$0xff] }
 0xda7   :  { %v3961_v28 = vpop.f32.mrb[125].mxu1  ;;  %v4024_v27 = vpop.f32.mrb[145].mxu0  ;;  %4148 = vmatmul.mubr.bf16.gmra.mrb[144].mxu1 %v4091_v45  ;;  %4205 = vmatmul.mubr.bf16.gmra.mrb[164].mxu0 %v4093_v59 }
 0xda8   :  { %6967 = vmatpush3.bf16.msra.mxu1 %v7971_v55  ;;  %7001 = vmatpush3.bf16.msra.mxu0 %v7972_v51  ;;  %v3963_v18 = vpop.f32.mrb[126].mxu1  ;;  %v4026_v56 = vpop.f32.mrb[146].mxu0  ;;  %v9950_v55 = vld [vmem:[#allocation83_spill] sm:$0xff] }
 0xda9   :  { %v4055_v63 = vpack.c.bf16 %v3963_v18, %v9426_v14  ;;  %v4057_v17 = vpack.c.bf16 %v4026_v56, %v9428_v12  ;;  %v3965_v10 = vpop.f32.mrb[127].mxu1  ;;  %v4028_v42 = vpop.f32.mrb[147].mxu0  ;;  %6968 = vmatprep.subr.bf16.mxu1 %v7973_v57  ;;  %7002 = vmatprep.subr.bf16.mxu0 %v7974_v29  ;;  %v9951_v18 = vld [vmem:[#allocation85_spill] sm:$0xff]  ;;  %v9954_v57 = vld [vmem:[#allocation82_spill] sm:$0xff] }
 0xdaa   :  { %v4056_v11 = vpack.c.bf16 %v3965_v10, %v3961_v28  ;;  %v4058_v48 = vpack.c.bf16 %v4028_v42, %v4024_v27  ;;  %v9953_v10 = vld [vmem:[#allocation79_spill] sm:$0xff] }
 0xdab   :  { %v4079_v33 = vmul.bf16 %v4055_v63, %v9948_v21  ;;  %v4081_v37 = vmul.bf16 %v4057_v17, %v9949_v3  ;;  %v9952_v63 = vld [vmem:[#allocation78_spill] sm:$0xff] }
 0xdac   :  { %v4080_v22 = vmul.bf16 %v4056_v11, %v8916_v47  ;;  %v4082_v16 = vmul.bf16 %v4058_v48, %v9945_v34  ;;  %6969 = vmatpush3.bf16.msra.mxu1 %v7975_v53  ;;  %7003 = vmatpush3.bf16.msra.mxu0 %v7976_v61  ;;  %v9955_v11 = vld [vmem:[#allocation84_spill] sm:$0xff] }
 0xdad   :  { %6970 = vmatprep.subr.bf16.mxu1 %v7977_v19  ;;  %7004 = vmatprep.subr.bf16.mxu0 %v7978_v8 }
 0xdae   :  { %v3969_v38 = vpop.f32.mrb[128].mxu1  ;;  %v4032_v39 = vpop.f32.mrb[148].mxu0  ;;  %4245 = vmatprep.mubr.bf16.mxu1 %v4080_v22  ;;  %4302 = vmatprep.mubr.bf16.mxu0 %v4082_v16 }
 0xdaf   :  { %v3971_v50 = vpop.f32.mrb[129].mxu1  ;;  %v4034_v47 = vpop.f32.mrb[149].mxu0 }
 0xdb0   :  { %6971 = vmatpush3.bf16.msra.mxu1 %v7979_v36  ;;  %7005 = vmatpush3.bf16.msra.mxu0 %v7980_v43  ;;  %v3973_v5 = vpop.f32.mrb[130].mxu1  ;;  %v4036_v4 = vpop.f32.mrb[150].mxu0 }
 0xdb1   :  { %v4063_v13 = vpack.c.bf16 %v3973_v5, %v3969_v38  ;;  %v4065_v30 = vpack.c.bf16 %v4036_v4, %v4032_v39  ;;  %v3975_v31 = vpop.f32.mrb[131].mxu1  ;;  %v4038_v52 = vpop.f32.mrb[151].mxu0  ;;  %6972 = vmatprep.subr.bf16.mxu1 %v7981_v24  ;;  %7006 = vmatprep.subr.bf16.mxu0 %v7982_v60 }
 0xdb2   :  { %v4064_v54 = vpack.c.bf16 %v3975_v31, %v3971_v50  ;;  %v4066_v23 = vpack.c.bf16 %v4038_v52, %v4034_v47 }
 0xdb3   :  { %v4087_v17 = vmul.bf16 %v4063_v13, %v9952_v63  ;;  %v4089_v42 = vmul.bf16 %v4065_v30, %v9953_v10 }
 0xdb4   :  { %v4088_v2 = vmul.bf16 %v4064_v54, %v9946_v35  ;;  %v4090_v25 = vmul.bf16 %v4066_v23, %v9947_v1  ;;  %6973 = vmatpush3.bf16.msra.mxu1 %v7983_v26  ;;  %7007 = vmatpush3.bf16.msra.mxu0 %v7984_v40 }
 0xdb5   :  { %7327 = vmatprep.subr.bf16.mxu1 %v9920_v32  ;;  %7335 = vmatprep.subr.bf16.mxu0 %v9920_v32 }
 0xdb6   :  { %v3979_v62 = vpop.f32.mrb[132].mxu1  ;;  %v4042_v9 = vpop.f32.mrb[152].mxu0 }
 0xdb7   :  { %4246 = vmatmul.mubr.bf16.vlgmr.msra.gmra.mrb[148].mxu1 %v4079_v33  ;;  %4303 = vmatmul.mubr.bf16.vlgmr.msra.gmra.mrb[168].mxu0 %v4081_v37  ;;  %v3981_v49 = vpop.f32.mrb[133].mxu1  ;;  %v4044_v46 = vpop.f32.mrb[153].mxu0 }
 0xdb8   :  { %4253 = vmatprep.mubr.bf16.mxu1 %v4088_v2  ;;  %4310 = vmatprep.mubr.bf16.mxu0 %v4090_v25  ;;  %v3983_v45 = vpop.f32.mrb[134].mxu1  ;;  %v4046_v59 = vpop.f32.mrb[154].mxu0 }
 0xdb9   :  { %v4071_v0 = vpack.c.bf16 %v3983_v45, %v3979_v62  ;;  %v4073_v7 = vpack.c.bf16 %v4046_v59, %v4042_v9  ;;  %v3985_v14 = vpop.f32.mrb[135].mxu1  ;;  %v4048_v12 = vpop.f32.mrb[155].mxu0 }
 0xdba   :  { %v4072_v28 = vpack.c.bf16 %v3985_v14, %v3981_v49  ;;  %v4074_v27 = vpack.c.bf16 %v4048_v12, %v4044_v46 }
 0xdbb   :  { %v4095_v29 = vmul.bf16 %v4071_v0, %v9954_v57  ;;  %v4097_v48 = vmul.bf16 %v4073_v7, %v9955_v11 }
 0xdbc   :  { %v4096_v51 = vmul.bf16 %v4072_v28, %v9950_v55  ;;  %v4098_v56 = vmul.bf16 %v4074_v27, %v9951_v18 }
 0xdbf   :  { %4254 = vmatmul.mubr.bf16.gmra.mrb[152].mxu1 %v4087_v17  ;;  %4311 = vmatmul.mubr.bf16.gmra.mrb[172].mxu0 %v4089_v42 }
 0xdc0   :  { %4261 = vmatprep.mubr.bf16.mxu1 %v4096_v51  ;;  %4318 = vmatprep.mubr.bf16.mxu0 %v4098_v56 }
 0xdc7   :  { %4262 = vmatmul.mubr.bf16.gmra.mrb[156].mxu1 %v4095_v29  ;;  %4319 = vmatmul.mubr.bf16.gmra.mrb[176].mxu0 %v4097_v48 }
 0xdc8   :  { %7331 = vmatprep.mubr.msk.bf16.mxu1 %vm8338_vm0, %v9920_v32  ;;  %7337 = vmatprep.mubr.msk.bf16.mxu0 %vm8338_vm0, %v9920_v32 }
 0xe6a   :  { %v6906_v22 = vpop.f32.mrb[136].mxu1  ;;  %v6940_v34 = vpop.f32.mrb[156].mxu0 }
 0xe6b   :  { %v6907_v16 = vpop.f32.mrb[137].mxu1  ;;  %v6941_v53 = vpop.f32.mrb[157].mxu0 }
 0xe6c   :  { %v6908_v61 = vadd.f32 %v6907_v16, %v6906_v22  ;;  %v6942_v19 = vadd.f32 %v6941_v53, %v6940_v34  ;;  %v6909_v8 = vpop.f32.mrb[138].mxu1  ;;  %v6943_v38 = vpop.f32.mrb[158].mxu0 }
 0xe6d   :  { %v6910_v39 = vpop.f32.mrb[139].mxu1  ;;  %v6944_v50 = vpop.f32.mrb[159].mxu0 }
 0xe6e   :  { %v4191_v47 = vadd.f32 %v6942_v19, %v6908_v61  ;;  %v6911_v36 = vadd.f32 %v6910_v39, %v6909_v8  ;;  %v6945_v43 = vadd.f32 %v6944_v50, %v6943_v38 }
 0xe70   :  { %v4194_v5 = vadd.f32 %v6945_v43, %v6911_v36 }
 0xe72   :  { %v6912_v4 = vpop.f32.mrb[140].mxu1  ;;  %v6946_v13 = vpop.f32.mrb[160].mxu0 }
 0xe73   :  { %v6913_v30 = vpop.f32.mrb[141].mxu1  ;;  %v6947_v31 = vpop.f32.mrb[161].mxu0 }
 0xe74   :  { %v6914_v52 = vadd.f32 %v6913_v30, %v6912_v4  ;;  %v6948_v24 = vadd.f32 %v6947_v31, %v6946_v13  ;;  %v6915_v60 = vpop.f32.mrb[142].mxu1  ;;  %v6949_v54 = vpop.f32.mrb[162].mxu0 }
 0xe75   :  { %v6916_v23 = vpop.f32.mrb[143].mxu1  ;;  %v6950_v35 = vpop.f32.mrb[163].mxu0 }
 0xe76   :  { %v4199_v2 = vadd.f32 %v6948_v24, %v6914_v52  ;;  %v6917_v1 = vadd.f32 %v6916_v23, %v6915_v60  ;;  %v6951_v25 = vadd.f32 %v6950_v35, %v6949_v54 }
 0xe78   :  { %v4202_v26 = vadd.f32 %v6951_v25, %v6917_v1 }
 0xe7a   :  { %v6918_v40 = vpop.f32.mrb[144].mxu1  ;;  %v6952_v21 = vpop.f32.mrb[164].mxu0 }
 0xe7b   :  { %v6919_v33 = vpop.f32.mrb[145].mxu1  ;;  %v6953_v3 = vpop.f32.mrb[165].mxu0 }
 0xe7c   :  { %v6920_v37 = vadd.f32 %v6919_v33, %v6918_v40  ;;  %v6954_v62 = vadd.f32 %v6953_v3, %v6952_v21  ;;  %v6921_v9 = vpop.f32.mrb[146].mxu1  ;;  %v6955_v49 = vpop.f32.mrb[166].mxu0 }
 0xe7d   :  { %v6922_v46 = vpop.f32.mrb[147].mxu1  ;;  %v6956_v45 = vpop.f32.mrb[167].mxu0 }
 0xe7e   :  { %v4207_v59 = vadd.f32 %v6954_v62, %v6920_v37  ;;  %v6923_v0 = vadd.f32 %v6922_v46, %v6921_v9  ;;  %v6957_v7 = vadd.f32 %v6956_v45, %v6955_v49  ;;  %v7985_v9 = vld [vmem:[%s9921_s13] sm:$0xff]   ;;  %s9964_s13 = sld [smem:[#allocation69_spill]] }
 0xe7f   :  { %v7986_v45 = vld [vmem:[%s9922_s1] sm:$0xf]  ;;  %s9965_s1 = sld [smem:[#allocation27_spill]] }
 0xe80   :  { %v4210_v14 = vadd.f32 %v6957_v7, %v6923_v0  ;;  %v7988_v0 = vld [vmem:[%s9923_s0 + $0x8] sm:$0xff]   ;;  %v9479_v7 = vpop.permute.xlu1 %4733 }
 0xe8a   :  { %v6974_v12 = vpop.f32.mrb[148].mxu1  ;;  %v7008_v28 = vpop.f32.mrb[168].mxu0 }
 0xe8b   :  { %v6975_v27 = vpop.f32.mrb[149].mxu1  ;;  %v7009_v55 = vpop.f32.mrb[169].mxu0 }
 0xe8c   :  { %v6976_v51 = vadd.f32 %v6975_v27, %v6974_v12  ;;  %v7010_v18 = vadd.f32 %v7009_v55, %v7008_v28  ;;  %v6977_v56 = vpop.f32.mrb[150].mxu1  ;;  %v7011_v63 = vpop.f32.mrb[170].mxu0  ;;  %v7989_v28 = vld [vmem:[%s9924_s8] ss:$0 sm:$0xff]  ;;  %s8341_s8 = smov 64  }
 0xe8d   :  { %v6978_v17 = vpop.f32.mrb[151].mxu1  ;;  %v7012_v10 = vpop.f32.mrb[171].mxu0 }
 0xe8e   :  { %v4248_v42 = vadd.f32 %v6976_v51, %v4191_v47  ;;  %v6979_v57 = vadd.f32 %v6978_v17, %v6977_v56  ;;  %v7013_v29 = vadd.f32 %v7012_v10, %v7011_v63 }
 0xe90   :  { %v4305_v11 = vadd.f32 %v7010_v18, %v4248_v42  ;;  %v4251_v48 = vadd.f32 %v6979_v57, %v4194_v5 }
 0xe92   :  { %v4308_v22 = vadd.f32 %v7013_v29, %v4251_v48  ;;  %v6980_v34 = vpop.f32.mrb[152].mxu1  ;;  %v7014_v16 = vpop.f32.mrb[172].mxu0 }
 0xe93   :  { %v6981_v53 = vpop.f32.mrb[153].mxu1  ;;  %v7015_v61 = vpop.f32.mrb[173].mxu0 }
 0xe94   :  { %v4327_v19 = vpack.c.bf16 %v4308_v22, %v4305_v11  ;;  %v6982_v8 = vadd.f32 %v6981_v53, %v6980_v34  ;;  %v7016_v38 = vadd.f32 %v7015_v61, %v7014_v16  ;;  %v6983_v39 = vpop.f32.mrb[154].mxu1  ;;  %v7017_v50 = vpop.f32.mrb[174].mxu0  ;;  %v7990_v22 = vld [vmem:[%s9925_s23] sm:$0xf]  ;;  %v7992_v61 = vld [vmem:[%s9926_s28 + $0x8] sm:$0xff]   ;;  %s8342_s23 = smov 96  }
 0xe95   :  { %v6984_v36 = vpop.f32.mrb[155].mxu1  ;;  %v7018_v43 = vpop.f32.mrb[175].mxu0  ;;  %v7991_v16 = vld [vmem:[%s9926_s28] sm:$0xff]  }
 0xe96   :  { %v4256_v4 = vadd.f32 %v6982_v8, %v4199_v2  ;;  %v6985_v13 = vadd.f32 %v6984_v36, %v6983_v39  ;;  %v7019_v30 = vadd.f32 %v7018_v43, %v7017_v50  ;;  %7328 = vmatpush3.bf16.msra.mxu1 %v4327_v19  ;;  %v7993_v19 = vld [vmem:[%s9927_s2] ss:$0 sm:$0xff] }
 0xe97   :  { %7329 = vmatprep.subr.bf16.mxu1 %v9920_v32 }
 0xe98   :  { %v4313_v47 = vadd.f32 %v7016_v38, %v4256_v4  ;;  %v4259_v5 = vadd.f32 %v6985_v13, %v4202_v26  ;;  %v7994_v4 = vld [vmem:[%s9928_s24] sm:$0xff]  }
 0xe99   :  { %v7995_v13 = vld [vmem:[%s9929_s25] sm:$0xff]  }
 0xe9a   :  { %v4316_v31 = vadd.f32 %v7019_v30, %v4259_v5  ;;  %v6986_v52 = vpop.f32.mrb[156].mxu1  ;;  %v7020_v24 = vpop.f32.mrb[176].mxu0  ;;  %v7996_v30 = vld [vmem:[%s9928_s24 + $0x8] sm:$0xff]  }
 0xe9b   :  { %v6987_v60 = vpop.f32.mrb[157].mxu1  ;;  %v7021_v54 = vpop.f32.mrb[177].mxu0 }
 0xe9c   :  { %v4328_v23 = vpack.c.bf16 %v4316_v31, %v4313_v47  ;;  %v6988_v35 = vadd.f32 %v6987_v60, %v6986_v52  ;;  %v7022_v1 = vadd.f32 %v7021_v54, %v7020_v24  ;;  %v6989_v25 = vpop.f32.mrb[158].mxu1  ;;  %v7023_v40 = vpop.f32.mrb[178].mxu0  ;;  %v7997_v47 = vld [vmem:[%s9929_s25 + $0x8] sm:$0xff]  }
 0xe9d   :  { %v6990_v21 = vpop.f32.mrb[159].mxu1  ;;  %v7024_v2 = vpop.f32.mrb[179].mxu0 }
 0xe9e   :  { %v4264_v33 = vadd.f32 %v6988_v35, %v4207_v59  ;;  %v6991_v3 = vadd.f32 %v6990_v21, %v6989_v25  ;;  %v7025_v37 = vadd.f32 %v7024_v2, %v7023_v40  ;;  %7330 = vmatpush3.bf16.msra.mxu1 %v4328_v23  ;;  %v7987_v59 = vld [vmem:[%s9923_s0] sm:$0xff]   ;;  %s9966_s0 = sld [smem:[#allocation70_spill]] }
 0xe9f   :  { %7341 = vmatprep.subr.bf16.mxu1 %v9920_v32 }
 0xea0   :  { %v4321_v26 = vadd.f32 %v7022_v1, %v4264_v33  ;;  %v4267_v62 = vadd.f32 %v6991_v3, %v4210_v14  ;;  %v7670_v14 = vpop.permute.xlu1 %7669  ;;  %v7998_v3 = vld [vmem:[%s9931_s19] sm:$0xff]  }
 0xea1   :  { %7332 = vmatmul.mubr.msk.bf16.vlgmr.msra.gmra.mrb[160].mxu1 %vm434_vm6, %v7985_v9  ;;  %v7672_v18 = vunpack.i.h.bf16 %v7670_v14  ;;  %v7671_v56 = vunpack.i.l.bf16 %v7670_v14 }
 0xea2   :  { %v4324_v49 = vadd.f32 %v7025_v37, %v4267_v62  ;;  %7343 = vmatprep.mubr.msk.bf16.mxu1 %vm8338_vm0, %v9920_v32  ;;  %v7999_v37 = vld [vmem:[%s9931_s19 + $0x8] sm:$0xff]  }
 0xea4   :  { %v4370_v46 = vpack.c.bf16 %v4324_v49, %v4321_v26 }
 0xea6   :  { %7336 = vmatpush3.bf16.msra.mxu0 %v4370_v46 }
 0xea7   :  { %7347 = vmatprep.subr.bf16.mxu0 %v9920_v32 }
 0xea9   :  { %7338 = vmatmul.mubr.msk.bf16.vlgmr.msra.gmra.mrb[180].mxu0 %vm363_vm2, %v7986_v45 }
 0xeaa   :  { %7348 = vmatpush3.bf16.msra.mxu0 %v7987_v59  ;;  %7351 = vmatprep.mubr.msk.bf16.mxu0 %vm8338_vm0, %v9920_v32 }
 0xeab   :  { %7349 = vmatprep.subr.bf16.mxu0 %v9920_v32 }
 0xeae   :  { %7350 = vmatpush3.bf16.msra.mxu0 %v7988_v0 }
 0xeaf   :  { %7363 = vmatprep.subr.bf16.mxu0 %v9920_v32 }
 0xf74   :  { %v4363_v12 = vpop.f32.mrb[160].mxu1 }
 0xf75   :  { %v4364_v27 = vadd.f32 %v7989_v28, %v4363_v12  ;;  %v7333_v55 = vpop.f32.mrb[161].mxu1 }
 0xf76   :  { %v4366_v51 = vpop.f32.mrb[162].mxu1 }
 0xf77   :  { %v4367_v63 = vadd.f32 %v7989_v28, %v4366_v51  ;;  %v7334_v17 = vpop.f32.mrb[163].mxu1  ;;  %v4932_v10 = vsel %vm434_vm6, %v4364_v27, %v7671_v56 }
 0xf79   :  { %v9483_v42 = vpack.c.bf16 %v4367_v63, %v4364_v27  ;;  %v4933_v57 = vsel %vm434_vm6, %v4367_v63, %v7672_v18 }
 0xf7a   :  { %v9486_v29 = vpack.c.bf16 %v4933_v57, %v4932_v10  ;;  %v8000_v10 = vld [vmem:[%s9932_s3] sm:$0xff]   ;;  %v8001_v57 = vld [vmem:[%s9932_s3 + $0x8] sm:$0xff]  }
 0xf7b   :  { %7342 = vmatpush3.bf16.msra.mxu1 %v9483_v42 }
 0xf7c   :  { %v4405_v11 = vpop.f32.mrb[180].mxu0  ;;  %7355 = vmatprep.subr.bf16.mxu1 %v9920_v32 }
 0xf7d   :  { %v7339_v48 = vpop.f32.mrb[181].mxu0  ;;  %v4406_v8 = vadd.f32 %v7993_v19, %v4405_v11  ;;  %v8002_v11 = vld [vmem:[%s9932_s3 + $0x10] sm:$0xff]  }
 0xf7e   :  { %7344 = vmatmul.mubr.msk.bf16.vlgmr.msra.gmra.mrb[164].mxu1 %vm363_vm2, %v7990_v22  ;;  %v4408_v34 = vpop.f32.mrb[182].mxu0  ;;  %v8003_v48 = vld [vmem:[%s9932_s3 + $0x18] sm:$0xff]  }
 0xf7f   :  { %7356 = vmatpush3.bf16.msra.mxu1 %v7991_v16  ;;  %v7340_v53 = vpop.f32.mrb[183].mxu0  ;;  %7359 = vmatprep.mubr.msk.bf16.mxu1 %vm8338_vm0, %v9920_v32 }
 0xf80   :  { %7357 = vmatprep.subr.bf16.mxu1 %v9920_v32 }
 0xf83   :  { %7358 = vmatpush3.bf16.msra.mxu1 %v7992_v61 }
 0xf84   :  { %7371 = vmatprep.subr.bf16.mxu1 %v9920_v32 }
0x1051   :  { %v4446_v38 = vpop.f32.mrb[164].mxu1 }
0x1052   :  { %v4452_v39 = vpack.c.bf16 %v4406_v8, %v4446_v38  ;;  %v7345_v50 = vpop.f32.mrb[165].mxu1 }
0x1053   :  { %v4449_v36 = vpop.f32.mrb[166].mxu1  ;;  %v8005_v50 = vld [vmem:[%s9932_s3 + $0x28] sm:$0xff]  }
0x1054   :  { %7352 = vmatmul.mubr.msk.bf16.vlgmr.msra.gmra.mrb[184].mxu0 %vm434_vm6, %v4452_v39  ;;  %v7346_v43 = vpop.f32.mrb[167].mxu1  ;;  %7360 = vmatmul.mubr.msk.bf16.vlgmr.msra.gmra.mrb[168].mxu1 %vm434_vm6, %v4452_v39  ;;  %v8004_v39 = vld [vmem:[%s9932_s3 + $0x20] sm:$0xff]   ;;  %v8006_v36 = vld [vmem:[%s9932_s3 + $0x30] sm:$0xff]  }
0x1055   :  { %7364 = vmatpush3.bf16.msra.mxu0 %v7994_v4  ;;  %7367 = vmatprep.mubr.msk.bf16.mxu0 %vm8338_vm0, %v9920_v32  ;;  %v8007_v43 = vld [vmem:[%s9932_s3 + $0x38] sm:$0xff]  }
0x1056   :  { %7365 = vmatprep.subr.bf16.mxu0 %v9920_v32  ;;  %7372 = vmatpush3.bf16.msra.mxu1 %v7995_v13  ;;  %v8008_v13 = vld [vmem:[#allocation11] ss:$0 sm:$0xff] }
0x1057   :  { %7373 = vmatprep.subr.bf16.mxu1 %v9920_v32  ;;  %7375 = vmatprep.mubr.msk.bf16.mxu1 %vm8338_vm0, %v9920_v32 }
0x1059   :  { %7366 = vmatpush3.bf16.msra.mxu0 %v7996_v30 }
0x105a   :  { %7374 = vmatpush3.bf16.msra.mxu1 %v7997_v47  ;;  %7379 = vmatprep.subr.bf16.mxu0 %v9920_v32 }
0x105b   :  { %7385 = vmatprep.subr.bf16.mxu1 %v9920_v32 }
0x105c   :  { %7368 = vmatmul.mubr.msk.bf16.vlgmr.msra.gmra.mrb[188].mxu0 %vm434_vm6, %v9294_v6 }
0x105d   :  { %7380 = vmatpush3.bf16.msra.mxu0 %v9191_v20  ;;  %7381 = vmatprep.mubr.msk.bf16.mxu0 %vm8338_vm0, %v9920_v32 }
0x105e   :  { %7393 = vmatprep.subr.bf16.mxu0 %v9920_v32 }
0x1127   :  { %v4490_v5 = vpop.f32.mrb[184].mxu0  ;;  %v4531_v31 = vpop.f32.mrb[168].mxu1 }
0x1128   :  { %v7353_v52 = vpop.f32.mrb[185].mxu0  ;;  %v7361_v24 = vpop.f32.mrb[169].mxu1 }
0x1129   :  { %v4493_v60 = vpop.f32.mrb[186].mxu0  ;;  %v4534_v54 = vpop.f32.mrb[170].mxu1 }
0x112a   :  { %v7354_v23 = vpop.f32.mrb[187].mxu0  ;;  %v7362_v35 = vpop.f32.mrb[171].mxu1 }
0x112b   :  { %v8012_v23 = vld [vmem:[%s9934_s16 + $0x8] sm:$0xff]  }
0x112f   :  { %v4574_v1 = vpop.f32.mrb[188].mxu0 }
0x1130   :  { %v4580_v25 = vmul.f32 %v4574_v1, %v4490_v5  ;;  %v4581_v40 = vmul.f32 %v4574_v1, %v4493_v60  ;;  %v7369_v21 = vpop.f32.mrb[189].mxu0  ;;  %v8009_v60 = vld [vmem:[%s9933_s11] sm:$0xff]  }
0x1131   :  { %v4577_v20 = vpop.f32.mrb[190].mxu0  ;;  %v8013_v1 = vld [vmem:[%s9935_s29] sm:$0xff]   ;;  %v8017_v21 = vld [vmem:[%s9935_s29 + $0x10] sm:$0xff]  }
0x1132   :  { %v4582_v2 = vpack.c.bf16 %v4581_v40, %v4580_v25  ;;  %v7370_v33 = vpop.f32.mrb[191].mxu0  ;;  %v8014_v25 = vld [vmem:[%s9935_s29 + $0x20] sm:$0xff]   ;;  %v8015_v40 = vld [vmem:[%s9935_s29 + $0x8] sm:$0xff]   ;;  %v8018_v20 = vld [vmem:[%s9935_s29 + $0x30] sm:$0xff]  }
0x1133   :  { %v8020_v33 = vld [vmem:[%s9935_s29 + $0x38] sm:$0xff]  }
0x1134   :  { %7376 = vmatmul.mubr.msk.bf16.vlgmr.msra.gmra.mrb[172].mxu1 %vm434_vm6, %v4582_v2  ;;  %v8019_v2 = vld [vmem:[%s9935_s29 + $0x18] sm:$0xff]  }
0x1135   :  { %7386 = vmatpush3.bf16.msra.mxu1 %v7998_v3  ;;  %7389 = vmatprep.mubr.msk.bf16.mxu1 %vm8338_vm0, %v9920_v32  ;;  %v8021_v3 = vld [vmem:[%s9936_s5] sm:$0xff]  }
0x1136   :  { %7387 = vmatprep.subr.bf16.mxu1 %v9920_v32 }
0x1139   :  { %7388 = vmatpush3.bf16.msra.mxu1 %v7999_v37  ;;  %v8022_v37 = vld [vmem:[%s9937_s9] sm:$0xff]  }
0x113a   :  { %7405 = vmatprep.subr.bf16.mxu1 %v9920_v32 }
0x1207   :  { %v4620_v26 = vpop.f32.mrb[172].mxu1 }
0x1208   :  { %v7377_v62 = vpop.f32.mrb[173].mxu1  ;;  %v4627_v49 = vmul.f32 0.125, %v4620_v26  ;;  %v8023_v26 = vld [vmem:[%s9936_s5 + $0x8] sm:$0xff]  }
0x1209   :  { %v4623_v9 = vpop.f32.mrb[174].mxu1  ;;  %v7799_v62 = vld [vmem:[%s9956_s14] sm:$0xff]  }
0x120a   :  { %v4628_v46 = vmul.f32 0.125, %v4623_v9  ;;  %v7378_v45 = vpop.f32.mrb[175].mxu1  ;;  %v7800_v9 = vld [vmem:[%s9956_s14 + $0x8] sm:$0xff]  }
0x120b   :  { %v8025_v45 = vld [vmem:[%s9938_s17] ss:$0 sm:$0xff] }
0x120c   :  { %v4629_v59 = vmax.f32 %v4627_v49, %v4628_v46 }
0x120e   :  { %v4630_v0 = vsub.f32 %v4627_v49, %v4629_v59  ;;  %v4633_v14 = vsub.f32 %v4628_v46, %v4629_v59  ;;  %v7801_v49 = vld [vmem:[%s9957_s4] sm:$0xff]  }
0x1210   :  { %v4631_v12 = vmul.f32 1.442695, %v4630_v0  ;;  %v4634_v28 = vmul.f32 1.442695, %v4633_v14 }
0x1212   :  { %7866 = vpow2.f32 %v4631_v12 }
0x1213   :  { %7868 = vpow2.f32 %v4634_v28 }
0x121c   :  { %v7867_v27 = vpop.eup %7866 }
0x121d   :  { %v7869_v55 = vpop.eup %7868 }
0x121e   :  { %v4636_v51 = vadd.f32 %v7869_v55, %v7867_v27 }
0x1220   :  { %7870 = vrcp.f32 %v4636_v51 }
0x122a   :  { %v7871_v18 = vpop.eup %7870 }
0x122b   :  { %v4638_v56 = vmul.f32 %v7871_v18, %v7867_v27  ;;  %v4639_v63 = vmul.f32 %v7871_v18, %v7869_v55  ;;  %v8026_v55 = vld [vmem:[%s9938_s17 + $0x1] ss:$0 sm:$0xff] }
0x122d   :  { %v4640_v17 = vpack.c.bf16 %v4639_v63, %v4638_v56 }
0x122f   :  { %7382 = vmatmul.mubr.msk.bf16.vlgmr.msra.gmra.mrb[192].mxu0 %vm2906_vm8, %v4640_v17  ;;  %vm6227_vm8 = vcmask 785408  }
0x1230   :  { %7394 = vmatpush3.bf16.msra.mxu0 %v8000_v10  ;;  %7401 = vmatprep.mubr.msk.bf16.mxu0 %vm8338_vm0, %v9920_v32 }
0x1231   :  { %7395 = vmatprep.subr.bf16.mxu0 %v9920_v32 }
0x1234   :  { %7396 = vmatpush3.bf16.msra.mxu0 %v8001_v57 }
0x1235   :  { %7397 = vmatprep.subr.bf16.mxu0 %v9920_v32 }
0x1238   :  { %7398 = vmatpush3.bf16.msra.mxu0 %v8002_v11 }
0x1239   :  { %7399 = vmatprep.subr.bf16.mxu0 %v9920_v32 }
0x123c   :  { %7400 = vmatpush3.bf16.msra.mxu0 %v8003_v48 }
0x123d   :  { %7417 = vmatprep.subr.bf16.mxu0 %v9920_v32 }
0x1302   :  { %v4678_v22 = vpop.f32.mrb[192].mxu0 }
0x1303   :  { %v4685_v34 = vmul.f32 %v4678_v22, %v4531_v31  ;;  %v7383_v16 = vpop.f32.mrb[193].mxu0 }
0x1304   :  { %v4681_v53 = vpop.f32.mrb[194].mxu0 }
0x1305   :  { %v4686_v61 = vmul.f32 %v4681_v53, %v4534_v54  ;;  %v7384_v19 = vpop.f32.mrb[195].mxu0  ;;  %v8010_v54 = vld [vmem:[%s9934_s16] sm:$0xff]  }
0x1307   :  { %v4687_v8 = vadd.f32 %v4686_v61, %v4685_v34 }
0x1309   :  { %v4688_v38 = vpack.c.bf16 %v4687_v8, %v4687_v8 }
0x130b   :  { %7390 = vmatmul.mubr.msk.bf16.vlgmr.msra.gmra.mrb[176].mxu1 %vm434_vm6, %v4688_v38 }
0x130c   :  { %7406 = vmatpush3.bf16.msra.mxu1 %v8004_v39  ;;  %7413 = vmatprep.mubr.msk.bf16.mxu1 %vm8338_vm0, %v9920_v32 }
0x130d   :  { %7407 = vmatprep.subr.bf16.mxu1 %v9920_v32 }
0x1310   :  { %7408 = vmatpush3.bf16.msra.mxu1 %v8005_v50  ;;  %v8027_v50 = vld [vmem:[%s9939_s6] ss:$0 sm:$0xff] }
0x1311   :  { %7409 = vmatprep.subr.bf16.mxu1 %v9920_v32 }
0x1314   :  { %7410 = vmatpush3.bf16.msra.mxu1 %v8006_v36 }
0x1315   :  { %7411 = vmatprep.subr.bf16.mxu1 %v9920_v32 }
0x1318   :  { %7412 = vmatpush3.bf16.msra.mxu1 %v8007_v43 }
0x1319   :  { %7425 = vmatprep.subr.bf16.mxu1 %v9920_v32 }
0x13de   :  { %v4726_v4 = vpop.f32.mrb[176].mxu1 }
0x13df   :  { %v4727_v30 = vadd.f32 %v8008_v13, %v4726_v4  ;;  %v7391_v47 = vpop.f32.mrb[177].mxu1 }
0x13e0   :  { %v4729_v5 = vpop.f32.mrb[178].mxu1  ;;  %v8028_v47 = vld [vmem:[#allocation10] ss:$0 sm:$0xff] }
0x13e1   :  { %v4736_v31 = vsel %vm434_vm6, %v4727_v30, %v9479_v7  ;;  %v7392_v52 = vpop.f32.mrb[179].mxu1  ;;  %v8011_v7 = vld [vmem:[%s9933_s11 + $0x8] sm:$0xff]   ;;  %v4833_v35 = vpack.c.bf16 %v4727_v30, %v4727_v30 }
0x13e2   :  { %v4737_v24 = vpack.c.bf16 %v4736_v31, %v4736_v31 }
0x13e4   :  { %7402 = vmatmul.mubr.msk.bf16.vlgmr.msra.gmra.mrb[196].mxu0 %vm3070_vm9, %v4737_v24  ;;  %7414 = vmatmul.mubr.msk.bf16.vlgmr.msra.gmra.mrb[180].mxu1 %vm3070_vm9, %v4737_v24 }
0x13e5   :  { %7418 = vmatpush3.bf16.msra.mxu0 %v8009_v60  ;;  %7426 = vmatpush3.bf16.msra.mxu1 %v8010_v54 }
0x13e6   :  { %7419 = vmatprep.subr.bf16.mxu0 %v9920_v32  ;;  %7427 = vmatprep.subr.bf16.mxu1 %v9920_v32 }
0x13e7   :  { %7421 = vmatprep.mubr.msk.bf16.mxu0 %vm8338_vm0, %v9920_v32  ;;  %7429 = vmatprep.mubr.msk.bf16.mxu1 %vm8338_vm0, %v9920_v32 }
0x13e9   :  { %7420 = vmatpush3.bf16.msra.mxu0 %v8011_v7  ;;  %7428 = vmatpush3.bf16.msra.mxu1 %v8012_v23  ;;  %v8029_v7 = vld [vmem:[%s9939_s6 + $0x1] ss:$0 sm:$0xff] }
0x13ea   :  { %7433 = vmatprep.subr.bf16.mxu0 %v9920_v32  ;;  %7445 = vmatprep.subr.bf16.mxu1 %v9920_v32 }
0x13ec   :  { %7422 = vmatmul.mubr.msk.bf16.vlgmr.msra.gmra.mrb[200].mxu0 %vm434_vm6, %v4833_v35  ;;  %7430 = vmatmul.mubr.msk.bf16.vlgmr.msra.gmra.mrb[184].mxu1 %vm434_vm6, %v9294_v6  ;;  %v8016_v6 = vld [vmem:[%s9935_s29 + $0x28] sm:$0xff]   ;;  %v8030_v35 = vld [vmem:[#allocation8] ss:$0 sm:$0xff] }
0x13ed   :  { %7434 = vmatpush3.bf16.msra.mxu0 %v8013_v1  ;;  %7446 = vmatpush3.bf16.msra.mxu1 %v8014_v25 }
0x13ee   :  { %7435 = vmatprep.subr.bf16.mxu0 %v9920_v32  ;;  %7447 = vmatprep.subr.bf16.mxu1 %v9920_v32 }
0x13ef   :  { %7441 = vmatprep.mubr.msk.bf16.mxu0 %vm8338_vm0, %v9920_v32  ;;  %7453 = vmatprep.mubr.msk.bf16.mxu1 %vm8338_vm0, %v9920_v32 }
0x13f1   :  { %7436 = vmatpush3.bf16.msra.mxu0 %v8015_v40  ;;  %7448 = vmatpush3.bf16.msra.mxu1 %v8016_v6 }
0x13f2   :  { %7437 = vmatprep.subr.bf16.mxu0 %v9920_v32  ;;  %7449 = vmatprep.subr.bf16.mxu1 %v9920_v32 }
0x13f5   :  { %7438 = vmatpush3.bf16.msra.mxu0 %v8017_v21  ;;  %7450 = vmatpush3.bf16.msra.mxu1 %v8018_v20 }
0x13f6   :  { %7439 = vmatprep.subr.bf16.mxu0 %v9920_v32  ;;  %7451 = vmatprep.subr.bf16.mxu1 %v9920_v32 }
0x13f9   :  { %7440 = vmatpush3.bf16.msra.mxu0 %v8019_v2  ;;  %7452 = vmatpush3.bf16.msra.mxu1 %v8020_v33 }
0x13fa   :  { %7457 = vmatprep.subr.bf16.mxu0 %v9920_v32  ;;  %7465 = vmatprep.subr.bf16.mxu1 %v9920_v32 }
0x13fc   :  { %7442 = vmatmul.mubr.msk.bf16.vlgmr.msra.gmra.mrb[204].mxu0 %vm3070_vm9, %v9486_v29  ;;  %7454 = vmatmul.mubr.msk.bf16.vlgmr.msra.gmra.mrb[188].mxu1 %vm3070_vm9, %v9486_v29  ;;  %v8024_v29 = vld [vmem:[%s9937_s9 + $0x8] sm:$0xff]  }
0x13fd   :  { %7458 = vmatpush3.bf16.msra.mxu0 %v8021_v3  ;;  %7466 = vmatpush3.bf16.msra.mxu1 %v8022_v37 }
0x13fe   :  { %7459 = vmatprep.subr.bf16.mxu0 %v9920_v32  ;;  %7467 = vmatprep.subr.bf16.mxu1 %v9920_v32 }
0x13ff   :  { %7461 = vmatprep.mubr.msk.bf16.mxu0 %vm8338_vm0, %v9920_v32  ;;  %7469 = vmatprep.mubr.msk.bf16.mxu1 %vm8338_vm0, %v9920_v32 }
0x1401   :  { %7460 = vmatpush3.bf16.msra.mxu0 %v8023_v26  ;;  %7468 = vmatpush3.bf16.msra.mxu1 %v8024_v29 }
0x1402   :  { %7481 = vmatprep.subr.bf16.mxu1 %v9920_v32  ;;  %7473 = vmatprep.subr.bf16.mxu0 %v9920_v32 }
0x1404   :  { %7462 = vmatmul.mubr.msk.bf16.vlgmr.msra.gmra.mrb[208].mxu0 %vm434_vm6, %v9483_v42  ;;  %7470 = vmatmul.mubr.msk.bf16.vlgmr.msra.gmra.mrb[192].mxu1 %vm434_vm6, %v9317_v15  ;;  %v7802_v42 = vld [vmem:[%s9957_s4 + $0x8] sm:$0xff]  }
0x1405   :  { %7485 = vmatprep.mubr.msk.bf16.mxu1 %vm8338_vm0, %v9920_v32  ;;  %7477 = vmatprep.mubr.msk.bf16.mxu0 %vm8338_vm0, %v9920_v32 }
0x1406   :  { %7482 = vmatpush3.bf16.msra.mxu1 %v7799_v62  ;;  %7474 = vmatpush3.bf16.msra.mxu0 %v7801_v49 }
0x1407   :  { %7483 = vmatprep.subr.bf16.mxu1 %v9920_v32  ;;  %7475 = vmatprep.subr.bf16.mxu0 %v9920_v32 }
0x140a   :  { %7484 = vmatpush3.bf16.msra.mxu1 %v7800_v9  ;;  %7476 = vmatpush3.bf16.msra.mxu0 %v7802_v42 }
0x14b7   :  { %v4775_v15 = vpop.f32.mrb[196].mxu0  ;;  %v4821_v46 = vpop.f32.mrb[180].mxu1 }
0x14b8   :  { %v4776_v59 = vadd.f32 %v8025_v45, %v4775_v15  ;;  %v7403_v0 = vpop.f32.mrb[197].mxu0  ;;  %v7415_v14 = vpop.f32.mrb[181].mxu1  ;;  %v4822_v51 = vadd.f32 %v8026_v55, %v4821_v46 }
0x14b9   :  { %v4778_v12 = vpop.f32.mrb[198].mxu0  ;;  %v4824_v28 = vpop.f32.mrb[182].mxu1 }
0x14ba   :  { %v6611_v27 = vmul.f32 -1.442695, %v4776_v59  ;;  %v7404_v18 = vpop.f32.mrb[199].mxu0  ;;  %v7416_v56 = vpop.f32.mrb[183].mxu1  ;;  %v6613_v63 = vmul.f32 -1.442695, %v4822_v51 }
0x14bb   :  { %v7803_v51 = vld [vmem:[%s9958_s15] sm:$0xff]  }
0x14bc   :  { %7872 = vpow2.f32 %v6611_v27 }
0x14bd   :  { %7874 = vpow2.f32 %v6613_v63 }
0x14bf   :  { %v4871_v17 = vpop.f32.mrb[200].mxu0  ;;  %v4911_v10 = vpop.f32.mrb[184].mxu1 }
0x14c0   :  { %v7423_v57 = vpop.f32.mrb[201].mxu0  ;;  %v7431_v11 = vpop.f32.mrb[185].mxu1  ;;  %v4912_v5 = vadd.f32 %v8028_v47, %v4911_v10  ;;  %v4872_v1 = vadd.f32 %v8030_v35, %v4871_v17  ;;  %v8031_v10 = vld [vmem:[#allocation5] ss:$0 sm:$0xff]  ;;  %v6628_v35 = vld [vmem:[#allocation3] ss:$0 sm:$0xff] }
0x14c1   :  { %v4874_v48 = vpop.f32.mrb[202].mxu0  ;;  %v4914_v22 = vpop.f32.mrb[186].mxu1  ;;  %v8032_v11 = vld [vmem:[%s9940_s12] ss:$0 sm:$0xff] }
0x14c2   :  { %v7424_v34 = vpop.f32.mrb[203].mxu0  ;;  %v7432_v16 = vpop.f32.mrb[187].mxu1 }
0x14c6   :  { %v7873_v53 = vpop.eup %7872 }
0x14c7   :  { %v4784_v61 = vadd.f32 1.0, %v7873_v53  ;;  %v7875_v19 = vpop.eup %7874 }
0x14c8   :  { %v4830_v8 = vadd.f32 1.0, %v7875_v19 }
0x14c9   :  { %7876 = vrcp.f32 %v4784_v61 }
0x14ca   :  { %7878 = vrcp.f32 %v4830_v8 }
0x14cf   :  { %v4972_v38 = vpop.f32.mrb[204].mxu0  ;;  %v5025_v39 = vpop.f32.mrb[188].mxu1 }
0x14d0   :  { %v4973_v36 = vadd.f32 %v8027_v50, %v4972_v38  ;;  %v7443_v43 = vpop.f32.mrb[205].mxu0  ;;  %v7455_v4 = vpop.f32.mrb[189].mxu1  ;;  %v5026_v23 = vadd.f32 %v8029_v7, %v5025_v39 }
0x14d1   :  { %v4975_v13 = vpop.f32.mrb[206].mxu0  ;;  %v5028_v30 = vpop.f32.mrb[190].mxu1 }
0x14d2   :  { %v6617_v31 = vmul.f32 -1.442695, %v4973_v36  ;;  %v4976_v52 = vadd.f32 %v8027_v50, %v4975_v13  ;;  %v7444_v24 = vpop.f32.mrb[207].mxu0  ;;  %v7456_v60 = vpop.f32.mrb[191].mxu1  ;;  %v5029_v6 = vadd.f32 %v8029_v7, %v5028_v30  ;;  %v6620_v20 = vmul.f32 -1.442695, %v5026_v23 }
0x14d3   :  { %v7877_v54 = vpop.eup %7876  ;;  %v8033_v60 = vld [vmem:[%s9897_s20] sm:$0xff]   ;;  %v7806_v7 = vld [vmem:[%s9959_s18 + $0x8] sm:$0xff]  }
0x14d4   :  { %v4917_v25 = vmul.f32 %v7877_v54, %v4912_v5  ;;  %7880 = vpow2.f32 %v6617_v31  ;;  %v6618_v40 = vmul.f32 -1.442695, %v4976_v52  ;;  %v6621_v26 = vmul.f32 -1.442695, %v5029_v6  ;;  %v7879_v42 = vpop.eup %7878  ;;  %v7805_v54 = vld [vmem:[%s9959_s18] sm:$0xff]  }
0x14d5   :  { %v4920_v59 = vsub.f32 1.0, %v7879_v42  ;;  %v4922_v12 = vmul.f32 %v7879_v42, %v9288_v44  ;;  %v9648_v23 = vld [vmem:[%s9960_s27] sm:$0xff]  }
0x14d6   :  { %v4918_v21 = vadd.f32 %v4917_v25, %v4872_v1  ;;  %7882 = vpow2.f32 %v6618_v40 }
0x14d7   :  { %v5081_v2 = vpop.f32.mrb[208].mxu0  ;;  %v5125_v33 = vpop.f32.mrb[192].mxu1 }
0x14d8   :  { %7884 = vtanh.f32 %v4918_v21  ;;  %v7463_v3 = vpop.f32.mrb[209].mxu0  ;;  %v7471_v37 = vpop.f32.mrb[193].mxu1  ;;  %v5126_v57 = vadd.f32 %v8031_v10, %v5125_v33  ;;  %v5082_v48 = vadd.f32 %v8032_v11, %v5081_v2 }
0x14d9   :  { %v5084_v29 = vpop.f32.mrb[210].mxu0  ;;  %v5128_v62 = vpop.f32.mrb[194].mxu1  ;;  %7886 = vpow2.f32 %v6620_v20 }
0x14da   :  { %v7464_v9 = vpop.f32.mrb[211].mxu0  ;;  %v7472_v49 = vpop.f32.mrb[195].mxu1  ;;  %7888 = vpow2.f32 %v6621_v26  ;;  %v5129_v34 = vadd.f32 %v8031_v10, %v5128_v62  ;;  %v5085_v61 = vadd.f32 %v8032_v11, %v5084_v29 }
0x14de   :  { %v7881_v15 = vpop.eup %7880 }
0x14df   :  { %v4985_v46 = vadd.f32 1.0, %v7881_v15 }
0x14e0   :  { %v7883_v45 = vpop.eup %7882 }
0x14e1   :  { %7890 = vrcp.f32 %v4985_v46  ;;  %v4986_v0 = vadd.f32 1.0, %v7883_v45 }
0x14e2   :  { %v7885_v14 = vpop.eup %7884 }
0x14e3   :  { %v4921_v28 = vmul.f32 %v7885_v14, %v4920_v59  ;;  %7892 = vrcp.f32 %v4986_v0  ;;  %v7887_v27 = vpop.eup %7886 }
0x14e4   :  { %v7889_v18 = vpop.eup %7888  ;;  %v5038_v63 = vadd.f32 1.0, %v7887_v27 }
0x14e5   :  { %v9622_v55 = vadd.f32 %v4922_v12, %v4921_v28  ;;  %v5039_v17 = vadd.f32 1.0, %v7889_v18  ;;  %v6624_v28 = vld [vmem:[#allocation2] ss:$0 sm:$0xff] }
0x14e6   :  { %7894 = vrcp.f32 %v5038_v63 }
0x14e7   :  { %v5300_v56 = vpack.c.bf16 %v9622_v55, %v9622_v55  ;;  %7896 = vrcp.f32 %v5039_v17  ;;  %v5444_v18 = vsel %vm5443_vm13, %v9622_v55, -inf }
0x14e9   :  { %7486 = vmatmul.mubr.msk.bf16.vlgmr.msra.gmra.mrb[196].mxu1 %vm434_vm6, %v5300_v56 }
0x14ea   :  { %7497 = vmatprep.mubr.msk.bf16.mxu1 %vm363_vm2, %v7803_v51  ;;  %v5397_v51 = vsel %vm5389_vm12, %v9622_v55, -inf }
0x14eb   :  { %v7891_v44 = vpop.eup %7890  ;;  %v5398_v11 = vrot.slane %v5397_v51, 4 }
0x14ec   :  { %v5132_v22 = vmul.f32 %v7891_v44, %v5126_v57 }
0x14ed   :  { %v7893_v16 = vpop.eup %7892 }
0x14ee   :  { %v5134_v53 = vadd.f32 %v5132_v22, %v5082_v48  ;;  %v5133_v19 = vmul.f32 %v7893_v16, %v5129_v34  ;;  %v5445_v48 = vrot.slane %v5444_v18, 4 }
0x14f0   :  { %7898 = vtanh.f32 %v5134_v53  ;;  %v5135_v8 = vadd.f32 %v5133_v19, %v5085_v61  ;;  %v7895_v38 = vpop.eup %7894 }
0x14f1   :  { %v7897_v39 = vpop.eup %7896  ;;  %v5138_v50 = vsub.f32 1.0, %v7895_v38  ;;  %v5142_v43 = vmul.f32 %v7895_v38, %v9309_v58  ;;  %v7804_v58 = vld [vmem:[%s9958_s15 + $0x8] sm:$0xff]  }
0x14f2   :  { %7900 = vtanh.f32 %v5135_v8  ;;  %v5139_v4 = vsub.f32 1.0, %v7897_v39  ;;  %v5143_v47 = vmul.f32 %v7897_v39, %v9311_v41  ;;  %v8034_v41 = vld [vmem:[%s9897_s20 + $0x8] sm:$0xff]   ;;  %s9961_s20 = sld [smem:[#allocation68_spill]] }
0x14fa   :  { %v7899_v36 = vpop.eup %7898 }
0x14fb   :  { %v5140_v13 = vmul.f32 %v7899_v36, %v5138_v50 }
0x14fc   :  { %v7901_v30 = vpop.eup %7900 }
0x14fd   :  { %v5141_v5 = vmul.f32 %v7901_v30, %v5139_v4  ;;  %v9632_v31 = vadd.f32 %v5142_v43, %v5140_v13  ;;  %v5399_v4 = vmax.f32 %v5397_v51, %v5398_v11  ;;  %v5446_v13 = vmax.f32 %v5444_v18, %v5445_v48  ;;  %v7810_v48 = vld [vmem:[%s9961_s20 + $0x8] sm:$0xff]  }
0x14ff   :  { %v9634_v52 = vadd.f32 %v5143_v47, %v5141_v5 }
0x1501   :  { %v5150_v24 = vpack.c.bf16 %v9634_v52, %v9632_v31 }
0x1503   :  { %7478 = vmatmul.mubr.msk.bf16.vlgmr.msra.gmra.mrb[212].mxu0 %vm434_vm6, %v5150_v24  ;;  %7489 = vmatprep.subr.bf16.mxu0 %v5150_v24 }
0x1504   :  { %7495 = vmatprep.subr.bf16.mxu1 %v5150_v24  ;;  %7490 = vmatpush3.bf16.msra.mxu0 %v5150_v24 }
0x1505   :  { %7496 = vmatpush3.bf16.msra.mxu1 %v5150_v24  ;;  %7491 = vmatprep.mubr.msk.bf16.mxu0 %vm363_vm2, %v8033_v60 }
0x1506   :  { %7501 = vmatprep.subr.bf16.mxu0 %v7805_v54 }
0x1508   :  { %7498 = vmatmul.mubr.msk.bf16.vlgmr.msra.gmra.mrb[200].mxu1 %vm363_vm2, %v7804_v58 }
0x150b   :  { %7492 = vmatmul.mubr.msk.bf16.vlgmr.msra.gmra.mrb[216].mxu0 %vm363_vm2, %v8034_v41  ;;  %vm6041_vm2 = vcmask 80896  }
0x150c   :  { %7502 = vmatpush3.bf16.msra.mxu0 %v7805_v54 }
0x150d   :  { %7503 = vmatprep.subr.bf16.mxu0 %v7806_v7 }
0x1510   :  { %7504 = vmatpush3.bf16.msra.mxu0 %v7806_v7 }
0x1511   :  { %7509 = vmatprep.subr.bf16.mxu0 %v9648_v23 }
0x15bc   :  { %v5357_v1 = vpop.f32.mrb[196].mxu1 }
0x15bd   :  { %v5358_v25 = vadd.f32 %v6628_v35, %v5357_v1  ;;  %v7487_v40 = vpop.f32.mrb[197].mxu1 }
0x15be   :  { %v5360_v6 = vpop.f32.mrb[198].mxu1 }
0x15bf   :  { %v5364_v21 = vsel %vm5363_vm10, %v5358_v25, -inf  ;;  %v5405_v20 = vsel %vm5404_vm11, %v5358_v25, -inf  ;;  %v7488_v2 = vpop.f32.mrb[199].mxu1 }
0x15c0   :  { %v5365_v33 = vrot.slane %v5364_v21, 4  ;;  %v5406_v3 = vrot.slane %v5405_v20, 4 }
0x15c2   :  { %v5366_v37 = vmax.f32 %v5364_v21, %v5365_v33  ;;  %v5407_v26 = vmax.f32 %v5405_v20, %v5406_v3  ;;  %v7808_v21 = vld [vmem:[%s9960_s27 + $0x8] sm:$0xff]   ;;  %v5400_v3 = vrot.slane %v5399_v4, 2 }
0x15c4   :  { %v5367_v29 = vrot.slane %v5366_v37, 2  ;;  %v5408_v62 = vrot.slane %v5407_v26, 2 }
0x15c6   :  { %v5368_v9 = vmax.f32 %v5366_v37, %v5367_v29  ;;  %v5409_v49 = vmax.f32 %v5407_v26, %v5408_v62  ;;  %v5447_v37 = vrot.slane %v5446_v13, 2 }
0x15c8   :  { %v5369_v42 = vrot.slane %v5368_v9, 1  ;;  %v5410_v15 = vrot.slane %v5409_v49, 1 }
0x15ca   :  { %v5370_v46 = vmax.f32 %v5368_v9, %v5369_v42  ;;  %v5411_v45 = vmax.f32 %v5409_v49, %v5410_v15 }
0x15cc   :  { %v5371_v59 = vsub.f32 %v5358_v25, %v5370_v46  ;;  %v5412_v0 = vsub.f32 %v5358_v25, %v5411_v45 }
0x15ce   :  { %v5372_v14 = vmul.f32 1.442695, %v5371_v59  ;;  %v5413_v12 = vmul.f32 1.442695, %v5412_v0  ;;  %v5401_v59 = vmax.f32 %v5399_v4, %v5400_v3  ;;  %v5448_v0 = vmax.f32 %v5446_v13, %v5447_v37  ;;  %v7819_v3 = vld [vmem:[%s9963_s26 + $0x28] sm:$0xff]   ;;  %v7820_v37 = vld [vmem:[%s9963_s26 + $0x30] sm:$0xff]  }
0x15d0   :  { %7902 = vpow2.f32 %v5372_v14 }
0x15d1   :  { %7904 = vpow2.f32 %v5413_v12 }
0x15d6   :  { %v5207_v27 = vpop.f32.mrb[212].mxu0 }
0x15d7   :  { %v9655_v56 = vadd.f32 %v6624_v28, %v5207_v27  ;;  %v7479_v63 = vpop.f32.mrb[213].mxu0 }
0x15d8   :  { %v5210_v17 = vpop.f32.mrb[214].mxu0  ;;  %v5449_v63 = vrot.slane %v5448_v0, 1 }
0x15d9   :  { %v5215_v10 = vsel %vm5214_vm14, %v9655_v56, -inf  ;;  %v9659_v57 = vadd.f32 %v6624_v28, %v5210_v17  ;;  %v7480_v44 = vpop.f32.mrb[215].mxu0 }
0x15da   :  { %v9661_v22 = vpop.eup %7902  ;;  %v5216_v34 = vrot.slane %v5215_v10, 4  ;;  %v7809_v44 = vld [vmem:[%s9961_s20] sm:$0xff]   ;;  %v5450_v11 = vmax.f32 %v5448_v0, %v5449_v63 }
0x15db   :  { %v9663_v16 = vpop.eup %7904  ;;  %v5374_v53 = vsel %vm5363_vm10, %v9661_v22, 0.0  ;;  %v5254_v61 = vsel %vm5214_vm14, %v9659_v57, -inf  ;;  %v7499_v19 = vpop.f32.mrb[200].mxu1  ;;  %v7813_v63 = vld [vmem:[%s9964_s13] sm:$0x1f]  }
0x15dc   :  { %v5375_v8 = vrot.slane %v5374_v53, 4  ;;  %v5416_v38 = vrot.slane %v9663_v16, 4  ;;  %v5217_v39 = vmax.f32 %v5215_v10, %v5216_v34  ;;  %v5255_v50 = vrot.slane %v5254_v61, 4  ;;  %v5557_v36 = vpop.f32.mrb[201].mxu1 }
0x15dd   :  { %v7500_v43 = vpop.f32.mrb[202].mxu1 }
0x15de   :  { %v5376_v30 = vadd.f32 %v5375_v8, %v5374_v53  ;;  %v5418_v47 = vsel %vm5363_vm10, %v5416_v38, 0.0  ;;  %v5218_v5 = vrot.slane %v5217_v39, 2  ;;  %v5256_v24 = vmax.f32 %v5254_v61, %v5255_v50  ;;  %v5560_v58 = vpop.f32.mrb[203].mxu1  ;;  %v7493_v60 = vpop.f32.mrb[216].mxu0 }
0x15df   :  { %v5419_v41 = vrot.slane %v5418_v47, 4  ;;  %v5583_v54 = vpack.c.bf16 %v7500_v43, %v7499_v19  ;;  %v5582_v7 = vpack.c.bf16 %v5560_v58, %v5557_v36  ;;  %v5488_v35 = vpop.f32.mrb[217].mxu0  ;;  %vm6240_vm10 = vcmask 76802  }
0x15e0   :  { %v5377_v1 = vrot.slane %v5376_v30, 2  ;;  %v5219_v25 = vmax.f32 %v5217_v39, %v5218_v5  ;;  %v5257_v40 = vrot.slane %v5256_v24, 2  ;;  %v7494_v6 = vpop.f32.mrb[218].mxu0  ;;  %vm6241_vm11 = vmor %vm6240_vm10, %vm2910_vm7 }
0x15e1   :  { %v5420_v20 = vadd.f32 %v5419_v41, %v5418_v47  ;;  %7505 = vmatprep.mubr.msk.bf16.mxu0 %vm434_vm6, %v5582_v7  ;;  %v5577_v2 = vpack.c.bf16 %v7494_v6, %v7493_v60  ;;  %v5491_v33 = vpop.f32.mrb[219].mxu0  ;;  %v7812_v7 = vld [vmem:[%s9962_s22 + $0x8] sm:$0xff]   ;;  %v7814_v6 = vld [vmem:[%s9963_s26] sm:$0xff]  }
0x15e2   :  { %v5378_v26 = vadd.f32 %v5377_v1, %v5376_v30  ;;  %v5220_v29 = vrot.slane %v5219_v25, 1  ;;  %v5258_v62 = vmax.f32 %v5256_v24, %v5257_v40  ;;  %7506 = vmatmul.mubr.msk.bf16.vlgmr.msra.gmra.mrb[220].mxu0 %vm434_vm6, %v5583_v54  ;;  %v5576_v9 = vpack.c.bf16 %v5491_v33, %v5488_v35  ;;  %v7811_v54 = vld [vmem:[%s9962_s22] sm:$0xff]   ;;  %7517 = vmatprep.subr.bf16.mxu1 %v7814_v6 }
0x15e3   :  { %v5421_v49 = vrot.slane %v5420_v20, 2  ;;  %7510 = vmatpush3.bf16.msra.mxu0 %v9648_v23  ;;  %v5402_v23 = vrot.slane %v5401_v59, 1  ;;  %7518 = vmatpush3.bf16.msra.mxu1 %v7814_v6  ;;  %v7818_v33 = vld [vmem:[%s9963_s26 + $0x20] sm:$0xff]  }
0x15e4   :  { %v5221_v42 = vmax.f32 %v5219_v25, %v5220_v29  ;;  %v5259_v15 = vrot.slane %v5258_v62, 1  ;;  %7511 = vmatprep.subr.bf16.mxu0 %v7808_v21  ;;  %7513 = vmatprep.mubr.msk.bf16.mxu0 %vm434_vm6, %v5576_v9  ;;  %v5379_v46 = vrot.slane %v5378_v26, 1 }
0x15e5   :  { %v5422_v45 = vadd.f32 %v5421_v49, %v5420_v20  ;;  %v7816_v20 = vld [vmem:[%s9963_s26 + $0x10] sm:$0xff]  }
0x15e6   :  { %v5222_v14 = vsub.f32 %v9655_v56, %v5221_v42  ;;  %v5260_v12 = vmax.f32 %v5258_v62, %v5259_v15  ;;  %v5380_v28 = vadd.f32 %v5379_v46, %v5378_v26  ;;  %v5403_v56 = vmax.f32 %v5401_v59, %v5402_v23  ;;  %v7821_v26 = vld [vmem:[%s9963_s26 + $0x38] sm:$0xff]  }
0x15e7   :  { %7512 = vmatpush3.bf16.msra.mxu0 %v7808_v21  ;;  %v5423_v27 = vrot.slane %v5422_v45, 1  ;;  %v7815_v21 = vld [vmem:[%s9963_s26 + $0x8] sm:$0xff]  }
0x15e8   :  { %v5223_v51 = vmul.f32 1.442695, %v5222_v14  ;;  %v5261_v18 = vsub.f32 %v9659_v57, %v5260_v12  ;;  %7537 = vmatprep.subr.bf16.mxu0 %v9920_v32  ;;  %7906 = vrcp.f32 %v5380_v28  ;;  %v9686_v57 = vsel %vm5293_vm15, %v5403_v56, %v5450_v11  ;;  %7519 = vmatprep.subr.bf16.mxu1 %v7815_v21  ;;  %v9725_v11 = vld [vmem:[%s9965_s1] sm:$0x3] }
0x15e9   :  { %v5424_v17 = vadd.f32 %v5423_v27, %v5422_v45  ;;  %v5922_v19 = vpack.c.bf16 %v9686_v57, %v9686_v57  ;;  %7520 = vmatpush3.bf16.msra.mxu1 %v7815_v21  ;;  %v6047_v56 = vsel %vm6045_vm1, %v7813_v63, 0 }
0x15ea   :  { %7908 = vpow2.f32 %v5223_v51  ;;  %v5262_v10 = vmul.f32 1.442695, %v5261_v18  ;;  %7521 = vmatprep.subr.bf16.mxu1 %v7816_v20 }
0x15eb   :  { %7910 = vrcp.f32 %v5424_v17 }
0x15ec   :  { %7912 = vpow2.f32 %v5262_v10 }
0x15ed   :  { %7522 = vmatpush3.bf16.msra.mxu1 %v7816_v20 }
0x15ee   :  { %7514 = vmatmul.mubr.msk.bf16.vlgmr.msra.gmra.mrb[220].mxu0 %vm434_vm6, %v5577_v2  ;;  %v7817_v2 = vld [vmem:[%s9963_s26 + $0x18] sm:$0xff]  }
0x15ef   :  { %7538 = vmatpush3.bf16.msra.mxu0 %v7809_v44  ;;  %7541 = vmatprep.mubr.msk.bf16.mxu0 %vm8338_vm0, %v9920_v32 }
0x15f0   :  { %7539 = vmatprep.subr.bf16.mxu0 %v9920_v32  ;;  %7523 = vmatprep.subr.bf16.mxu1 %v7817_v2 }
0x15f1   :  { %7524 = vmatpush3.bf16.msra.mxu1 %v7817_v2 }
0x15f2   :  { %v7907_v34 = vpop.eup %7906  ;;  %7525 = vmatprep.subr.bf16.mxu1 %v7818_v33 }
0x15f3   :  { %7540 = vmatpush3.bf16.msra.mxu0 %v7810_v48  ;;  %v5382_v53 = vmul.f32 %v7907_v34, %v9661_v22  ;;  %v6035_v48 = vpack.c.bf16 %v9725_v11, %v9725_v11  ;;  %v6646_v34 = vld [vmem:[#allocation13] ss:$0 sm:$0xff] }
0x15f4   :  { %v7909_v61 = vpop.eup %7908  ;;  %7545 = vmatprep.subr.bf16.mxu0 %v9920_v32 }
0x15f5   :  { %v7911_v8 = vpop.eup %7910  ;;  %v5225_v38 = vsel %vm5214_vm14, %v7909_v61, 0.0  ;;  %5385 = vperm.xlu1 %7674, %v5382_v53   ;;  %7526 = vmatpush3.bf16.msra.mxu1 %v7818_v33 }
0x15f6   :  { %v7913_v39 = vpop.eup %7912  ;;  %v5226_v50 = vrot.slane %v5225_v38, 4  ;;  %7542 = vmatmul.mubr.msk.bf16.vlgmr.msra.gmra.mrb[224].mxu0 %vm434_vm6, %v5922_v19  ;;  %v5426_v36 = vmul.f32 %v7911_v8, %v9663_v16  ;;  %7527 = vmatprep.subr.bf16.mxu1 %v7819_v3 }
0x15f7   :  { %v5264_v43 = vsel %vm5214_vm14, %v7913_v39, 0.0  ;;  %7549 = vmatprep.mubr.msk.bf16.mxu0 %vm8338_vm0, %v9920_v32  ;;  %7546 = vmatpush3.bf16.msra.mxu0 %v7811_v54  ;;  %v7824_v54 = vld [vmem:[%s9966_s0 + $0x10] sm:$0xff]  }
0x15f8   :  { %v5227_v22 = vadd.f32 %v5226_v50, %v5225_v38  ;;  %v5265_v4 = vrot.slane %v5264_v43, 4  ;;  %5429 = vperm.xlu0 %7673, %v5426_v36   ;;  %7547 = vmatprep.subr.bf16.mxu0 %v9920_v32 }
0x15f9   :  { %7528 = vmatpush3.bf16.msra.mxu1 %v7819_v3 }
0x15fa   :  { %v5228_v13 = vrot.slane %v5227_v22, 2  ;;  %v5266_v30 = vadd.f32 %v5265_v4, %v5264_v43  ;;  %7529 = vmatprep.subr.bf16.mxu1 %v7820_v37 }
0x15fb   :  { %7548 = vmatpush3.bf16.msra.mxu0 %v7812_v7  ;;  %v7825_v7 = vld [vmem:[%s9966_s0 + $0x18] sm:$0xff]  }
0x15fc   :  { %v5229_v47 = vadd.f32 %v5228_v13, %v5227_v22  ;;  %v5267_v5 = vrot.slane %v5266_v30, 2  ;;  %7553 = vmatprep.subr.bf16.mxu0 %v9920_v32 }
0x15fd   :  { %7530 = vmatpush3.bf16.msra.mxu1 %v7820_v37  ;;  %v6668_v37 = vld [vmem:[#allocation14] ss:$0 sm:$0xff] }
0x15fe   :  { %v5230_v24 = vrot.slane %v5229_v47, 1  ;;  %v5268_v58 = vadd.f32 %v5267_v5, %v5266_v30  ;;  %7531 = vmatprep.subr.bf16.mxu1 %v7821_v26 }
0x1600   :  { %v5231_v60 = vadd.f32 %v5230_v24, %v5229_v47  ;;  %v5269_v41 = vrot.slane %v5268_v58, 1  ;;  %v7822_v24 = vld [vmem:[%s9966_s0] sm:$0xff]  }
0x1601   :  { %7532 = vmatpush3.bf16.msra.mxu1 %v7821_v26 }
0x1602   :  { %7914 = vrcp.f32 %v5231_v60  ;;  %v5270_v16 = vadd.f32 %v5269_v41, %v5268_v58  ;;  %7559 = vmatprep.subr.bf16.mxu1 %v9920_v32 }
0x1604   :  { %7916 = vrcp.f32 %v5270_v16  ;;  %v7823_v16 = vld [vmem:[%s9966_s0 + $0x8] sm:$0xff]  }
0x160c   :  { %v7915_v35 = vpop.eup %7914 }
0x160d   :  { %v5233_v1 = vmul.f32 %v7915_v35, %v7909_v61  ;;  %v7826_v35 = vld [vmem:[%s9966_s0 + $0x20] sm:$0xff]  }
0x160e   :  { %v7917_v25 = vpop.eup %7916 }
0x160f   :  { %5236 = vperm.xlu1 %7674, %v5233_v1   ;;  %v5272_v40 = vmul.f32 %v7917_v25, %v7913_v39  ;;  %v7827_v1 = vld [vmem:[%s9966_s0 + $0x28] sm:$0xff]   ;;  %v7828_v25 = vld [vmem:[%s9966_s0 + $0x30] sm:$0xff]  }
0x1611   :  { %5275 = vperm.xlu0 %7673, %v5272_v40   ;;  %v7829_v40 = vld [vmem:[%s9966_s0 + $0x38] sm:$0xff]  }
0x1674   :  { %v5386_v29 = vpop.permute.xlu1 %5385 }
0x1675   :  { %v5388_v62 = vmul.f32 %v5386_v29, %v9622_v55 }
0x1677   :  { %v5390_v9 = vsel %vm5389_vm12, %v5388_v62, 0.0  ;;  %v5430_v49 = vpop.permute.xlu0 %5429 }
0x1678   :  { %v5391_v42 = vrot.slane %v5390_v9, 4  ;;  %v5432_v15 = vmul.f32 %v5430_v49, %v9622_v55 }
0x167a   :  { %v5392_v46 = vadd.f32 %v5391_v42, %v5390_v9  ;;  %v5434_v45 = vrot.slane %v5432_v15, 4 }
0x167c   :  { %v5393_v59 = vrot.slane %v5392_v46, 2  ;;  %v5436_v0 = vsel %vm5389_vm12, %v5434_v45, 0.0  ;;  %v5247_v45 = vsel %vm434_vm6, %v9632_v31, -inf }
0x167d   :  { %v5437_v14 = vrot.slane %v5436_v0, 4 }
0x167e   :  { %v5394_v12 = vadd.f32 %v5393_v59, %v5392_v46  ;;  %v5286_v46 = vsel %vm434_vm6, %v9634_v52, -inf }
0x167f   :  { %v5438_v28 = vadd.f32 %v5437_v14, %v5436_v0  ;;  %v5287_v59 = vrot.slane %v5286_v46, 4  ;;  %v5248_v0 = vrot.slane %v5247_v45, 4 }
0x1680   :  { %v5395_v51 = vrot.slane %v5394_v12, 1 }
0x1681   :  { %v5439_v27 = vrot.slane %v5438_v28, 2  ;;  %v5288_v14 = vmax.f32 %v5286_v46, %v5287_v59 }
0x1682   :  { %v5396_v17 = vadd.f32 %v5395_v51, %v5394_v12  ;;  %v5249_v12 = vmax.f32 %v5247_v45, %v5248_v0  ;;  %v6647_v51 = vld [vmem:[#allocation4] ss:$0 sm:$0xff] }
0x1683   :  { %v5440_v18 = vadd.f32 %v5439_v27, %v5438_v28  ;;  %v5289_v28 = vrot.slane %v5288_v14, 2 }
0x1684   :  { %v5250_v27 = vrot.slane %v5249_v12, 2 }
0x1685   :  { %v5441_v23 = vrot.slane %v5440_v18, 1 }
0x1687   :  { %v5442_v10 = vadd.f32 %v5441_v23, %v5440_v18  ;;  %v5290_v18 = vmax.f32 %v5288_v14, %v5289_v28 }
0x1689   :  { %v9717_v44 = vsel %vm5293_vm15, %v5396_v17, %v5442_v10  ;;  %v5251_v17 = vmax.f32 %v5249_v12, %v5250_v27 }
0x168a   :  { %v5917_v55 = vpack.c.bf16 %v9717_v44, %v9717_v44 }
0x168c   :  { %7550 = vmatmul.mubr.msk.bf16.vlgmr.msra.gmra.mrb[228].mxu0 %vm434_vm6, %v5917_v55 }
0x168d   :  { %7554 = vmatpush3.bf16.msra.mxu0 %v6047_v56  ;;  %7555 = vmatprep.mubr.msk.bf16.mxu0 %vm8338_vm0, %v9920_v32 }
0x1694   :  { %7556 = vmatmul.mubr.msk.bf16.vlgmr.msra.gmra.mrb[232].mxu0 %vm6041_vm2, %v6035_v48  ;;  %v5291_v48 = vrot.slane %v5290_v18, 1 }
0x16c1   :  { %v7515_v53 = vpop.f32.mrb[220].mxu0 }
0x16c2   :  { %v5727_v61 = vadd.f32 %v7515_v53, %v6646_v34  ;;  %v5703_v19 = vpop.f32.mrb[221].mxu0  ;;  %v5252_v53 = vrot.slane %v5251_v17, 1 }
0x16c3   :  { %v5725_v8 = vadd.f32 %v6646_v34, %v5703_v19  ;;  %v7516_v38 = vpop.f32.mrb[222].mxu0  ;;  %v5292_v19 = vmax.f32 %v5290_v18, %v5291_v48 }
0x16c4   :  { %v5728_v39 = vadd.f32 %v7516_v38, %v6646_v34  ;;  %v5706_v50 = vpop.f32.mrb[223].mxu0  ;;  %v5731_v43 = vmax.f32 %v5727_v61, 0.0  ;;  %v5253_v38 = vmax.f32 %v5251_v17, %v5252_v53 }
0x16c5   :  { %v5726_v36 = vadd.f32 %v6646_v34, %v5706_v50  ;;  %v5729_v4 = vmax.f32 %v5725_v8, 0.0  ;;  %v5276_v50 = vpop.permute.xlu0 %5275 }
0x16c6   :  { %v5732_v22 = vmax.f32 %v5728_v39, 0.0  ;;  %v5295_v39 = vsel %vm5293_vm15, %v5253_v38, %v5292_v19 }
0x16c7   :  { %v5730_v13 = vmax.f32 %v5726_v36, 0.0  ;;  %v5237_v36 = vpop.permute.xlu1 %5236 }
0x16c8   :  { %v5750_v30 = vpack.c.bf16 %v5732_v22, %v5731_v43  ;;  %v5278_v43 = vmul.f32 %v5276_v50, %v9634_v52  ;;  %v5239_v22 = vmul.f32 %v5237_v36, %v9632_v31 }
0x16c9   :  { %v5749_v47 = vpack.c.bf16 %v5730_v13, %v5729_v4  ;;  %v5972_v5 = vpop.f32.mrb[224].mxu0 }
0x16ca   :  { %v7543_v58 = vpop.f32.mrb[225].mxu0  ;;  %v5279_v4 = vsel %vm434_vm6, %v5278_v43, 0.0  ;;  %v5240_v13 = vsel %vm434_vm6, %v5239_v22, 0.0 }
0x16cb   :  { %7533 = vmatprep.mubr.bf16.mxu1 %v5749_v47  ;;  %v5975_v60 = vpop.f32.mrb[226].mxu0  ;;  %v5241_v47 = vrot.slane %v5240_v13, 4  ;;  %v9967_v58 = vlaneseq }
0x16cc   :  { %7534 = vmatmul.mubr.bf16.vlgmr.msra.gmra.mrb[204].mxu1 %v5750_v30  ;;  %v7544_v41 = vpop.f32.mrb[227].mxu0  ;;  %v5280_v30 = vrot.slane %v5279_v4, 4 }
0x16cd   :  { %7560 = vmatpush3.bf16.msra.mxu1 %v7822_v24  ;;  %7575 = vmatprep.mubr.msk.bf16.mxu1 %vm8338_vm0, %v9920_v32  ;;  %v5242_v24 = vadd.f32 %v5241_v47, %v5240_v13  ;;  %v5861_v60 = vand.u32 127, %v9967_v58  ;;  %v9968_v41 = vld [vmem:[#allocation72_spill] sm:$0xff] }
0x16ce   :  { %7561 = vmatprep.subr.bf16.mxu1 %v9920_v32  ;;  %v5858_v52 = vadd.s32 16, %v9968_v41  ;;  %v5859_v31 = vadd.s32 24, %v9968_v41 }
0x16cf   :  { %vm5862_vm0 = vcmp.eq.s32.totalorder %v9968_v41, %v5861_v60 }
0x16d0   :  { %vm5864_vm4 = vcmp.eq.s32.totalorder %v5858_v52, %v5861_v60  ;;  %vm5865_vm5 = vcmp.eq.s32.totalorder %v5859_v31, %v5861_v60 }
0x16d1   :  { %7562 = vmatpush3.bf16.msra.mxu1 %v7823_v16  ;;  %v5857_v16 = vadd.s32 8, %v9968_v41 }
0x16d2   :  { %7563 = vmatprep.subr.bf16.mxu1 %v9920_v32 }
0x16d3   :  { %vm5863_vm3 = vcmp.eq.s32.totalorder %v5857_v16, %v5861_v60 }
0x16d5   :  { %7564 = vmatpush3.bf16.msra.mxu1 %v7824_v54 }
0x16d6   :  { %7565 = vmatprep.subr.bf16.mxu1 %v9920_v32 }
0x16d9   :  { %7566 = vmatpush3.bf16.msra.mxu1 %v7825_v7 }
0x16da   :  { %7567 = vmatprep.subr.bf16.mxu1 %v9920_v32 }
0x16dd   :  { %7568 = vmatpush3.bf16.msra.mxu1 %v7826_v35  ;;  %v6656_v35 = vsel %vm5862_vm0, 1.0, %v9920_v32 }
0x16de   :  { %7569 = vmatprep.subr.bf16.mxu1 %v9920_v32 }
0x16e1   :  { %7570 = vmatpush3.bf16.msra.mxu1 %v7827_v1 }
0x16e2   :  { %7571 = vmatprep.subr.bf16.mxu1 %v9920_v32 }
0x16e5   :  { %7572 = vmatpush3.bf16.msra.mxu1 %v7828_v25 }
0x16e6   :  { %7573 = vmatprep.subr.bf16.mxu1 %v9920_v32 }
0x16e9   :  { %7574 = vmatpush3.bf16.msra.mxu1 %v7829_v40  ;;  %v6657_v40 = vsel %vm5863_vm3, 1.0, %v9920_v32 }
0x175f   :  { %v6027_v6 = vpop.f32.mrb[228].mxu0 }
0x1760   :  { %v6028_v21 = vadd.f32 %v6027_v6, %v5972_v5  ;;  %v7551_v20 = vpop.f32.mrb[229].mxu0  ;;  %v5281_v5 = vadd.f32 %v5280_v30, %v5279_v4 }
0x1761   :  { %v6030_v2 = vpop.f32.mrb[230].mxu0 }
0x1762   :  { %v7552_v33 = vpop.f32.mrb[231].mxu0  ;;  %v6658_v2 = vsel %vm5864_vm4, 1.0, %v9920_v32 }
0x1767   :  { %v6083_v3 = vpop.f32.mrb[232].mxu0 }
0x1768   :  { %v6089_v26 = vadd.f32 %v6083_v3, %v6028_v21  ;;  %v7557_v29 = vpop.f32.mrb[233].mxu0 }
0x1769   :  { %v6086_v62 = vpop.f32.mrb[234].mxu0  ;;  %v8343_v29 = vmov 1983009808  }
0x176a   :  { %v6097_v9 = vadd.f32 %v6668_v37, %v6089_v26  ;;  %v7558_v49 = vpop.f32.mrb[235].mxu0  ;;  %v6659_v26 = vsel %vm5865_vm5, 1.0, %v9920_v32  ;;  %v6233_v62 = vunpack.c.l.s4 %v8343_v29 }
0x176c   :  { %v6098_v42 = vmax.f32 %v6097_v9, 0.0  ;;  %v6234_v27 = vunpack.c.0.s8 %v6233_v62 }
0x176e   :  { %v6115_v15 = vpack.c.bf16 %v6098_v42, %v6098_v42 }
0x1770   :  { %7576 = vmatmul.mubr.bf16.vlgmr.msra.gmra.mrb[208].mxu1 %v6115_v15 }
0x179f   :  { %v7535_v23 = vpop.f32.mrb[204].mxu1 }
0x17a0   :  { %v5840_v63 = vpop.f32.mrb[205].mxu1  ;;  %v5849_v61 = vadd.f32 %v7535_v23, %v6647_v51 }
0x17a1   :  { %v5841_v10 = vadd.f32 %v6647_v51, %v5840_v63  ;;  %v7536_v55 = vpop.f32.mrb[206].mxu1 }
0x17a2   :  { %v5843_v56 = vpop.f32.mrb[207].mxu1  ;;  %v5852_v8 = vadd.f32 %v7536_v55, %v6647_v51 }
0x17a3   :  { %v5844_v34 = vadd.f32 %v6647_v51, %v5843_v56  ;;  %5876 = vperm.xlu1 %7674, %v5841_v10   ;;  %v6237_v10 = vsub.s32 %v6234_v27, %v9968_v41 }
0x17a5   :  { %5881 = vperm.xlu0 %7673, %v5844_v34  }
0x17a7   :  { %5886 = vperm.xlu1 %7674, %v5849_v61  }
0x17a9   :  { %5891 = vperm.xlu0 %7673, %v5852_v8  }
0x17ab   :  { %6214 = vrot.lane.b32.xlu1 %v5295_v39, %s8340_s30  ;;  %s8344_s30 = smov [#allocation17]  }
0x17ac   :  { %s6249_s28 = sshll.u32 %s8344_s30, 4  ;;  %s6250_s28 = int_to_ptr.vmem [resolvable:$true] %s6249_s28 }
0x17ad   :  { %6218 = vrot.lane.b32.xlu0 %v9717_v44, %s8341_s8  ;;  %v5282_v44 = vrot.slane %v5281_v5, 2  ;;  %s8189_s2 = scalar_lea.vmem %s6250_s28, 16  ;;  %s8193_s24 = scalar_lea.vmem %s6250_s28, 32 }
0x17ae   :  { %p8190_p0 = scmp.ne.s32.totalorder %s6250_s28, %s8189_s2  ;;  %p8194_p1 = scmp.lt.s32.totalorder %s6250_s28, %s6250_s28 }
0x17af   :  { %6222 = vrot.lane.b32.xlu1 %v9686_v57, %s8342_s23  ;;  %v5243_v57 = vrot.slane %v5242_v24, 2  ;;  %v5283_v54 = vadd.f32 %v5282_v44, %v5281_v5  ;;  %p8195_p2 = scmp.lt.s32.totalorder %s8193_s24, %s8189_s2 }
0x17b1   :  { %v5244_v7 = vadd.f32 %v5243_v57, %v5242_v24  ;;  %v5284_v1 = vrot.slane %v5283_v54, 1  ;;  %p8196_p3 = por %p8195_p2, %p8194_p1 }
0x17b3   :  { %v5245_v21 = vrot.slane %v5244_v7, 1  ;;  %v5285_v3 = vadd.f32 %v5284_v1, %v5283_v54  ;;  %p8197_p4 = pnand %p8196_p3, %p8190_p0 }
0x17b5   :  { %v5246_v15 = vadd.f32 %v5245_v21, %v5244_v7 }
0x17b7   :  { %v5294_v12 = vsel %vm5293_vm15, %v5246_v15, %v5285_v3 }
0x1822   :  { %v5877_v25 = vpop.permute.xlu1 %5876 }
0x1823   :  { %v5894_v6 = vmul.f32 %v6656_v35, %v5877_v25 }
0x1824   :  { %v5882_v20 = vpop.permute.xlu0 %5881 }
0x1825   :  { %v5895_v33 = vmul.f32 %v6657_v40, %v5882_v20  ;;  %v5898_v9 = vsel %vm434_vm6, %v5894_v6, 0.0 }
0x1826   :  { %v5887_v37 = vpop.permute.xlu1 %5886 }
0x1827   :  { %v5899_v49 = vsel %vm434_vm6, %v5895_v33, 0.0  ;;  %v5896_v42 = vmul.f32 %v6658_v2, %v5887_v37 }
0x1828   :  { %v5900_v46 = vadd.f32 %v5899_v49, %v5898_v9  ;;  %v5892_v45 = vpop.permute.xlu0 %5891 }
0x1829   :  { %v5901_v59 = vsel %vm434_vm6, %v5896_v42, 0.0  ;;  %v5897_v0 = vmul.f32 %v6659_v26, %v5892_v45 }
0x182a   :  { %v5902_v14 = vadd.f32 %v5901_v59, %v5900_v46  ;;  %v6215_v28 = vpop.permute.xlu1 %6214 }
0x182b   :  { %v5903_v32 = vsel %vm434_vm6, %v5897_v0, 0.0  ;;  %v6225_v51 = vsel %vm434_vm6, %v5294_v12, %v6215_v28  ;;  %vm5911_vm6 = vcmask 253952  }
0x182c   :  { %v5904_v18 = vadd.f32 %v5903_v32, %v5902_v14  ;;  %v6219_v23 = vpop.permute.xlu0 %6218 }
0x182d   :  { %v6226_v63 = vsel %vm3070_vm9, %v6225_v51, %v6219_v23 }
0x182e   :  { %v5905_v17 = vrot.slane %v5904_v18, 4  ;;  %v6223_v55 = vpop.permute.xlu1 %6222 }
0x182f   :  { %v6228_v56 = vsel %vm6227_vm8, %v6226_v63, %v6223_v55 }
0x1830   :  { %v5906_v48 = vadd.f32 %v5905_v17, %v5904_v18  ;;  %v6231_v34 = vcombine.low %v6228_v56, %v9725_v11 }
0x1832   :  { %v5907_v53 = vrot.slane %v5906_v48, 2  ;;  %v6238_v61 = vrot.slane %v6231_v34, %v6237_v10 }
0x1834   :  { %v5908_v19 = vadd.f32 %v5907_v53, %v5906_v48  ;;  %6242 = vst.msk [vmem:[#allocation20] sm:$0xf] %vm6241_vm11, %v6238_v61 }
0x1836   :  { %v5909_v8 = vrot.slane %v5908_v19, 1 }
0x1838   :  { %v5910_v38 = vadd.f32 %v5909_v8, %v5908_v19 }
0x183a   :  { %5912 = vst.msk [vmem:[#allocation17] sm:$0x1] %vm5911_vm6, %v5910_v38 }
0x183b   :  { %8200 = shalt.err (!%p8197_p4)
}
0x183c   :  { %s9969_s25 = sld [smem:[#allocation71_spill]] }
0x1842   :  { %s8201_s10 = scalar_lea.hbm %s9969_s25, 16 }
0x1843   :  { %p8202_p5 = scmp.ne.s32.totalorder %s9969_s25, %s8201_s10  ;;  %p8205_p6 = scmp.lt.u32.totalorder %s8201_s10, %s9969_s25 }
0x1845   :  { %p8207_p7 = pnand %p8205_p6, %p8202_p5 }
0x1847   :  { %8210 = shalt.err (!%p8207_p7)
}
0x1848   :  { %6252 = dma.vmem_to_hbm [thread:$0]  %s6250_s28, 16, %s9969_s25, [#allocation7]   ;;  %v6669_v11 = vld [vmem:[#allocation16] ss:$0 sm:$0xff]  ;;  %v6205_v39 = vpop.f32.mrb[208].mxu1  ;;  %vm6211_vm7 = vcmask 254976  }
0x1849   :  { %s8345_s19 = smov [#allocation18]   ;;  %s8346_s11 = smov [#allocation20]   ;;  %v6206_v50 = vadd.f32 %v6669_v11, %v6205_v39  ;;  %v7577_v36 = vpop.f32.mrb[209].mxu1 }
0x184a   :  { %s6259_s3 = sshll.u32 %s8345_s19, 4  ;;  %s6269_s16 = sshll.u32 %s8346_s11, 4  ;;  %v6208_v43 = vpop.f32.mrb[210].mxu1  ;;  %s6260_s3 = int_to_ptr.vmem [resolvable:$true] %s6259_s3  ;;  %s6270_s16 = int_to_ptr.vmem [resolvable:$true] %s6269_s16 }
0x184b   :  { %v7578_v22 = vpop.f32.mrb[211].mxu1  ;;  %6212 = vst.msk [vmem:[#allocation18] sm:$0x3] %vm6211_vm7, %v6206_v50  ;;  %s8211_s29 = scalar_lea.vmem %s6260_s3, 32  ;;  %p8216_p9 = scmp.lt.s32.totalorder %s6260_s3, %s6260_s3 }
0x184c   :  { %p8212_p8 = scmp.ne.s32.totalorder %s6260_s3, %s8211_s29  ;;  %p8217_p10 = scmp.lt.s32.totalorder %s8211_s29, %s8211_s29 }
0x184e   :  { %p8218_p11 = por %p8217_p10, %p8216_p9 }
0x1850   :  { %p8219_p12 = pnand %p8218_p11, %p8212_p8 }
0x1852   :  { %8222 = shalt.err (!%p8219_p12)
}
0x1853   :  { %s8223_s5 = scalar_lea.hbm %s8653_s21, 32 }
0x1854   :  { %p8224_p13 = scmp.ne.s32.totalorder %s8653_s21, %s8223_s5  ;;  %p8227_p0 = scmp.lt.u32.totalorder %s8223_s5, %s8653_s21 }
0x1856   :  { %p8229_p1 = pnand %p8227_p0, %p8224_p13 }
0x1858   :  { %8232 = shalt.err (!%p8229_p1)
}
0x1859   :  { %6262 = dma.vmem_to_hbm [thread:$0]  %s6260_s3, 32, %s8653_s21, [#allocation19]  }
0x185a   :  { %s8233_s9 = scalar_lea.vmem %s6270_s16, 64  ;;  %p8238_p3 = scmp.lt.s32.totalorder %s6270_s16, %s6270_s16 }
0x185b   :  { %p8234_p2 = scmp.ne.s32.totalorder %s6270_s16, %s8233_s9  ;;  %p8239_p4 = scmp.lt.s32.totalorder %s8233_s9, %s8233_s9 }
0x185d   :  { %p8240_p5 = por %p8239_p4, %p8238_p3 }
0x185f   :  { %p8241_p6 = pnand %p8240_p5, %p8234_p2 }
0x1861   :  { %8244 = shalt.err (!%p8241_p6)
}
0x1862   :  { %s8245_s17 = scalar_lea.hbm %s8658_s7, 64 }
0x1863   :  { %p8246_p7 = scmp.ne.s32.totalorder %s8658_s7, %s8245_s17  ;;  %p8249_p8 = scmp.lt.u32.totalorder %s8245_s17, %s8658_s7 }
0x1865   :  { %p8251_p9 = pnand %p8249_p8, %p8246_p7 }
0x1867   :  { %8254 = shalt.err (!%p8251_p9)
}
0x1868   :  { %6272 = dma.vmem_to_hbm [thread:$0]  %s6270_s16, 64, %s8658_s7, [#allocation19]  }
0x1869   :  { %8263 = dma.done.wait [#allocation7], 16  }
0x186a   :  { %8264 = vsyncadd [#allocation7], 4294967280 }
0x186b   :  { %8265 = dma.done.wait [#allocation19], 96  }
0x186c   :  { %8266 = vsyncadd [#allocation19], 4294967200 }
0x186d   :  { %6282 = vsyncpa [#allocation6], 1 }
0x186e   :  { %6283 = vsyncpa [#allocation9], 1 }
0x186f   :  { %6284 = vsyncpa [#allocation12], 1 }
0x1870   :  { %6285 = vsyncpa [#allocation15], 1 }
0x1871   :  { %6286 = vsyncpa [#allocation7], 1 }
0x1872   :  { %6287 = vsyncpa [#allocation19], 1 }

</bundles_post_ra>
